<compile_context>
chip_gen: v5e
topology: v5e:2x2
jax: 0.10.0
libtpu: 0.0.40
codegen_flags: <defaults>
</compile_context>

<pallas_src>
import jax
import jax.numpy as jnp
from jax import lax
from jax.experimental import pallas as pl
from jax.experimental.pallas import tpu as pltpu


# ---------------------------------------------------------------------------
# Fused BasicBlock kernel (factory closes over static shapes / flags)
# ---------------------------------------------------------------------------
def _make_basic_block_kernel(bt, h, w, oh, ow, cin, cout, stride, has_proj):
    m = bt * oh * ow

    def conv3x3_acc(xp, w_ref, ci, s, keep_center):
        """3x3 conv as nine K=ci matmuls with one f32 accumulator.

        xp: (bt, H+2, W+9, ci) bf16, zero halo, interior at [:, 1:, 8:, :].
        w_ref: (9, ci, cout) bf16 Ref.  Returns (acc_f32 (m, cout), center patch or None).
        """
        acc = jnp.zeros((m, cout), jnp.float32)
        center = None
        for dy in range(3):
            for dx in range(3):
                patch = lax.slice(
                    xp,
                    (0, dy, dx + 7, 0),
                    (bt, dy + (oh - 1) * s + 1, dx + 7 + (ow - 1) * s + 1, ci),
                    (1, s, s, 1),
                ).reshape(m, ci)
                acc = acc + jnp.dot(patch, w_ref[dy * 3 + dx],
                                    preferred_element_type=jnp.float32)
                if keep_center and dy == 1 and dx == 1:
                    center = patch
        return acc, center

    def kernel(*refs):
        if has_proj:
            (x_ref, w1_ref, s1_ref, b1_ref, w2_ref, s2_ref, b2_ref,
             ws_ref, ss_ref, bs_ref, o_ref, xp_ref, y1p_ref) = refs
        else:
            (x_ref, w1_ref, s1_ref, b1_ref, w2_ref, s2_ref, b2_ref,
             o_ref, xp_ref, y1p_ref) = refs

        x = x_ref[...]                                           # (bt, h, w, cin) bf16

        # ---- padded x in VMEM: zero only the halo strips, aligned interior at W=8 ----
        xp_ref[:, pl.ds(0, 1), :, :] = jnp.zeros((bt, 1, w + 9, cin), jnp.bfloat16)
        xp_ref[:, pl.ds(h + 1, 1), :, :] = jnp.zeros((bt, 1, w + 9, cin), jnp.bfloat16)
        xp_ref[:, :, pl.ds(0, 8), :] = jnp.zeros((bt, h + 2, 8, cin), jnp.bfloat16)
        xp_ref[:, :, pl.ds(w + 8, 1), :] = jnp.zeros((bt, h + 2, 1, cin), jnp.bfloat16)
        xp_ref[:, pl.ds(1, h), pl.ds(8, w), :] = x

        # ---- conv1 (3x3, stride) + BN1 + ReLU ----------------------------------------
        y1, x_center = conv3x3_acc(xp_ref[...], w1_ref, cin, stride, keep_center=True)
        y1 = jnp.maximum(y1 * s1_ref[...] + b1_ref[...], 0.0)    # (m, cout) f32

        # ---- keep padded y1 in VMEM (bf16) — no HBM round trip -----------------------
        y1p_ref[:, pl.ds(0, 1), :, :] = jnp.zeros((bt, 1, ow + 9, cout), jnp.bfloat16)
        y1p_ref[:, pl.ds(oh + 1, 1), :, :] = jnp.zeros((bt, 1, ow + 9, cout), jnp.bfloat16)
        y1p_ref[:, :, pl.ds(0, 8), :] = jnp.zeros((bt, oh + 2, 8, cout), jnp.bfloat16)
        y1p_ref[:, :, pl.ds(ow + 8, 1), :] = jnp.zeros((bt, oh + 2, 1, cout), jnp.bfloat16)
        y1p_ref[:, pl.ds(1, oh), pl.ds(8, ow), :] = (
            y1.reshape(bt, oh, ow, cout).astype(jnp.bfloat16))

        # ---- conv2 (3x3, stride 1) + BN2 ---------------------------------------------
        y2, _ = conv3x3_acc(y1p_ref[...], w2_ref, cout, 1, keep_center=False)
        y2 = y2 * s2_ref[...] + b2_ref[...]

        # ---- shortcut ------------------------------------------------------------------
        if has_proj:
            # x_center is exactly x[:, 0::stride, 0::stride, :] (bf16) — reused from conv1.
            sc = jnp.dot(x_center, ws_ref[...], preferred_element_type=jnp.float32)
            sc = sc * ss_ref[...] + bs_ref[...]
        else:
            sc = x.reshape(m, cout).astype(jnp.float32)          # cin == cout, stride == 1

        o_ref[...] = jnp.maximum(y2 + sc, 0.0).reshape(bt, oh, ow, cout)

    return kernel


# ---------------------------------------------------------------------------
# Generation-aware VMEM budget and batch-tile selection
# ---------------------------------------------------------------------------
def _vmem_budget_bytes():
    cap = 64 * 1024 * 1024                       # safe fallback (v7x physical VMEM)
    try:
        info = pltpu.get_tpu_info()
        cap = int(getattr(info, "vmem_capacity_bytes", cap))
    except Exception:
        pass
    # leave headroom for compiler-internal scratch; cap well below physical
    return min((cap * 3) // 4, 96 * 1024 * 1024)


def _choose_batch_tile(n, h, w, oh, ow, cin, cout, has_proj, budget):
    weights = (9 * cin * cout + 9 * cout * cout) * 2 + 4 * cout * 4
    if has_proj:
        weights += cin * cout * 2 + 2 * cout * 4

    def est(bt):
        x_blk = bt * h * w * cin * 2                       # bf16 input block
        o_blk = bt * oh * ow * cout * 4                    # f32 output block
        xp = bt * (h + 2) * (w + 9) * cin * 2              # padded-x scratch
        y1p = bt * (oh + 2) * (ow + 9) * cout * 2          # padded-y1 scratch
        temps = 2 * (xp + y1p) + 4 * bt * oh * ow * max(cin, cout) * 4
        return 2 * (x_blk + o_blk) + xp + y1p + weights + temps

    best = 1
    for bt in range(1, n + 1):
        if n % bt:
            continue
        if est(bt) > budget:
            continue
        if n // bt < min(2, n):      # keep >= 2 grid steps so both v7x cores get work
            continue
        best = bt
    return best


# ---------------------------------------------------------------------------
# Wrappers: NHWC entry point + torch-compatible NCHW wrapper
# ---------------------------------------------------------------------------
def basic_block_forward_nhwc(x_nhwc, params, stride=1):
    n, h, w, cin = x_nhwc.shape
    cout = params["scale1"].shape[-1]
    has_proj = params["has_proj"]
    oh = (h + 2 - 3) // stride + 1
    ow = (w + 2 - 3) // stride + 1

    budget = _vmem_budget_bytes()
    bt = _choose_batch_tile(n, h, w, oh, ow, cin, cout, has_proj, budget)

    x = x_nhwc.astype(jnp.bfloat16)                      # bf16 activation DMA

    in_specs = [
        pl.BlockSpec((bt, h, w, cin), lambda i: (i, 0, 0, 0)),   # x: B_t images / step
        pl.BlockSpec((9, cin, cout), lambda i: (0, 0, 0)),       # w1  (VMEM-resident)
        pl.BlockSpec((1, cout), lambda i: (0, 0)),               # scale1
        pl.BlockSpec((1, cout), lambda i: (0, 0)),               # bias1
        pl.BlockSpec((9, cout, cout), lambda i: (0, 0, 0)),      # w2  (VMEM-resident)
        pl.BlockSpec((1, cout), lambda i: (0, 0)),               # scale2
        pl.BlockSpec((1, cout), lambda i: (0, 0)),               # bias2
    ]
    args = [x, params["w1"], params["scale1"], params["bias1"],
            params["w2"], params["scale2"], params["bias2"]]
    if has_proj:
        in_specs += [
            pl.BlockSpec((cin, cout), lambda i: (0, 0)),         # ws  (VMEM-resident)
            pl.BlockSpec((1, cout), lambda i: (0, 0)),           # scale_s
            pl.BlockSpec((1, cout), lambda i: (0, 0)),           # bias_s
        ]
        args += [params["ws"], params["scale_s"], params["bias_s"]]

    return pl.pallas_call(
        _make_basic_block_kernel(bt, h, w, oh, ow, cin, cout, stride, has_proj),
        out_shape=jax.ShapeDtypeStruct((n, oh, ow, cout), jnp.float32),
        grid_spec=pltpu.PrefetchScalarGridSpec(
            num_scalar_prefetch=0,
            grid=(n // bt,),
            in_specs=in_specs,
            out_specs=pl.BlockSpec((bt, oh, ow, cout), lambda i: (i, 0, 0, 0)),
            scratch_shapes=[
                pltpu.VMEM((bt, h + 2, w + 9, cin), jnp.bfloat16),     # padded x
                pltpu.VMEM((bt, oh + 2, ow + 9, cout), jnp.bfloat16),  # padded y1
            ]),
        compiler_params=pltpu.CompilerParams(
            dimension_semantics=("parallel",),
            vmem_limit_bytes=int(budget)),
    )(*args)


def basic_block_forward(x_nchw, params, stride=1):
    """torch-compatible NCHW wrapper (layout plumbing only)."""
    x_nhwc = jnp.transpose(x_nchw, (0, 2, 3, 1))
    out_nhwc = basic_block_forward_nhwc(x_nhwc, params, stride)
    return jnp.transpose(out_nhwc, (0, 3, 1, 2))


# ---------------------------------------------------------------------------
# Deterministic parameter construction (PyTorch-shaped, eval-mode BN folded)
# ---------------------------------------------------------------------------
def init_params(key, cin, cout, stride):
    ks = jax.random.split(key, 9)
    eps = 1e-5
    has_proj = (stride != 1) or (cin != cout)

    def bn_fold(gamma, beta):
        # eval-mode BN with running_mean = 0, running_var = 1
        scale = gamma / jnp.sqrt(1.0 + eps)
        return scale.reshape(1, -1), beta.reshape(1, -1)

    w1_oihw = 0.1 * jax.random.normal(ks[0], (cout, cin, 3, 3), jnp.float32)
    w2_oihw = 0.1 * jax.random.normal(ks[1], (cout, cout, 3, 3), jnp.float32)
    g1 = 1.0 + 0.1 * jax.random.normal(ks[2], (cout,), jnp.float32)
    b1 = 0.1 * jax.random.normal(ks[3], (cout,), jnp.float32)
    g2 = 1.0 + 0.1 * jax.random.normal(ks[4], (cout,), jnp.float32)
    b2 = 0.1 * jax.random.normal(ks[5], (cout,), jnp.float32)

    scale1, bias1 = bn_fold(g1, b1)
    scale2, bias2 = bn_fold(g2, b2)

    params = {
        # kernel-ready: per-tap HWIO as (9, Cin, Cout), bf16 for the MXU
        "w1": jnp.transpose(w1_oihw, (2, 3, 1, 0)).reshape(9, cin, cout).astype(jnp.bfloat16),
        "w2": jnp.transpose(w2_oihw, (2, 3, 1, 0)).reshape(9, cout, cout).astype(jnp.bfloat16),
        "scale1": scale1, "bias1": bias1,
        "scale2": scale2, "bias2": bias2,
        # raw (for the plain-JAX reference)
        "w1_oihw": w1_oihw, "w2_oihw": w2_oihw,
        "g1": g1, "b1": b1, "g2": g2, "b2": b2,
        "has_proj": has_proj, "eps": eps,
    }
    if has_proj:
        ws_oihw = 0.1 * jax.random.normal(ks[6], (cout, cin, 1, 1), jnp.float32)
        gs = 1.0 + 0.1 * jax.random.normal(ks[7], (cout,), jnp.float32)
        bs = 0.1 * jax.random.normal(ks[8], (cout,), jnp.float32)
        scale_s, bias_s = bn_fold(gs, bs)
        params.update({
            "ws": jnp.transpose(ws_oihw, (2, 3, 1, 0)).reshape(cin, cout).astype(jnp.bfloat16),
            "scale_s": scale_s, "bias_s": bias_s,
            "ws_oihw": ws_oihw, "gs": gs, "bs": bs,
        })
    return params


def ref_forward(x_nchw, p, stride):
    """Pure-JAX f32 reference (eval-mode BN), NCHW."""
    dn = ("NCHW", "OIHW", "NCHW")
    eps = p["eps"]

    def bn(y, gamma, beta):
        scale = (gamma / jnp.sqrt(1.0 + eps)).reshape(1, -1, 1, 1)
        return y * scale + beta.reshape(1, -1, 1, 1)

    y = lax.conv_general_dilated(x_nchw, p["w1_oihw"], (stride, stride),
                                 ((1, 1), (1, 1)), dimension_numbers=dn)
    y = jax.nn.relu(bn(y, p["g1"], p["b1"]))
    y = lax.conv_general_dilated(y, p["w2_oihw"], (1, 1),
                                 ((1, 1), (1, 1)), dimension_numbers=dn)
    y = bn(y, p["g2"], p["b2"])
    if p["has_proj"]:
        sc = lax.conv_general_dilated(x_nchw, p["ws_oihw"], (stride, stride),
                                      ((0, 0), (0, 0)), dimension_numbers=dn)
        sc = bn(sc, p["gs"], p["bs"])
    else:
        sc = x_nchw
    return jax.nn.relu(y + sc)


if __name__ == "__main__":
    key = jax.random.PRNGKey(0)
    kx1, kp1, kx2, kp2, kx3, kp3 = jax.random.split(key, 6)

    tol = 5e-2  # bf16 activations + bf16 matmul operands vs f32 reference

    # Case 1: Cin != Cout, stride 1 -> projection shortcut (1x1 conv + BN)
    N, Cin, H, W, Cout, stride = 2, 4, 16, 16, 8, 1
    x1 = jax.random.normal(kx1, (N, Cin, H, W), jnp.float32)
    p1 = init_params(kp1, Cin, Cout, stride)
    out1 = jax.block_until_ready(basic_block_forward(x1, p1, stride=stride))
    assert out1.shape == (N, Cout, H, W), out1.shape
    err1 = float(jnp.max(jnp.abs(out1 - ref_forward(x1, p1, stride))))

    # Case 2: Cin == Cout, stride 1 -> identity shortcut (no projection params DMA'd)
    x2 = jax.random.normal(kx2, (N, Cout, H, W), jnp.float32)
    p2 = init_params(kp2, Cout, Cout, 1)
    out2 = jax.block_until_ready(basic_block_forward(x2, p2, stride=1))
    assert out2.shape == (N, Cout, H, W), out2.shape
    err2 = float(jnp.max(jnp.abs(out2 - ref_forward(x2, p2, 1))))

    # Case 3: stride 2 projection (downsampling block)
    x3 = jax.random.normal(kx3, (N, Cin, H, W), jnp.float32)
    p3 = init_params(kp3, Cin, Cout, 2)
    out3 = jax.block_until_ready(basic_block_forward(x3, p3, stride=2))
    assert out3.shape == (N, Cout, H // 2, W // 2), out3.shape
    err3 = float(jnp.max(jnp.abs(out3 - ref_forward(x3, p3, 2))))

    if err1 > tol or err2 > tol or err3 > tol:
        raise AssertionError(
            f"Pallas output mismatch vs JAX reference: {err1=:.3e} {err2=:.3e} {err3=:.3e}")
    print("KERNEL_OK")
</pallas_src>

<mosaic_0001>
module attributes {stable_mosaic.version = 11 : i64} {
  func.func @kernel(%arg0: i32, %arg1: memref<1x16x16x4xbf16, #tpu.memory_space<vmem>>, %arg2: memref<9x4x8xbf16, #tpu.memory_space<vmem>>, %arg3: memref<1x8xf32, #tpu.memory_space<vmem>>, %arg4: memref<1x8xf32, #tpu.memory_space<vmem>>, %arg5: memref<9x8x8xbf16, #tpu.memory_space<vmem>>, %arg6: memref<1x8xf32, #tpu.memory_space<vmem>>, %arg7: memref<1x8xf32, #tpu.memory_space<vmem>>, %arg8: memref<4x8xbf16, #tpu.memory_space<vmem>>, %arg9: memref<1x8xf32, #tpu.memory_space<vmem>>, %arg10: memref<1x8xf32, #tpu.memory_space<vmem>>, %arg11: memref<1x16x16x8xf32, #tpu.memory_space<vmem>>, %arg12: memref<1x18x25x4xbf16, #tpu.memory_space<vmem>>, %arg13: memref<1x18x25x8xbf16, #tpu.memory_space<vmem>>) attributes {dimension_semantics = [#tpu.dimension_semantics<parallel>], iteration_bounds = array<i64: 2>, scalar_prefetch = 0 : i64, scratch_operands = 2 : i64, tpu.core_type = #tpu.core_type<tc>, window_params = [{transform_indices = @transform_0, window_bounds = array<i64: 1, 16, 16, 4>}, {pipeline_mode = #tpu.pipeline_mode<synchronous>, transform_indices = @transform_1, window_bounds = array<i64: 9, 4, 8>}, {pipeline_mode = #tpu.pipeline_mode<synchronous>, transform_indices = @transform_2, window_bounds = array<i64: 1, 8>}, {pipeline_mode = #tpu.pipeline_mode<synchronous>, transform_indices = @transform_3, window_bounds = array<i64: 1, 8>}, {pipeline_mode = #tpu.pipeline_mode<synchronous>, transform_indices = @transform_4, window_bounds = array<i64: 9, 8, 8>}, {pipeline_mode = #tpu.pipeline_mode<synchronous>, transform_indices = @transform_5, window_bounds = array<i64: 1, 8>}, {pipeline_mode = #tpu.pipeline_mode<synchronous>, transform_indices = @transform_6, window_bounds = array<i64: 1, 8>}, {pipeline_mode = #tpu.pipeline_mode<synchronous>, transform_indices = @transform_7, window_bounds = array<i64: 4, 8>}, {pipeline_mode = #tpu.pipeline_mode<synchronous>, transform_indices = @transform_8, window_bounds = array<i64: 1, 8>}, {pipeline_mode = #tpu.pipeline_mode<synchronous>, transform_indices = @transform_9, window_bounds = array<i64: 1, 8>}, {transform_indices = @transform_10, window_bounds = array<i64: 1, 16, 16, 8>}]} {
    %c0 = arith.constant 0 : index
    %c0_0 = arith.constant 0 : index
    %c0_1 = arith.constant 0 : index
    %c0_2 = arith.constant 0 : index
    %0 = vector.load %arg1[%c0, %c0_0, %c0_1, %c0_2] : memref<1x16x16x4xbf16, #tpu.memory_space<vmem>>, vector<1x16x16x4xbf16>
    %cst = arith.constant 0.000000e+00 : bf16
    %1 = vector.broadcast %cst : bf16 to vector<1x1x25x4xbf16>
    %c0_3 = arith.constant 0 : index
    %c0_4 = arith.constant 0 : index
    %c0_5 = arith.constant 0 : index
    %c0_6 = arith.constant 0 : index
    %2 = vector.load %arg12[%c0_3, %c0_4, %c0_5, %c0_6] : memref<1x18x25x4xbf16, #tpu.memory_space<vmem>>, vector<1x1x25x4xbf16>
    tpu.vector_store %arg12[%c0_3, %c0_4, %c0_5, %c0_6], %1 {strides = array<i32>} : memref<1x18x25x4xbf16, #tpu.memory_space<vmem>>, vector<1x1x25x4xbf16>,
    %cst_7 = arith.constant 0.000000e+00 : bf16
    %3 = vector.broadcast %cst_7 : bf16 to vector<1x1x25x4xbf16>
    %c0_8 = arith.constant 0 : index
    %c17 = arith.constant 17 : index
    %c0_9 = arith.constant 0 : index
    %c0_10 = arith.constant 0 : index
    %4 = vector.load %arg12[%c0_8, %c17, %c0_9, %c0_10] : memref<1x18x25x4xbf16, #tpu.memory_space<vmem>>, vector<1x1x25x4xbf16>
    tpu.vector_store %arg12[%c0_8, %c17, %c0_9, %c0_10], %3 {strides = array<i32>} : memref<1x18x25x4xbf16, #tpu.memory_space<vmem>>, vector<1x1x25x4xbf16>,
    %cst_11 = arith.constant 0.000000e+00 : bf16
    %5 = vector.broadcast %cst_11 : bf16 to vector<1x18x8x4xbf16>
    %c0_12 = arith.constant 0 : index
    %c0_13 = arith.constant 0 : index
    %c0_14 = arith.constant 0 : index
    %c0_15 = arith.constant 0 : index
    %6 = vector.load %arg12[%c0_12, %c0_13, %c0_14, %c0_15] : memref<1x18x25x4xbf16, #tpu.memory_space<vmem>>, vector<1x18x8x4xbf16>
    tpu.vector_store %arg12[%c0_12, %c0_13, %c0_14, %c0_15], %5 {strides = array<i32>} : memref<1x18x25x4xbf16, #tpu.memory_space<vmem>>, vector<1x18x8x4xbf16>,
    %cst_16 = arith.constant 0.000000e+00 : bf16
    %7 = vector.broadcast %cst_16 : bf16 to vector<1x18x1x4xbf16>
    %c0_17 = arith.constant 0 : index
    %c0_18 = arith.constant 0 : index
    %c24 = arith.constant 24 : index
    %c0_19 = arith.constant 0 : index
    %8 = vector.load %arg12[%c0_17, %c0_18, %c24, %c0_19] : memref<1x18x25x4xbf16, #tpu.memory_space<vmem>>, vector<1x18x1x4xbf16>
    tpu.vector_store %arg12[%c0_17, %c0_18, %c24, %c0_19], %7 {strides = array<i32>} : memref<1x18x25x4xbf16, #tpu.memory_space<vmem>>, vector<1x18x1x4xbf16>,
    %c0_20 = arith.constant 0 : index
    %c1 = arith.constant 1 : index
    %c8 = arith.constant 8 : index
    %c0_21 = arith.constant 0 : index
    %9 = vector.load %arg12[%c0_20, %c1, %c8, %c0_21] : memref<1x18x25x4xbf16, #tpu.memory_space<vmem>>, vector<1x16x16x4xbf16>
    tpu.vector_store %arg12[%c0_20, %c1, %c8, %c0_21], %0 {strides = array<i32>} : memref<1x18x25x4xbf16, #tpu.memory_space<vmem>>, vector<1x16x16x4xbf16>,
    %c0_22 = arith.constant 0 : index
    %c0_23 = arith.constant 0 : index
    %c0_24 = arith.constant 0 : index
    %c0_25 = arith.constant 0 : index
    %10 = vector.load %arg12[%c0_22, %c0_23, %c0_24, %c0_25] : memref<1x18x25x4xbf16, #tpu.memory_space<vmem>>, vector<1x18x25x4xbf16>
    %cst_26 = arith.constant 0.000000e+00 : f32
    %11 = vector.broadcast %cst_26 : f32 to vector<256x8xf32>
    %12 = vector.extract_strided_slice %10 {offsets = [0, 0, 7, 0], sizes = [1, 16, 16, 4], strides = [1, 1, 1, 1]} : vector<1x18x25x4xbf16> to vector<1x16x16x4xbf16>
    %13 = vector.shape_cast %12 : vector<1x16x16x4xbf16> to vector<256x4xbf16>
    %c0_27 = arith.constant 0 : index
    %c0_28 = arith.constant 0 : index
    %c0_29 = arith.constant 0 : index
    %14 = vector.load %arg2[%c0_27, %c0_28, %c0_29] : memref<9x4x8xbf16, #tpu.memory_space<vmem>>, vector<1x4x8xbf16>
    %15 = vector.shape_cast %14 : vector<1x4x8xbf16> to vector<4x8xbf16>
    %cst_30 = arith.constant dense<0.000000e+00> : vector<256x8xf32>
    %16 = tpu.matmul %13, %15, %cst_30 {dimension_numbers = #tpu.dot_dimension_numbers<[1], [0], [0], [1], [0, 0, 1, 1], [], []>} : vector<256x4xbf16>, vector<4x8xbf16>, vector<256x8xf32> -> vector<256x8xf32>
    %17 = arith.addf %11, %16 : vector<256x8xf32>
    %18 = vector.extract_strided_slice %10 {offsets = [0, 0, 8, 0], sizes = [1, 16, 16, 4], strides = [1, 1, 1, 1]} : vector<1x18x25x4xbf16> to vector<1x16x16x4xbf16>
    %19 = vector.shape_cast %18 : vector<1x16x16x4xbf16> to vector<256x4xbf16>
    %c1_31 = arith.constant 1 : index
    %c0_32 = arith.constant 0 : index
    %c0_33 = arith.constant 0 : index
    %20 = vector.load %arg2[%c1_31, %c0_32, %c0_33] : memref<9x4x8xbf16, #tpu.memory_space<vmem>>, vector<1x4x8xbf16>
    %21 = vector.shape_cast %20 : vector<1x4x8xbf16> to vector<4x8xbf16>
    %cst_34 = arith.constant dense<0.000000e+00> : vector<256x8xf32>
    %22 = tpu.matmul %19, %21, %cst_34 {dimension_numbers = #tpu.dot_dimension_numbers<[1], [0], [0], [1], [0, 0, 1, 1], [], []>} : vector<256x4xbf16>, vector<4x8xbf16>, vector<256x8xf32> -> vector<256x8xf32>
    %23 = arith.addf %17, %22 : vector<256x8xf32>
    %24 = vector.extract_strided_slice %10 {offsets = [0, 0, 9, 0], sizes = [1, 16, 16, 4], strides = [1, 1, 1, 1]} : vector<1x18x25x4xbf16> to vector<1x16x16x4xbf16>
    %25 = vector.shape_cast %24 : vector<1x16x16x4xbf16> to vector<256x4xbf16>
    %c2 = arith.constant 2 : index
    %c0_35 = arith.constant 0 : index
    %c0_36 = arith.constant 0 : index
    %26 = vector.load %arg2[%c2, %c0_35, %c0_36] : memref<9x4x8xbf16, #tpu.memory_space<vmem>>, vector<1x4x8xbf16>
    %27 = vector.shape_cast %26 : vector<1x4x8xbf16> to vector<4x8xbf16>
    %cst_37 = arith.constant dense<0.000000e+00> : vector<256x8xf32>
    %28 = tpu.matmul %25, %27, %cst_37 {dimension_numbers = #tpu.dot_dimension_numbers<[1], [0], [0], [1], [0, 0, 1, 1], [], []>} : vector<256x4xbf16>, vector<4x8xbf16>, vector<256x8xf32> -> vector<256x8xf32>
    %29 = arith.addf %23, %28 : vector<256x8xf32>
    %30 = vector.extract_strided_slice %10 {offsets = [0, 1, 7, 0], sizes = [1, 16, 16, 4], strides = [1, 1, 1, 1]} : vector<1x18x25x4xbf16> to vector<1x16x16x4xbf16>
    %31 = vector.shape_cast %30 : vector<1x16x16x4xbf16> to vector<256x4xbf16>
    %c3 = arith.constant 3 : index
    %c0_38 = arith.constant 0 : index
    %c0_39 = arith.constant 0 : index
    %32 = vector.load %arg2[%c3, %c0_38, %c0_39] : memref<9x4x8xbf16, #tpu.memory_space<vmem>>, vector<1x4x8xbf16>
    %33 = vector.shape_cast %32 : vector<1x4x8xbf16> to vector<4x8xbf16>
    %cst_40 = arith.constant dense<0.000000e+00> : vector<256x8xf32>
    %34 = tpu.matmul %31, %33, %cst_40 {dimension_numbers = #tpu.dot_dimension_numbers<[1], [0], [0], [1], [0, 0, 1, 1], [], []>} : vector<256x4xbf16>, vector<4x8xbf16>, vector<256x8xf32> -> vector<256x8xf32>
    %35 = arith.addf %29, %34 : vector<256x8xf32>
    %36 = vector.extract_strided_slice %10 {offsets = [0, 1, 8, 0], sizes = [1, 16, 16, 4], strides = [1, 1, 1, 1]} : vector<1x18x25x4xbf16> to vector<1x16x16x4xbf16>
    %37 = vector.shape_cast %36 : vector<1x16x16x4xbf16> to vector<256x4xbf16>
    %c4 = arith.constant 4 : index
    %c0_41 = arith.constant 0 : index
    %c0_42 = arith.constant 0 : index
    %38 = vector.load %arg2[%c4, %c0_41, %c0_42] : memref<9x4x8xbf16, #tpu.memory_space<vmem>>, vector<1x4x8xbf16>
    %39 = vector.shape_cast %38 : vector<1x4x8xbf16> to vector<4x8xbf16>
    %cst_43 = arith.constant dense<0.000000e+00> : vector<256x8xf32>
    %40 = tpu.matmul %37, %39, %cst_43 {dimension_numbers = #tpu.dot_dimension_numbers<[1], [0], [0], [1], [0, 0, 1, 1], [], []>} : vector<256x4xbf16>, vector<4x8xbf16>, vector<256x8xf32> -> vector<256x8xf32>
    %41 = arith.addf %35, %40 : vector<256x8xf32>
    %42 = vector.extract_strided_slice %10 {offsets = [0, 1, 9, 0], sizes = [1, 16, 16, 4], strides = [1, 1, 1, 1]} : vector<1x18x25x4xbf16> to vector<1x16x16x4xbf16>
    %43 = vector.shape_cast %42 : vector<1x16x16x4xbf16> to vector<256x4xbf16>
    %c5 = arith.constant 5 : index
    %c0_44 = arith.constant 0 : index
    %c0_45 = arith.constant 0 : index
    %44 = vector.load %arg2[%c5, %c0_44, %c0_45] : memref<9x4x8xbf16, #tpu.memory_space<vmem>>, vector<1x4x8xbf16>
    %45 = vector.shape_cast %44 : vector<1x4x8xbf16> to vector<4x8xbf16>
    %cst_46 = arith.constant dense<0.000000e+00> : vector<256x8xf32>
    %46 = tpu.matmul %43, %45, %cst_46 {dimension_numbers = #tpu.dot_dimension_numbers<[1], [0], [0], [1], [0, 0, 1, 1], [], []>} : vector<256x4xbf16>, vector<4x8xbf16>, vector<256x8xf32> -> vector<256x8xf32>
    %47 = arith.addf %41, %46 : vector<256x8xf32>
    %48 = vector.extract_strided_slice %10 {offsets = [0, 2, 7, 0], sizes = [1, 16, 16, 4], strides = [1, 1, 1, 1]} : vector<1x18x25x4xbf16> to vector<1x16x16x4xbf16>
    %49 = vector.shape_cast %48 : vector<1x16x16x4xbf16> to vector<256x4xbf16>
    %c6 = arith.constant 6 : index
    %c0_47 = arith.constant 0 : index
    %c0_48 = arith.constant 0 : index
    %50 = vector.load %arg2[%c6, %c0_47, %c0_48] : memref<9x4x8xbf16, #tpu.memory_space<vmem>>, vector<1x4x8xbf16>
    %51 = vector.shape_cast %50 : vector<1x4x8xbf16> to vector<4x8xbf16>
    %cst_49 = arith.constant dense<0.000000e+00> : vector<256x8xf32>
    %52 = tpu.matmul %49, %51, %cst_49 {dimension_numbers = #tpu.dot_dimension_numbers<[1], [0], [0], [1], [0, 0, 1, 1], [], []>} : vector<256x4xbf16>, vector<4x8xbf16>, vector<256x8xf32> -> vector<256x8xf32>
    %53 = arith.addf %47, %52 : vector<256x8xf32>
    %54 = vector.extract_strided_slice %10 {offsets = [0, 2, 8, 0], sizes = [1, 16, 16, 4], strides = [1, 1, 1, 1]} : vector<1x18x25x4xbf16> to vector<1x16x16x4xbf16>
    %55 = vector.shape_cast %54 : vector<1x16x16x4xbf16> to vector<256x4xbf16>
    %c7 = arith.constant 7 : index
    %c0_50 = arith.constant 0 : index
    %c0_51 = arith.constant 0 : index
    %56 = vector.load %arg2[%c7, %c0_50, %c0_51] : memref<9x4x8xbf16, #tpu.memory_space<vmem>>, vector<1x4x8xbf16>
    %57 = vector.shape_cast %56 : vector<1x4x8xbf16> to vector<4x8xbf16>
    %cst_52 = arith.constant dense<0.000000e+00> : vector<256x8xf32>
    %58 = tpu.matmul %55, %57, %cst_52 {dimension_numbers = #tpu.dot_dimension_numbers<[1], [0], [0], [1], [0, 0, 1, 1], [], []>} : vector<256x4xbf16>, vector<4x8xbf16>, vector<256x8xf32> -> vector<256x8xf32>
    %59 = arith.addf %53, %58 : vector<256x8xf32>
    %60 = vector.extract_strided_slice %10 {offsets = [0, 2, 9, 0], sizes = [1, 16, 16, 4], strides = [1, 1, 1, 1]} : vector<1x18x25x4xbf16> to vector<1x16x16x4xbf16>
    %61 = vector.shape_cast %60 : vector<1x16x16x4xbf16> to vector<256x4xbf16>
    %c8_53 = arith.constant 8 : index
    %c0_54 = arith.constant 0 : index
    %c0_55 = arith.constant 0 : index
    %62 = vector.load %arg2[%c8_53, %c0_54, %c0_55] : memref<9x4x8xbf16, #tpu.memory_space<vmem>>, vector<1x4x8xbf16>
    %63 = vector.shape_cast %62 : vector<1x4x8xbf16> to vector<4x8xbf16>
    %cst_56 = arith.constant dense<0.000000e+00> : vector<256x8xf32>
    %64 = tpu.matmul %61, %63, %cst_56 {dimension_numbers = #tpu.dot_dimension_numbers<[1], [0], [0], [1], [0, 0, 1, 1], [], []>} : vector<256x4xbf16>, vector<4x8xbf16>, vector<256x8xf32> -> vector<256x8xf32>
    %65 = arith.addf %59, %64 : vector<256x8xf32>
    %c0_57 = arith.constant 0 : index
    %c0_58 = arith.constant 0 : index
    %66 = vector.load %arg3[%c0_57, %c0_58] : memref<1x8xf32, #tpu.memory_space<vmem>>, vector<1x8xf32>
    %67 = vector.broadcast %66 : vector<1x8xf32> to vector<256x8xf32>
    %68 = arith.mulf %65, %67 : vector<256x8xf32>
    %c0_59 = arith.constant 0 : index
    %c0_60 = arith.constant 0 : index
    %69 = vector.load %arg4[%c0_59, %c0_60] : memref<1x8xf32, #tpu.memory_space<vmem>>, vector<1x8xf32>
    %70 = vector.broadcast %69 : vector<1x8xf32> to vector<256x8xf32>
    %71 = arith.addf %68, %70 : vector<256x8xf32>
    %cst_61 = arith.constant 0.000000e+00 : f32
    %72 = vector.broadcast %cst_61 : f32 to vector<256x8xf32>
    %73 = arith.maximumf %71, %72 : vector<256x8xf32>
    %cst_62 = arith.constant 0.000000e+00 : bf16
    %74 = vector.broadcast %cst_62 : bf16 to vector<1x1x25x8xbf16>
    %c0_63 = arith.constant 0 : index
    %c0_64 = arith.constant 0 : index
    %c0_65 = arith.constant 0 : index
    %c0_66 = arith.constant 0 : index
    %75 = vector.load %arg13[%c0_63, %c0_64, %c0_65, %c0_66] : memref<1x18x25x8xbf16, #tpu.memory_space<vmem>>, vector<1x1x25x8xbf16>
    tpu.vector_store %arg13[%c0_63, %c0_64, %c0_65, %c0_66], %74 {strides = array<i32>} : memref<1x18x25x8xbf16, #tpu.memory_space<vmem>>, vector<1x1x25x8xbf16>,
    %cst_67 = arith.constant 0.000000e+00 : bf16
    %76 = vector.broadcast %cst_67 : bf16 to vector<1x1x25x8xbf16>
    %c0_68 = arith.constant 0 : index
    %c17_69 = arith.constant 17 : index
    %c0_70 = arith.constant 0 : index
    %c0_71 = arith.constant 0 : index
    %77 = vector.load %arg13[%c0_68, %c17_69, %c0_70, %c0_71] : memref<1x18x25x8xbf16, #tpu.memory_space<vmem>>, vector<1x1x25x8xbf16>
    tpu.vector_store %arg13[%c0_68, %c17_69, %c0_70, %c0_71], %76 {strides = array<i32>} : memref<1x18x25x8xbf16, #tpu.memory_space<vmem>>, vector<1x1x25x8xbf16>,
    %cst_72 = arith.constant 0.000000e+00 : bf16
    %78 = vector.broadcast %cst_72 : bf16 to vector<1x18x8x8xbf16>
    %c0_73 = arith.constant 0 : index
    %c0_74 = arith.constant 0 : index
    %c0_75 = arith.constant 0 : index
    %c0_76 = arith.constant 0 : index
    %79 = vector.load %arg13[%c0_73, %c0_74, %c0_75, %c0_76] : memref<1x18x25x8xbf16, #tpu.memory_space<vmem>>, vector<1x18x8x8xbf16>
    tpu.vector_store %arg13[%c0_73, %c0_74, %c0_75, %c0_76], %78 {strides = array<i32>} : memref<1x18x25x8xbf16, #tpu.memory_space<vmem>>, vector<1x18x8x8xbf16>,
    %cst_77 = arith.constant 0.000000e+00 : bf16
    %80 = vector.broadcast %cst_77 : bf16 to vector<1x18x1x8xbf16>
    %c0_78 = arith.constant 0 : index
    %c0_79 = arith.constant 0 : index
    %c24_80 = arith.constant 24 : index
    %c0_81 = arith.constant 0 : index
    %81 = vector.load %arg13[%c0_78, %c0_79, %c24_80, %c0_81] : memref<1x18x25x8xbf16, #tpu.memory_space<vmem>>, vector<1x18x1x8xbf16>
    tpu.vector_store %arg13[%c0_78, %c0_79, %c24_80, %c0_81], %80 {strides = array<i32>} : memref<1x18x25x8xbf16, #tpu.memory_space<vmem>>, vector<1x18x1x8xbf16>,
    %82 = vector.shape_cast %73 : vector<256x8xf32> to vector<1x16x16x8xf32>
    %83 = arith.truncf %82 : vector<1x16x16x8xf32> to vector<1x16x16x8xbf16>
    %c0_82 = arith.constant 0 : index
    %c1_83 = arith.constant 1 : index
    %c8_84 = arith.constant 8 : index
    %c0_85 = arith.constant 0 : index
    %84 = vector.load %arg13[%c0_82, %c1_83, %c8_84, %c0_85] : memref<1x18x25x8xbf16, #tpu.memory_space<vmem>>, vector<1x16x16x8xbf16>
    tpu.vector_store %arg13[%c0_82, %c1_83, %c8_84, %c0_85], %83 {strides = array<i32>} : memref<1x18x25x8xbf16, #tpu.memory_space<vmem>>, vector<1x16x16x8xbf16>,
    %c0_86 = arith.constant 0 : index
    %c0_87 = arith.constant 0 : index
    %c0_88 = arith.constant 0 : index
    %c0_89 = arith.constant 0 : index
    %85 = vector.load %arg13[%c0_86, %c0_87, %c0_88, %c0_89] : memref<1x18x25x8xbf16, #tpu.memory_space<vmem>>, vector<1x18x25x8xbf16>
    %cst_90 = arith.constant 0.000000e+00 : f32
    %86 = vector.broadcast %cst_90 : f32 to vector<256x8xf32>
    %87 = vector.extract_strided_slice %85 {offsets = [0, 0, 7, 0], sizes = [1, 16, 16, 8], strides = [1, 1, 1, 1]} : vector<1x18x25x8xbf16> to vector<1x16x16x8xbf16>
    %88 = vector.shape_cast %87 : vector<1x16x16x8xbf16> to vector<256x8xbf16>
    %c0_91 = arith.constant 0 : index
    %c0_92 = arith.constant 0 : index
    %c0_93 = arith.constant 0 : index
    %89 = vector.load %arg5[%c0_91, %c0_92, %c0_93] : memref<9x8x8xbf16, #tpu.memory_space<vmem>>, vector<1x8x8xbf16>
    %90 = vector.shape_cast %89 : vector<1x8x8xbf16> to vector<8x8xbf16>
    %cst_94 = arith.constant dense<0.000000e+00> : vector<256x8xf32>
    %91 = tpu.matmul %88, %90, %cst_94 {dimension_numbers = #tpu.dot_dimension_numbers<[1], [0], [0], [1], [0, 0, 1, 1], [], []>} : vector<256x8xbf16>, vector<8x8xbf16>, vector<256x8xf32> -> vector<256x8xf32>
    %92 = arith.addf %86, %91 : vector<256x8xf32>
    %93 = vector.extract_strided_slice %85 {offsets = [0, 0, 8, 0], sizes = [1, 16, 16, 8], strides = [1, 1, 1, 1]} : vector<1x18x25x8xbf16> to vector<1x16x16x8xbf16>
    %94 = vector.shape_cast %93 : vector<1x16x16x8xbf16> to vector<256x8xbf16>
    %c1_95 = arith.constant 1 : index
    %c0_96 = arith.constant 0 : index
    %c0_97 = arith.constant 0 : index
    %95 = vector.load %arg5[%c1_95, %c0_96, %c0_97] : memref<9x8x8xbf16, #tpu.memory_space<vmem>>, vector<1x8x8xbf16>
    %96 = vector.shape_cast %95 : vector<1x8x8xbf16> to vector<8x8xbf16>
    %cst_98 = arith.constant dense<0.000000e+00> : vector<256x8xf32>
    %97 = tpu.matmul %94, %96, %cst_98 {dimension_numbers = #tpu.dot_dimension_numbers<[1], [0], [0], [1], [0, 0, 1, 1], [], []>} : vector<256x8xbf16>, vector<8x8xbf16>, vector<256x8xf32> -> vector<256x8xf32>
    %98 = arith.addf %92, %97 : vector<256x8xf32>
    %99 = vector.extract_strided_slice %85 {offsets = [0, 0, 9, 0], sizes = [1, 16, 16, 8], strides = [1, 1, 1, 1]} : vector<1x18x25x8xbf16> to vector<1x16x16x8xbf16>
    %100 = vector.shape_cast %99 : vector<1x16x16x8xbf16> to vector<256x8xbf16>
    %c2_99 = arith.constant 2 : index
    %c0_100 = arith.constant 0 : index
    %c0_101 = arith.constant 0 : index
    %101 = vector.load %arg5[%c2_99, %c0_100, %c0_101] : memref<9x8x8xbf16, #tpu.memory_space<vmem>>, vector<1x8x8xbf16>
    %102 = vector.shape_cast %101 : vector<1x8x8xbf16> to vector<8x8xbf16>
    %cst_102 = arith.constant dense<0.000000e+00> : vector<256x8xf32>
    %103 = tpu.matmul %100, %102, %cst_102 {dimension_numbers = #tpu.dot_dimension_numbers<[1], [0], [0], [1], [0, 0, 1, 1], [], []>} : vector<256x8xbf16>, vector<8x8xbf16>, vector<256x8xf32> -> vector<256x8xf32>
    %104 = arith.addf %98, %103 : vector<256x8xf32>
    %105 = vector.extract_strided_slice %85 {offsets = [0, 1, 7, 0], sizes = [1, 16, 16, 8], strides = [1, 1, 1, 1]} : vector<1x18x25x8xbf16> to vector<1x16x16x8xbf16>
    %106 = vector.shape_cast %105 : vector<1x16x16x8xbf16> to vector<256x8xbf16>
    %c3_103 = arith.constant 3 : index
    %c0_104 = arith.constant 0 : index
    %c0_105 = arith.constant 0 : index
    %107 = vector.load %arg5[%c3_103, %c0_104, %c0_105] : memref<9x8x8xbf16, #tpu.memory_space<vmem>>, vector<1x8x8xbf16>
    %108 = vector.shape_cast %107 : vector<1x8x8xbf16> to vector<8x8xbf16>
    %cst_106 = arith.constant dense<0.000000e+00> : vector<256x8xf32>
    %109 = tpu.matmul %106, %108, %cst_106 {dimension_numbers = #tpu.dot_dimension_numbers<[1], [0], [0], [1], [0, 0, 1, 1], [], []>} : vector<256x8xbf16>, vector<8x8xbf16>, vector<256x8xf32> -> vector<256x8xf32>
    %110 = arith.addf %104, %109 : vector<256x8xf32>
    %111 = vector.extract_strided_slice %85 {offsets = [0, 1, 8, 0], sizes = [1, 16, 16, 8], strides = [1, 1, 1, 1]} : vector<1x18x25x8xbf16> to vector<1x16x16x8xbf16>
    %112 = vector.shape_cast %111 : vector<1x16x16x8xbf16> to vector<256x8xbf16>
    %c4_107 = arith.constant 4 : index
    %c0_108 = arith.constant 0 : index
    %c0_109 = arith.constant 0 : index
    %113 = vector.load %arg5[%c4_107, %c0_108, %c0_109] : memref<9x8x8xbf16, #tpu.memory_space<vmem>>, vector<1x8x8xbf16>
    %114 = vector.shape_cast %113 : vector<1x8x8xbf16> to vector<8x8xbf16>
    %cst_110 = arith.constant dense<0.000000e+00> : vector<256x8xf32>
    %115 = tpu.matmul %112, %114, %cst_110 {dimension_numbers = #tpu.dot_dimension_numbers<[1], [0], [0], [1], [0, 0, 1, 1], [], []>} : vector<256x8xbf16>, vector<8x8xbf16>, vector<256x8xf32> -> vector<256x8xf32>
    %116 = arith.addf %110, %115 : vector<256x8xf32>
    %117 = vector.extract_strided_slice %85 {offsets = [0, 1, 9, 0], sizes = [1, 16, 16, 8], strides = [1, 1, 1, 1]} : vector<1x18x25x8xbf16> to vector<1x16x16x8xbf16>
    %118 = vector.shape_cast %117 : vector<1x16x16x8xbf16> to vector<256x8xbf16>
    %c5_111 = arith.constant 5 : index
    %c0_112 = arith.constant 0 : index
    %c0_113 = arith.constant 0 : index
    %119 = vector.load %arg5[%c5_111, %c0_112, %c0_113] : memref<9x8x8xbf16, #tpu.memory_space<vmem>>, vector<1x8x8xbf16>
    %120 = vector.shape_cast %119 : vector<1x8x8xbf16> to vector<8x8xbf16>
    %cst_114 = arith.constant dense<0.000000e+00> : vector<256x8xf32>
    %121 = tpu.matmul %118, %120, %cst_114 {dimension_numbers = #tpu.dot_dimension_numbers<[1], [0], [0], [1], [0, 0, 1, 1], [], []>} : vector<256x8xbf16>, vector<8x8xbf16>, vector<256x8xf32> -> vector<256x8xf32>
    %122 = arith.addf %116, %121 : vector<256x8xf32>
    %123 = vector.extract_strided_slice %85 {offsets = [0, 2, 7, 0], sizes = [1, 16, 16, 8], strides = [1, 1, 1, 1]} : vector<1x18x25x8xbf16> to vector<1x16x16x8xbf16>
    %124 = vector.shape_cast %123 : vector<1x16x16x8xbf16> to vector<256x8xbf16>
    %c6_115 = arith.constant 6 : index
    %c0_116 = arith.constant 0 : index
    %c0_117 = arith.constant 0 : index
    %125 = vector.load %arg5[%c6_115, %c0_116, %c0_117] : memref<9x8x8xbf16, #tpu.memory_space<vmem>>, vector<1x8x8xbf16>
    %126 = vector.shape_cast %125 : vector<1x8x8xbf16> to vector<8x8xbf16>
    %cst_118 = arith.constant dense<0.000000e+00> : vector<256x8xf32>
    %127 = tpu.matmul %124, %126, %cst_118 {dimension_numbers = #tpu.dot_dimension_numbers<[1], [0], [0], [1], [0, 0, 1, 1], [], []>} : vector<256x8xbf16>, vector<8x8xbf16>, vector<256x8xf32> -> vector<256x8xf32>
    %128 = arith.addf %122, %127 : vector<256x8xf32>
    %129 = vector.extract_strided_slice %85 {offsets = [0, 2, 8, 0], sizes = [1, 16, 16, 8], strides = [1, 1, 1, 1]} : vector<1x18x25x8xbf16> to vector<1x16x16x8xbf16>
    %130 = vector.shape_cast %129 : vector<1x16x16x8xbf16> to vector<256x8xbf16>
    %c7_119 = arith.constant 7 : index
    %c0_120 = arith.constant 0 : index
    %c0_121 = arith.constant 0 : index
    %131 = vector.load %arg5[%c7_119, %c0_120, %c0_121] : memref<9x8x8xbf16, #tpu.memory_space<vmem>>, vector<1x8x8xbf16>
    %132 = vector.shape_cast %131 : vector<1x8x8xbf16> to vector<8x8xbf16>
    %cst_122 = arith.constant dense<0.000000e+00> : vector<256x8xf32>
    %133 = tpu.matmul %130, %132, %cst_122 {dimension_numbers = #tpu.dot_dimension_numbers<[1], [0], [0], [1], [0, 0, 1, 1], [], []>} : vector<256x8xbf16>, vector<8x8xbf16>, vector<256x8xf32> -> vector<256x8xf32>
    %134 = arith.addf %128, %133 : vector<256x8xf32>
    %135 = vector.extract_strided_slice %85 {offsets = [0, 2, 9, 0], sizes = [1, 16, 16, 8], strides = [1, 1, 1, 1]} : vector<1x18x25x8xbf16> to vector<1x16x16x8xbf16>
    %136 = vector.shape_cast %135 : vector<1x16x16x8xbf16> to vector<256x8xbf16>
    %c8_123 = arith.constant 8 : index
    %c0_124 = arith.constant 0 : index
    %c0_125 = arith.constant 0 : index
    %137 = vector.load %arg5[%c8_123, %c0_124, %c0_125] : memref<9x8x8xbf16, #tpu.memory_space<vmem>>, vector<1x8x8xbf16>
    %138 = vector.shape_cast %137 : vector<1x8x8xbf16> to vector<8x8xbf16>
    %cst_126 = arith.constant dense<0.000000e+00> : vector<256x8xf32>
    %139 = tpu.matmul %136, %138, %cst_126 {dimension_numbers = #tpu.dot_dimension_numbers<[1], [0], [0], [1], [0, 0, 1, 1], [], []>} : vector<256x8xbf16>, vector<8x8xbf16>, vector<256x8xf32> -> vector<256x8xf32>
    %140 = arith.addf %134, %139 : vector<256x8xf32>
    %c0_127 = arith.constant 0 : index
    %c0_128 = arith.constant 0 : index
    %141 = vector.load %arg6[%c0_127, %c0_128] : memref<1x8xf32, #tpu.memory_space<vmem>>, vector<1x8xf32>
    %142 = vector.broadcast %141 : vector<1x8xf32> to vector<256x8xf32>
    %143 = arith.mulf %140, %142 : vector<256x8xf32>
    %c0_129 = arith.constant 0 : index
    %c0_130 = arith.constant 0 : index
    %144 = vector.load %arg7[%c0_129, %c0_130] : memref<1x8xf32, #tpu.memory_space<vmem>>, vector<1x8xf32>
    %145 = vector.broadcast %144 : vector<1x8xf32> to vector<256x8xf32>
    %146 = arith.addf %143, %145 : vector<256x8xf32>
    %c0_131 = arith.constant 0 : index
    %c0_132 = arith.constant 0 : index
    %147 = vector.load %arg8[%c0_131, %c0_132] : memref<4x8xbf16, #tpu.memory_space<vmem>>, vector<4x8xbf16>
    %cst_133 = arith.constant dense<0.000000e+00> : vector<256x8xf32>
    %148 = tpu.matmul %37, %147, %cst_133 {dimension_numbers = #tpu.dot_dimension_numbers<[1], [0], [0], [1], [0, 0, 1, 1], [], []>} : vector<256x4xbf16>, vector<4x8xbf16>, vector<256x8xf32> -> vector<256x8xf32>
    %c0_134 = arith.constant 0 : index
    %c0_135 = arith.constant 0 : index
    %149 = vector.load %arg9[%c0_134, %c0_135] : memref<1x8xf32, #tpu.memory_space<vmem>>, vector<1x8xf32>
    %150 = vector.broadcast %149 : vector<1x8xf32> to vector<256x8xf32>
    %151 = arith.mulf %148, %150 : vector<256x8xf32>
    %c0_136 = arith.constant 0 : index
    %c0_137 = arith.constant 0 : index
    %152 = vector.load %arg10[%c0_136, %c0_137] : memref<1x8xf32, #tpu.memory_space<vmem>>, vector<1x8xf32>
    %153 = vector.broadcast %152 : vector<1x8xf32> to vector<256x8xf32>
    %154 = arith.addf %151, %153 : vector<256x8xf32>
    %155 = arith.addf %146, %154 : vector<256x8xf32>
    %cst_138 = arith.constant 0.000000e+00 : f32
    %156 = vector.broadcast %cst_138 : f32 to vector<256x8xf32>
    %157 = arith.maximumf %155, %156 : vector<256x8xf32>
    %158 = vector.shape_cast %157 : vector<256x8xf32> to vector<1x16x16x8xf32>
    %c0_139 = arith.constant 0 : index
    %c0_140 = arith.constant 0 : index
    %c0_141 = arith.constant 0 : index
    %c0_142 = arith.constant 0 : index
    %159 = vector.load %arg11[%c0_139, %c0_140, %c0_141, %c0_142] : memref<1x16x16x8xf32, #tpu.memory_space<vmem>>, vector<1x16x16x8xf32>
    tpu.vector_store %arg11[%c0_139, %c0_140, %c0_141, %c0_142], %158 {strides = array<i32>} : memref<1x16x16x8xf32, #tpu.memory_space<vmem>>, vector<1x16x16x8xf32>,
    return
  }
  func.func @transform_0(%arg0: i32) -> (i32, i32, i32, i32) {
    %c0_i32 = arith.constant 0 : i32
    %c0_i32_0 = arith.constant 0 : i32
    %c0_i32_1 = arith.constant 0 : i32
    %c0_i32_2 = arith.constant 0 : i32
    return %arg0, %c0_i32, %c0_i32_0, %c0_i32_1 : i32, i32, i32, i32
  }
  func.func @transform_1(%arg0: i32) -> (i32, i32, i32) {
    %c0_i32 = arith.constant 0 : i32
    %c0_i32_0 = arith.constant 0 : i32
    %c0_i32_1 = arith.constant 0 : i32
    %c0_i32_2 = arith.constant 0 : i32
    return %c0_i32, %c0_i32_0, %c0_i32_1 : i32, i32, i32
  }
  func.func @transform_2(%arg0: i32) -> (i32, i32) {
    %c0_i32 = arith.constant 0 : i32
    %c0_i32_0 = arith.constant 0 : i32
    %c0_i32_1 = arith.constant 0 : i32
    return %c0_i32, %c0_i32_0 : i32, i32
  }
  func.func @transform_3(%arg0: i32) -> (i32, i32) {
    %c0_i32 = arith.constant 0 : i32
    %c0_i32_0 = arith.constant 0 : i32
    %c0_i32_1 = arith.constant 0 : i32
    return %c0_i32, %c0_i32_0 : i32, i32
  }
  func.func @transform_4(%arg0: i32) -> (i32, i32, i32) {
    %c0_i32 = arith.constant 0 : i32
    %c0_i32_0 = arith.constant 0 : i32
    %c0_i32_1 = arith.constant 0 : i32
    %c0_i32_2 = arith.constant 0 : i32
    return %c0_i32, %c0_i32_0, %c0_i32_1 : i32, i32, i32
  }
  func.func @transform_5(%arg0: i32) -> (i32, i32) {
    %c0_i32 = arith.constant 0 : i32
    %c0_i32_0 = arith.constant 0 : i32
    %c0_i32_1 = arith.constant 0 : i32
    return %c0_i32, %c0_i32_0 : i32, i32
  }
  func.func @transform_6(%arg0: i32) -> (i32, i32) {
    %c0_i32 = arith.constant 0 : i32
    %c0_i32_0 = arith.constant 0 : i32
    %c0_i32_1 = arith.constant 0 : i32
    return %c0_i32, %c0_i32_0 : i32, i32
  }
  func.func @transform_7(%arg0: i32) -> (i32, i32) {
    %c0_i32 = arith.constant 0 : i32
    %c0_i32_0 = arith.constant 0 : i32
    %c0_i32_1 = arith.constant 0 : i32
    return %c0_i32, %c0_i32_0 : i32, i32
  }
  func.func @transform_8(%arg0: i32) -> (i32, i32) {
    %c0_i32 = arith.constant 0 : i32
    %c0_i32_0 = arith.constant 0 : i32
    %c0_i32_1 = arith.constant 0 : i32
    return %c0_i32, %c0_i32_0 : i32, i32
  }
  func.func @transform_9(%arg0: i32) -> (i32, i32) {
    %c0_i32 = arith.constant 0 : i32
    %c0_i32_0 = arith.constant 0 : i32
    %c0_i32_1 = arith.constant 0 : i32
    return %c0_i32, %c0_i32_0 : i32, i32
  }
  func.func @transform_10(%arg0: i32) -> (i32, i32, i32, i32) {
    %c0_i32 = arith.constant 0 : i32
    %c0_i32_0 = arith.constant 0 : i32
    %c0_i32_1 = arith.constant 0 : i32
    %c0_i32_2 = arith.constant 0 : i32
    return %arg0, %c0_i32, %c0_i32_0, %c0_i32_1 : i32, i32, i32, i32
  }
}

</mosaic_0001>

<bundles_post_ra>
// kernel: tpu_custom_call.1
= control target key start
LH: loop header
LB: loop body
LE: loop exit
PB: predicated region body
PF: predicated region fallthrough
CT: control target
= control target key end

     0   :  { %s6149_s13 = smov 0   ;;  %s9019_s0 = inlined_call_operand.vmem [shape: bf16[2,16,16,4], index: 0, kind: input, shape index: {}]   ;;  %s9020_s1 = inlined_call_operand.vmem [shape: bf16[9,4,8], index: 1, kind: input, shape index: {}]   ;;  %s9021_s2 = inlined_call_operand.vmem [shape: f32[1,8], index: 2, kind: input, shape index: {}]   ;;  %s9022_s3 = inlined_call_operand.vmem [shape: f32[1,8], index: 3, kind: input, shape index: {}]   ;;  %s9023_s4 = inlined_call_operand.vmem [shape: bf16[9,8,8], index: 4, kind: input, shape index: {}]   ;;  %s9024_s5 = inlined_call_operand.vmem [shape: f32[1,8], index: 5, kind: input, shape index: {}]   ;;  %s9025_s6 = inlined_call_operand.vmem [shape: f32[1,8], index: 6, kind: input, shape index: {}]   ;;  %s9026_s7 = inlined_call_operand.vmem [shape: bf16[4,8], index: 7, kind: input, shape index: {}]   ;;  %s9027_s8 = inlined_call_operand.vmem [shape: f32[1,8], index: 8, kind: input, shape index: {}]   ;;  %s9028_s9 = inlined_call_operand.vmem [shape: f32[1,8], index: 9, kind: input, shape index: {}]   ;;  %s9029_s10 = inlined_call_operand.vmem [shape: f32[2,16,16,8], index: 10, kind: output, shape index: {}]  }
   0x1 LB: > { %s5467_s14 = sadd.s32 4294967295, %s6091_s13   ;;  %p5471_p0 = scmp.ge.s32.totalorder %s6091_s13, 1  ;;  %s6091_s13 = sphi %s6149_s13, %s20_s13  }
   0x2   : > { %p312_p1 = scmp.lt.s32.totalorder %s6091_s13, 3 }
   0x4   : > { %p313_p2 = pnand %p5471_p0, %p312_p1 }
   0x6   : > { %316 = sbr.rel (%p313_p2) target bundleno = 1551 (0x60f), region = 60 }
   0xb   : > { %v5492_v0 = vld [vmem:[%s9020_s1 + $0x2] sm:$0x3]  ;;  %vm1073_vm0 = vcmask 1041408   ;;  %vm393_vm1 = vcmask 27648   ;;  %v9030_v2 = vmov 0   ;;  %p350_p3 = scmp.lt.s32.totalorder %s5467_s14, 1 }
   0xc   : > { %v1075_v1 = vsel %vm1073_vm0, %v5492_v0, 0  ;;  %395 = vst.msk [vmem:[#allocation2 + $0x4] sm:$0xf] %vm393_vm1, %v9030_v2  ;;  %v941_v3 = vld [vmem:[%s9020_s1] sm:$0x3]  ;;  %vm1024_vm2 = vcmask 31744  }
   0xd   : > { %1084 = vmatpush.bf16.msra.mxu0 %v1075_v1  ;;  %396 = vst.msk [vmem:[#allocation2 + $0x8] sm:$0xf] %vm393_vm1, %v9030_v2  ;;  %6016 = vmatpush.bf16.msra.mxu3 %v1075_v1  ;;  %v1263_v4 = vsel %vm1073_vm0, %v941_v3, 0  ;;  %v5624_v5 = vld [vmem:[%s9020_s1 + $0x8] sm:$0x3]  ;;  %s9294_s14 = smov (!%p350_p3, %s5467_s14), 1 }
   0xe   : > { %394 = vst.msk [vmem:[#allocation2] sm:$0xf] %vm393_vm1, %v9030_v2  ;;  %1272 = vmatpush.bf16.msra.mxu1 %v1263_v4  ;;  %v1968_v7 = vsel %vm1073_vm0, %v5624_v5, 0  ;;  %v5589_v8 = vld [vmem:[%s9020_s1 + $0x4] sm:$0x3]  ;;  %s5978_s23 = sshll.u32 %s9294_s14, 7 }
   0xf   : > { %404 = vst.msk [vmem:[#allocation2 + $0x110] sm:$0xf] %vm393_vm1, %v9030_v2  ;;  %v6204_v9 = vsel %vm1073_vm0, %v5589_v8, 0  ;;  %s6225_s26 = scalar_lea.vmem %s9019_s0, %s5978_s23  ;;  %vm398_vm3 = vsmask.f32 256  ;;  %vm397_vm4 = vcmask 24576  }
  0x10   : > { %405 = vst.msk [vmem:[#allocation2 + $0x114] sm:$0xf] %vm393_vm1, %v9030_v2  ;;  %1689 = vmatpush.bf16.msra.mxu2 %v6204_v9  ;;  %v400_v14 = vld [vmem:[#allocation2 + $0xc] sm:$0x1]  ;;  %v383_v15 = vld [vmem:[%s6225_s26 + $0x58] sm:$0xf]  ;;  %vm6238_vm5 = vmand %vm397_vm4, %vm398_vm3 }
  0x11   : > { %6017 = vmatpush.bf16.msrb.mxu3 %v1263_v4  ;;  %406 = vst.msk [vmem:[#allocation2 + $0x118] sm:$0xf] %vm393_vm1, %v9030_v2  ;;  %1977 = vmatpush.bf16.msrb.mxu0 %v1968_v7  ;;  %v384_v16 = vld [vmem:[%s6225_s26 + $0x5c] sm:$0xf]  ;;  %v9103_v20 = vmov 0  ;;  %v401_v23 = vsel %vm6238_vm5, 0, %v400_v14 }
  0x12   : > { %411 = vst.msk [vmem:[#allocation2 + $0x10] sm:$0xf] %vm393_vm1, %v9030_v2  ;;  %v9104_v20 = vsel %vm6238_vm5, 4294967295, %v9103_v20  ;;  %v361_v21 = vld [vmem:[%s6225_s26] sm:$0xf]  ;;  %v9106_v28 = vmov 0 }
  0x13   : > { %412 = vst.msk [vmem:[#allocation2 + $0x20] sm:$0xf] %vm393_vm1, %v9030_v2  ;;  %v516_v10 = vld [vmem:[#allocation2 + $0x4] sm:$0xf]  ;;  %vm587_vm6 = vsmask.f32 4368 }
  0x14   : > { %v5980_v6 = vld [vmem:[#allocation2 + $0x4] sm:$0xff]  ;;  %413 = vst.msk [vmem:[#allocation2 + $0x30] sm:$0xf] %vm393_vm1, %v9030_v2  ;;  %v595_v12 = vshrl.u32 %v516_v10, 16  ;;  %v598_v24 = vshll.u32 %v516_v10, 16  ;;  %vm6253_vm7 = vmor %vm398_vm3, %vm587_vm6  ;;  %vm3484_vm11 = vcmask 1043456  }
  0x15   : > { %414 = vst.msk [vmem:[#allocation2 + $0x40] sm:$0xf] %vm393_vm1, %v9030_v2  ;;  %5557 = vmatmul.msk.bf16.vlgmr.msra.gmra.mxu0 %vm1024_vm2, %v5980_v6  ;;  %v517_v11 = vld [vmem:[#allocation2 + $0x8] sm:$0xf]  ;;  %v362_v22 = vld [vmem:[%s6225_s26 + $0x4] sm:$0xf] }
  0x16   : > { %415 = vst.msk [vmem:[#allocation2 + $0x50] sm:$0xf] %vm393_vm1, %v9030_v2  ;;  %v604_v13 = vshrl.u32 %v517_v11, 16  ;;  %v597_v17 = vrot.slane %v595_v12, 7  ;;  %v607_v19 = vshll.u32 %v517_v11, 16  ;;  %v9107_v28 = vsel %vm6253_vm7, 4294967295, %v9106_v28 }
  0x17   : > { %416 = vst.msk [vmem:[#allocation2 + $0x60] sm:$0xf] %vm393_vm1, %v9030_v2  ;;  %v385_v27 = vld [vmem:[%s6225_s26 + $0x60] sm:$0xf]  ;;  %v386_v29 = vld [vmem:[%s6225_s26 + $0x64] sm:$0xf] }
  0x18   : > { %417 = vst.msk [vmem:[#allocation2 + $0x70] sm:$0xf] %vm393_vm1, %v9030_v2  ;;  %v606_v18 = vrot.slane %v604_v13, 7  ;;  %v602_v25 = vrot.slane %v597_v17, 4  ;;  %v431_v30 = vld [vmem:[#allocation2 + $0x1c] sm:$0x1]  ;;  %v600_v35 = vor.u32 %v598_v24, %v597_v17 }
  0x19   : > { %418 = vst.msk [vmem:[#allocation2 + $0x80] sm:$0xf] %vm393_vm1, %v9030_v2  ;;  %v363_v31 = vld [vmem:[%s6225_s26 + $0x8] sm:$0xf]  ;;  %v364_v33 = vld [vmem:[%s6225_s26 + $0xc] sm:$0xf] }
  0x1a   : > { %419 = vst.msk [vmem:[#allocation2 + $0x90] sm:$0xf] %vm393_vm1, %v9030_v2  ;;  %v609_v26 = vor.u32 %v607_v19, %v606_v18  ;;  %v432_v37 = vsel %vm6238_vm5, 0, %v431_v30  ;;  %v1357_v38 = vrot.slane %v595_v12, 4  ;;  %v1358_v39 = vrot.slane %v598_v24, 5  ;;  %s5979_s23 = sshll.u32 %s9294_s14, 8 }
  0x1b   : > { %420 = vst.msk [vmem:[#allocation2 + $0xa0] sm:$0xf] %vm393_vm1, %v9030_v2  ;;  %v519_v40 = vld [vmem:[#allocation2 + $0x10] sm:$0xf]  ;;  %v387_v43 = vld [vmem:[%s6225_s26 + $0x68] sm:$0xf] }
  0x1c   : > { %421 = vst.msk [vmem:[#allocation2 + $0xb0] sm:$0xf] %vm393_vm1, %v9030_v2  ;;  %v610_v36 = vsel %vm6253_vm7, %v602_v25, %v609_v26  ;;  %v388_v46 = vld [vmem:[%s6225_s26 + $0x6c] sm:$0xf]  ;;  %v1361_v49 = vrot.slane %v607_v19, 5  ;;  %v1363_v50 = vrot.slane %v604_v13, 4  ;;  %v1359_v62 = vor.u32 %v1358_v39, %v1357_v38 }
  0x1d   : > { %422 = vst.msk [vmem:[#allocation2 + $0xc0] sm:$0xf] %vm393_vm1, %v9030_v2  ;;  %v1167_v44 = vunpack.c.l.b16 %v610_v36  ;;  %v612_v55 = vshrl.u32 %v519_v40, 16  ;;  %vm1354_vm8 = vsmask.f32 3328  ;;  %vm2775_vm12 = vcmask 60416  }
  0x1e   : > { %423 = vst.msk [vmem:[#allocation2 + $0xd0] sm:$0xf] %vm393_vm1, %v9030_v2  ;;  %vm1355_vm9 = vsmask.f32 7440  ;;  %v1364_v0 = vor.u32 %v1363_v50, %v1361_v49  ;;  %v1360_v6 = vrot.slane %v1359_v62, 4  ;;  %vm3435_vm13 = vcmask 64512  }
  0x1f   : > { %424 = vst.msk [vmem:[#allocation2 + $0xe0] sm:$0xf] %vm393_vm1, %v9030_v2  ;;  %v5477_v1 = vrot.slane %v612_v55, 11  ;;  %v365_v7 = vld [vmem:[%s6225_s26 + $0x10] sm:$0xf]  ;;  %vm6283_vm10 = vmor %vm1354_vm8, %vm1355_vm9  ;;  %vm2779_vm14 = vcmask 57344  }
  0x20   : > { %425 = vst.msk [vmem:[#allocation2 + $0xf0] sm:$0xf] %vm393_vm1, %v9030_v2  ;;  %v366_v8 = vld [vmem:[%s6225_s26 + $0x14] sm:$0xf]  ;;  %v434_v10 = vld [vmem:[#allocation2 + $0x2c] sm:$0x1]  ;;  %v1362_v17 = vsel %vm6283_vm10, %v1360_v6, %v1361_v49  ;;  %vm7415_vm15 = vmand %vm2779_vm14, %vm398_vm3 }
  0x21   : > { %426 = vst.msk [vmem:[#allocation2 + $0x100] sm:$0xf] %vm393_vm1, %v9030_v2  ;;  %v1365_v12 = vrot.slane %v1364_v0, 4  ;;  %v523_v26 = vld [vmem:[#allocation2 + $0x20] sm:$0xf] }
  0x22   : > { %410 = vst.msk [vmem:[#allocation2] sm:$0xf] %vm393_vm1, %v9030_v2  ;;  %v437_v50 = vld [vmem:[#allocation2 + $0x3c] sm:$0x1] }
  0x23   : > { %9105 = vst [vmem:[#allocation4_spill] sm:$0xff] %v9104_v20  ;;  %v368_v55 = vld [vmem:[%s6225_s26 + $0x1c] sm:$0xf] }
  0x24   : > { %427 = vst.msk [vmem:[#allocation2 + $0x110] sm:$0xf] %vm393_vm1, %v9030_v2 }
  0x25   : > { %505 = vst.msk [vmem:[#allocation2 + $0xc4] sm:$0xf] %vm393_vm1, %v383_v15 }
  0x26   : > { %506 = vst.msk [vmem:[#allocation2 + $0xc8] sm:$0xf] %vm393_vm1, %v384_v16  ;;  %v435_v16 = vsel %vm6238_vm5, 0, %v434_v10 }
  0x27   : > { %483 = vst.msk [vmem:[#allocation2 + $0x14] sm:$0xf] %vm393_vm1, %v361_v21 }
  0x28   : > { %9108 = vst [vmem:[#allocation5_spill] sm:$0xff] %v9107_v28 }
  0x29   : > { %484 = vst.msk [vmem:[#allocation2 + $0x18] sm:$0xf] %vm393_vm1, %v362_v22  ;;  %v515_v32 = vld [vmem:[#allocation2] sm:$0xf] }
  0x2a   : > { %402 = vst [vmem:[#allocation2 + $0xc] sm:$0x1] %v401_v23  ;;  %v590_v34 = vshrl.u32 %v515_v32, 16  ;;  %v389_v32 = vld [vmem:[%s6225_s26 + $0x70] sm:$0xf] }
  0x2b   : > { %507 = vst.msk [vmem:[#allocation2 + $0xd4] sm:$0xf] %vm393_vm1, %v385_v27 }
  0x2c   : > { %508 = vst.msk [vmem:[#allocation2 + $0xd8] sm:$0xf] %vm393_vm1, %v386_v29  ;;  %v5476_v42 = vrot.slane %v590_v34, 11  ;;  %v1583_v34 = vunpack.c.l.b16 %v1362_v17 }
  0x2d   : > { %485 = vst.msk [vmem:[#allocation2 + $0x24] sm:$0xf] %vm393_vm1, %v363_v31  ;;  %v5992_v41 = vld [vmem:[#allocation2 + $0xc4] sm:$0xff] }
  0x2e   : > { %486 = vst.msk [vmem:[#allocation2 + $0x28] sm:$0xf] %vm393_vm1, %v364_v33  ;;  %v520_v45 = vld [vmem:[#allocation2 + $0x14] sm:$0xf]  ;;  %5569 = vmatmul.msk.bf16.vlgmr.msra.gmra.mxu3 %vm1024_vm2, %v5992_v41  ;;  %v601_v47 = vsel %vm6253_vm7, %v5476_v42, %v600_v35 }
  0x2f   : > { %433 = vst [vmem:[#allocation2 + $0x1c] sm:$0x1] %v432_v37  ;;  %v617_v52 = vshrl.u32 %v520_v45, 16  ;;  %v1166_v53 = vunpack.c.l.b16 %v601_v47  ;;  %6018 = vmatpush.bf16.msra.mxu3 %v6204_v9  ;;  %v620_v59 = vshll.u32 %v520_v45, 16  ;;  %v9109_v9 = vmov 0 }
  0x30   : > { %v5981_v48 = vld [vmem:[#allocation2 + $0x14] sm:$0xff]  ;;  %509 = vst.msk [vmem:[#allocation2 + $0xe4] sm:$0xf] %vm393_vm1, %v387_v43  ;;  %v9110_v9 = vsel %vm6283_vm10, 4294967295, %v9109_v9 }
  0x31   : > { %v521_v51 = vld [vmem:[#allocation2 + $0x18] sm:$0xf]  ;;  %v428_v54 = vld [vmem:[#allocation2 + $0xc] sm:$0x1]  ;;  %5558 = vmatmul.msk.bf16.gmra.mxu0 %vm1024_vm2, %v5981_v48  ;;  %v619_v58 = vrot.slane %v617_v52, 7  ;;  %v1198_v61 = vpack.c.b16 %v1167_v44, %v1166_v53  ;;  %9111 = vst [vmem:[#allocation6_spill] sm:$0xff] %v9110_v9 }
  0x32   : > { %v626_v56 = vshrl.u32 %v521_v51, 16  ;;  %v429_v57 = vsel %vm6238_vm5, 0, %v428_v54  ;;  %v629_v60 = vshll.u32 %v521_v51, 16  ;;  %510 = vst.msk [vmem:[#allocation2 + $0xe8] sm:$0xf] %vm393_vm1, %v388_v46  ;;  %v1371_v19 = vrot.slane %v617_v52, 4 }
  0x33   : > { %430 = vst [vmem:[#allocation2 + $0xc] sm:$0x1] %v429_v57  ;;  %5573 = vmatmul.msk.bf16.vlgmr.msra.gmra.mxu1 %vm1024_vm2, %v1198_v61  ;;  %v622_v3 = vor.u32 %v620_v59, %v619_v58  ;;  %v624_v4 = vrot.slane %v619_v58, 4  ;;  %v5993_v22 = vld [vmem:[#allocation2 + $0xd4] sm:$0xff]  ;;  %v1372_v23 = vrot.slane %v620_v59, 5  ;;  %v634_v44 = vshrl.u32 %v523_v26, 16 }
  0x34   : > { %v628_v63 = vrot.slane %v626_v56, 7  ;;  %487 = vst.msk [vmem:[#allocation2 + $0x34] sm:$0xf] %vm393_vm1, %v365_v7  ;;  %v524_v15 = vld [vmem:[#allocation2 + $0x24] sm:$0xf]  ;;  %v1375_v24 = vrot.slane %v629_v60, 5 }
  0x35   : > { %488 = vst.msk [vmem:[#allocation2 + $0x38] sm:$0xf] %vm393_vm1, %v366_v8  ;;  %v623_v13 = vsel %vm6253_vm7, %v5477_v1, %v622_v3  ;;  %v525_v21 = vld [vmem:[#allocation2 + $0x28] sm:$0xf]  ;;  %v1377_v25 = vrot.slane %v626_v56, 4  ;;  %v639_v36 = vshrl.u32 %v524_v15, 16  ;;  %v1373_v40 = vor.u32 %v1372_v23, %v1371_v19 }
  0x36   : > { %v631_v5 = vor.u32 %v629_v60, %v628_v63  ;;  %436 = vst [vmem:[#allocation2 + $0x2c] sm:$0x1] %v435_v16  ;;  %v1168_v29 = vunpack.c.l.b16 %v623_v13  ;;  %v5982_v31 = vld [vmem:[#allocation2 + $0x24] sm:$0xff]  ;;  %v390_v33 = vld [vmem:[%s6225_s26 + $0x74] sm:$0xf]  ;;  %v648_v37 = vshrl.u32 %v525_v21, 16 }
  0x37   : > { %v522_v35 = vld [vmem:[#allocation2 + $0x1c] sm:$0x1]  ;;  %511 = vst.msk [vmem:[#allocation2 + $0xf4] sm:$0xf] %vm393_vm1, %v389_v32  ;;  %v1378_v41 = vor.u32 %v1377_v25, %v1375_v24  ;;  %v642_v45 = vshll.u32 %v524_v15, 16  ;;  %v641_v47 = vrot.slane %v639_v36, 7 }
  0x38   : > { %v632_v14 = vsel %vm6253_vm7, %v624_v4, %v631_v5  ;;  %512 = vst.msk [vmem:[#allocation2 + $0xf8] sm:$0xf] %vm393_vm1, %v390_v33  ;;  %v1381_v43 = vshll.u32 %v522_v35, 16  ;;  %v650_v48 = vrot.slane %v648_v37, 7  ;;  %v651_v49 = vshll.u32 %v525_v21, 16 }
  0x39   : > { %v1169_v30 = vunpack.c.l.b16 %v632_v14  ;;  %v1374_v51 = vrot.slane %v1373_v40, 4  ;;  %v1379_v52 = vrot.slane %v1378_v41, 4  ;;  %v367_v54 = vld [vmem:[%s6225_s26 + $0x18] sm:$0xf]  ;;  %v438_v56 = vsel %vm6238_vm5, 0, %v437_v50 }
  0x3a   : > { %v518_v11 = vld [vmem:[#allocation2 + $0xc] sm:$0x1]  ;;  %v1383_v53 = vrot.slane %v1381_v43, 5  ;;  %v5478_v57 = vrot.slane %v634_v44, 11  ;;  %v644_v58 = vor.u32 %v642_v45, %v641_v47  ;;  %v646_v59 = vrot.slane %v641_v47, 4 }
  0x3b   : > { %v1367_v18 = vshll.u32 %v518_v11, 16  ;;  %v6304_v42 = vpack.c.b16 %v1169_v30, %v1168_v29  ;;  %v653_v60 = vor.u32 %v651_v49, %v650_v48  ;;  %489 = vst.msk [vmem:[#allocation2 + $0x44] sm:$0xf] %vm393_vm1, %v367_v54  ;;  %v1376_v61 = vsel %vm6283_vm10, %v1374_v51, %v1375_v24  ;;  %v528_v4 = vld [vmem:[#allocation2 + $0x34] sm:$0xf]  ;;  %v5994_v11 = vld [vmem:[#allocation2 + $0xe4] sm:$0xff] }
  0x3c   : > { %490 = vst.msk [vmem:[#allocation2 + $0x48] sm:$0xf] %vm393_vm1, %v368_v55  ;;  %v1384_v62 = vsel %vm6283_vm10, %v1379_v52, %v1383_v53  ;;  %v645_v63 = vsel %vm6253_vm7, %v5478_v57, %v644_v58  ;;  %v1385_v1 = vrot.slane %v639_v36, 4  ;;  %v1386_v3 = vrot.slane %v642_v45, 5  ;;  %v529_v7 = vld [vmem:[#allocation2 + $0x38] sm:$0xf] }
  0x3d   : > { %v1369_v27 = vrot.slane %v1367_v18, 5  ;;  %439 = vst [vmem:[#allocation2 + $0x3c] sm:$0x1] %v438_v56  ;;  %v654_v0 = vsel %vm6253_vm7, %v646_v59, %v653_v60  ;;  %v1389_v5 = vrot.slane %v651_v49, 5  ;;  %v1391_v6 = vrot.slane %v648_v37, 4  ;;  %v5983_v16 = vld [vmem:[#allocation2 + $0x34] sm:$0xff] }
  0x3e   : > { %5570 = vmatmul.msk.bf16.gmra.mxu3 %vm1024_vm2, %v5993_v22  ;;  %v1585_v8 = vunpack.c.l.b16 %v1376_v61  ;;  %v1586_v10 = vunpack.c.l.b16 %v1384_v62  ;;  %v1170_v13 = vunpack.c.l.b16 %v645_v63  ;;  %v1171_v14 = vunpack.c.l.b16 %v654_v0  ;;  %v527_v18 = vld [vmem:[#allocation2 + $0x30] sm:$0xf]  ;;  %v440_v35 = vld [vmem:[#allocation2 + $0x4c] sm:$0x1]  ;;  %v6339_v43 = vld [vmem:[#allocation2 + $0xc8] sm:$0xf] }
  0x3f   : > { %v1370_v38 = vsel %vm6283_vm10, %v1365_v12, %v1369_v27  ;;  %v526_v12 = vld [vmem:[#allocation2 + $0x2c] sm:$0x1]  ;;  %v661_v15 = vshrl.u32 %v528_v4, 16  ;;  %v1387_v17 = vor.u32 %v1386_v3, %v1385_v1  ;;  %v670_v19 = vshrl.u32 %v529_v7, 16  ;;  %v370_v44 = vld [vmem:[%s6225_s26 + $0x24] sm:$0xf] }
  0x40   : > { %v1584_v39 = vunpack.c.l.b16 %v1370_v38  ;;  %v1392_v21 = vor.u32 %v1391_v6, %v1389_v5  ;;  %v1395_v22 = vshll.u32 %v526_v12, 16  ;;  %v6324_v23 = vpack.c.b16 %v1586_v10, %v1585_v8  ;;  %v369_v38 = vld [vmem:[%s6225_s26 + $0x20] sm:$0xf]  ;;  %492 = vst.msk [vmem:[#allocation2 + $0x58] sm:$0xf] %vm393_vm1, %v370_v44  ;;  %v5995_v60 = vld [vmem:[#allocation2 + $0xf4] sm:$0xff] }
  0x41   : > { %5559 = vmatmul.msk.bf16.gmra.mxu0 %vm1024_vm2, %v5982_v31  ;;  %v6327_v24 = vpack.c.b16 %v1171_v14, %v1170_v13  ;;  %v656_v25 = vshrl.u32 %v527_v18, 16  ;;  %v663_v26 = vrot.slane %v661_v15, 7  ;;  %v1388_v27 = vrot.slane %v1387_v17, 4  ;;  %491 = vst.msk [vmem:[#allocation2 + $0x54] sm:$0xf] %vm393_vm1, %v369_v38 }
  0x42   : > { %v1615_v46 = vpack.c.b16 %v1584_v39, %v1583_v34  ;;  %v664_v29 = vshll.u32 %v528_v4, 16  ;;  %v672_v30 = vrot.slane %v670_v19, 7  ;;  %v673_v31 = vshll.u32 %v529_v7, 16  ;;  %v6332_v34 = vld [vmem:[#allocation2 + $0xc4] sm:$0xf] }
  0x43   : > { %5574 = vmatmul.msk.bf16.gmra.mxu1 %vm1024_vm2, %v6304_v42  ;;  %v1393_v32 = vrot.slane %v1392_v21, 4  ;;  %v1397_v33 = vrot.slane %v1395_v22, 5  ;;  %v5479_v36 = vrot.slane %v656_v25, 11  ;;  %v668_v37 = vrot.slane %v663_v26, 4  ;;  %v563_v50 = vld [vmem:[#allocation2 + $0xc0] sm:$0xf] }
  0x44   : > { %5590 = vmatmul.msk.bf16.vlgmr.msra.gmra.mxu2 %vm1024_vm2, %v1615_v46  ;;  %v1390_v39 = vsel %vm6283_vm10, %v1388_v27, %v1389_v5  ;;  %v666_v40 = vor.u32 %v664_v29, %v663_v26  ;;  %v675_v41 = vor.u32 %v673_v31, %v672_v30  ;;  %v859_v46 = vshrl.u32 %v6332_v34, 16  ;;  %v6352_v54 = vld [vmem:[#allocation2 + $0x44] sm:$0xf]  ;;  %v6354_v55 = vld [vmem:[#allocation2 + $0x48] sm:$0xf] }
  0x45   : > { %v1398_v45 = vsel %vm6283_vm10, %v1393_v32, %v1397_v33  ;;  %v441_v47 = vsel %vm6238_vm5, 0, %v440_v35  ;;  %v1399_v48 = vrot.slane %v661_v15, 4  ;;  %v1400_v49 = vrot.slane %v664_v29, 5  ;;  %v530_v0 = vld [vmem:[#allocation2 + $0x3c] sm:$0x1] }
  0x46   : > { %442 = vst [vmem:[#allocation2 + $0x4c] sm:$0x1] %v441_v47  ;;  %v1587_v51 = vunpack.c.l.b16 %v1390_v39  ;;  %v6349_v52 = vrot.slane %v673_v31, 5  ;;  %v868_v53 = vshrl.u32 %v6339_v43, 16  ;;  %v1588_v56 = vunpack.c.l.b16 %v1398_v45  ;;  %v531_v1 = vld [vmem:[#allocation2 + $0x40] sm:$0xf] }
  0x47   : > { %v667_v57 = vsel %vm6253_vm7, %v5479_v36, %v666_v40  ;;  %v676_v58 = vsel %vm6253_vm7, %v668_v37, %v675_v41  ;;  %v1405_v59 = vrot.slane %v670_v19, 4  ;;  %v854_v61 = vshrl.u32 %v563_v50, 16  ;;  %v443_v29 = vld [vmem:[#allocation2 + $0x5c] sm:$0x1]  ;;  %v6385_v39 = vld [vmem:[#allocation2 + $0xd4] sm:$0xf] }
  0x48   : > { %v861_v62 = vrot.slane %v859_v46, 7  ;;  %v862_v63 = vshll.u32 %v6332_v34, 16  ;;  %v683_v3 = vshrl.u32 %v6352_v54, 16  ;;  %v692_v4 = vshrl.u32 %v6354_v55, 16  ;;  %v371_v41 = vld [vmem:[%s6225_s26 + $0x28] sm:$0xf] }
  0x49   : > { %v1172_v5 = vunpack.c.l.b16 %v667_v57  ;;  %v1173_v6 = vunpack.c.l.b16 %v676_v58  ;;  %v870_v7 = vrot.slane %v868_v53, 7  ;;  %v871_v8 = vshll.u32 %v6339_v43, 16  ;;  %v372_v44 = vld [vmem:[%s6225_s26 + $0x2c] sm:$0xf]  ;;  %v6395_v47 = vld [vmem:[#allocation2 + $0xd8] sm:$0xf] }
  0x4a   : > { %v6368_v10 = vpack.c.b16 %v1588_v56, %v1587_v51  ;;  %v1401_v12 = vor.u32 %v1400_v49, %v1399_v48  ;;  %v1406_v13 = vor.u32 %v1405_v59, %v6349_v52  ;;  %v1409_v14 = vshll.u32 %v530_v0, 16  ;;  %493 = vst.msk [vmem:[#allocation2 + $0x64] sm:$0xf] %vm393_vm1, %v371_v41  ;;  %v567_v57 = vld [vmem:[#allocation2 + $0xd0] sm:$0xf] }
  0x4b   : > { %v5488_v15 = vrot.slane %v854_v61, 11  ;;  %v678_v17 = vshrl.u32 %v531_v1, 16  ;;  %v685_v18 = vrot.slane %v683_v3, 7  ;;  %v686_v19 = vshll.u32 %v6352_v54, 16  ;;  %494 = vst.msk [vmem:[#allocation2 + $0x68] sm:$0xf] %vm393_vm1, %v372_v44 }
  0x4c   : > { %v694_v21 = vrot.slane %v692_v4, 7  ;;  %v695_v22 = vshll.u32 %v6354_v55, 16  ;;  %v6376_v25 = vpack.c.b16 %v1173_v6, %v1172_v5  ;;  %v866_v26 = vrot.slane %v861_v62, 4  ;;  %v446_v41 = vld [vmem:[#allocation2 + $0x6c] sm:$0x1] }
  0x4d   : > { %v873_v27 = vor.u32 %v871_v8, %v870_v7  ;;  %v1402_v30 = vrot.slane %v1401_v12, 4  ;;  %v1407_v31 = vrot.slane %v1406_v13, 4  ;;  %v1411_v32 = vrot.slane %v1409_v14, 5  ;;  %v537_v7 = vld [vmem:[#allocation2 + $0x58] sm:$0xf] }
  0x4e   : > { %5571 = vmatmul.msk.bf16.gmra.mxu3 %vm1024_vm2, %v5994_v11  ;;  %v5984_v11 = vld [vmem:[#allocation2 + $0x44] sm:$0xff]  ;;  %v5480_v35 = vrot.slane %v678_v17, 11  ;;  %v688_v36 = vor.u32 %v686_v19, %v685_v18  ;;  %v690_v37 = vrot.slane %v685_v18, 4  ;;  %v697_v38 = vor.u32 %v695_v22, %v694_v21  ;;  %v5985_v18 = vld [vmem:[#allocation2 + $0x54] sm:$0xff] }
  0x4f   : > { %v874_v40 = vsel %vm6253_vm7, %v866_v26, %v873_v27  ;;  %v444_v45 = vsel %vm6238_vm5, 0, %v443_v29  ;;  %v1404_v48 = vsel %vm6283_vm10, %v1402_v30, %v6349_v52  ;;  %v1412_v49 = vsel %vm6283_vm10, %v1407_v31, %v1411_v32  ;;  %v5607_v43 = vld [vmem:[%s9020_s1 + $0x6] sm:$0x3] }
  0x50   : > { %v1191_v51 = vunpack.c.l.b16 %v874_v40  ;;  %v689_v54 = vsel %vm6253_vm7, %v5480_v35, %v688_v36  ;;  %v698_v55 = vsel %vm6253_vm7, %v690_v37, %v697_v38  ;;  %v881_v56 = vshrl.u32 %v6385_v39, 16  ;;  %445 = vst [vmem:[#allocation2 + $0x5c] sm:$0x1] %v444_v45  ;;  %v6436_v45 = vld [vmem:[#allocation2 + $0xe4] sm:$0xf] }
  0x51   : > { %5560 = vmatmul.msk.bf16.gmra.mxu0 %vm1024_vm2, %v5983_v16  ;;  %v864_v16 = vor.u32 %v862_v63, %v861_v62  ;;  %v890_v58 = vshrl.u32 %v6395_v47, 16  ;;  %v1589_v52 = vunpack.c.l.b16 %v1404_v48  ;;  %v1590_v59 = vunpack.c.l.b16 %v1412_v49  ;;  %v6410_v62 = vld [vmem:[#allocation2 + $0x54] sm:$0xf] }
  0x52   : > { %v1414_v61 = vrot.slane %v686_v19, 5  ;;  %v1174_v0 = vunpack.c.l.b16 %v689_v54  ;;  %v1175_v1 = vunpack.c.l.b16 %v698_v55  ;;  %v6412_v5 = vrot.slane %v695_v22, 5  ;;  %v535_v19 = vld [vmem:[#allocation2 + $0x50] sm:$0xf] }
  0x53   : > { %5575 = vmatmul.msk.bf16.gmra.mxu1 %vm1024_vm2, %v6327_v24  ;;  %v865_v33 = vsel %vm6253_vm7, %v5488_v15, %v864_v16  ;;  %v1419_v6 = vrot.slane %v692_v4, 4  ;;  %v876_v12 = vshrl.u32 %v567_v57, 16  ;;  %v883_v13 = vrot.slane %v881_v56, 7  ;;  %v534_v15 = vld [vmem:[#allocation2 + $0x4c] sm:$0x1] }
  0x54   : > { %5591 = vmatmul.msk.bf16.gmra.mxu2 %vm1024_vm2, %v6324_v23  ;;  %v1190_v50 = vunpack.c.l.b16 %v865_v33  ;;  %v884_v14 = vshll.u32 %v6385_v39, 16  ;;  %v893_v16 = vshll.u32 %v6395_v47, 16  ;;  %v705_v17 = vshrl.u32 %v6410_v62, 16 }
  0x55   : > { %v714_v4 = vshrl.u32 %v537_v7, 16  ;;  %v6423_v21 = vpack.c.b16 %v1590_v59, %v1589_v52  ;;  %v6425_v22 = vpack.c.b16 %v1175_v1, %v1174_v0  ;;  %v1420_v27 = vor.u32 %v1419_v6, %v6412_v5  ;;  %v373_v52 = vld [vmem:[%s6225_s26 + $0x30] sm:$0xf]  ;;  %v374_v59 = vld [vmem:[%s6225_s26 + $0x34] sm:$0xf] }
  0x56   : > { %v1423_v29 = vshll.u32 %v534_v15, 16  ;;  %v5489_v30 = vrot.slane %v876_v12, 11  ;;  %v886_v31 = vor.u32 %v884_v14, %v883_v13  ;;  %v888_v32 = vrot.slane %v883_v13, 4  ;;  %495 = vst.msk [vmem:[#allocation2 + $0x74] sm:$0xf] %vm393_vm1, %v373_v52 }
  0x57   : > { %v700_v35 = vshrl.u32 %v535_v19, 16  ;;  %v707_v36 = vrot.slane %v705_v17, 7  ;;  %v708_v37 = vshll.u32 %v6410_v62, 16  ;;  %v716_v38 = vrot.slane %v714_v4, 7  ;;  %v571_v6 = vld [vmem:[#allocation2 + $0xe0] sm:$0xf] }
  0x58   : > { %v717_v40 = vshll.u32 %v537_v7, 16  ;;  %v1421_v48 = vrot.slane %v1420_v27, 4  ;;  %v1425_v49 = vrot.slane %v1423_v29, 5  ;;  %v903_v0 = vshrl.u32 %v6436_v45, 16  ;;  %496 = vst.msk [vmem:[#allocation2 + $0x78] sm:$0xf] %vm393_vm1, %v374_v59 }
  0x59   : > { %v5481_v55 = vrot.slane %v700_v35, 11  ;;  %v710_v57 = vor.u32 %v708_v37, %v707_v36  ;;  %v541_v29 = vld [vmem:[#allocation2 + $0x68] sm:$0xf] }
  0x5a   : > { %v719_v62 = vor.u32 %v717_v40, %v716_v38  ;;  %v1426_v12 = vsel %vm6283_vm10, %v1421_v48, %v1425_v49  ;;  %v6463_v27 = vrot.slane %v717_v40, 5 }
  0x5b   : > { %v711_v19 = vsel %vm6253_vm7, %v5481_v55, %v710_v57  ;;  %v1592_v40 = vunpack.c.l.b16 %v1426_v12  ;;  %v5986_v55 = vld [vmem:[#allocation2 + $0x64] sm:$0xff] }
  0x5c   : > { %v1176_v48 = vunpack.c.l.b16 %v711_v19 }
  0x5e   : > { %5572 = vmatmul.msk.bf16.gmra.mxu3 %vm1024_vm2, %v5995_v60  ;;  %v1413_v60 = vrot.slane %v683_v3, 4  ;;  %v892_v3 = vrot.slane %v890_v58, 7 }
  0x60   : > { %v1415_v26 = vor.u32 %v1414_v61, %v1413_v60  ;;  %v895_v33 = vor.u32 %v893_v16, %v892_v3  ;;  %v447_v60 = vsel %vm6238_vm5, 0, %v446_v41  ;;  %v712_v61 = vrot.slane %v707_v36, 4  ;;  %v539_v41 = vld [vmem:[#allocation2 + $0x60] sm:$0xf] }
  0x61   : > { %5561 = vmatmul.msk.bf16.gmra.mxu0 %vm1024_vm2, %v5984_v11  ;;  %v6414_v11 = vpack.c.b16 %v1191_v51, %v1190_v50  ;;  %v887_v50 = vsel %vm6253_vm7, %v5489_v30, %v886_v31  ;;  %v6442_v51 = vld [vmem:[#allocation2 + $0xe8] sm:$0xf]  ;;  %v1427_v3 = vrot.slane %v705_v17, 4  ;;  %448 = vst [vmem:[#allocation2 + $0x6c] sm:$0x1] %v447_v60  ;;  %v898_v31 = vshrl.u32 %v571_v6, 16 }
  0x62   : > { %v1416_v44 = vrot.slane %v1415_v26, 4  ;;  %v896_v54 = vsel %vm6253_vm7, %v888_v32, %v895_v33  ;;  %v9034_v7 = vshrl.u32 %v6442_v51, 16  ;;  %v1192_v13 = vunpack.c.l.b16 %v887_v50  ;;  %v538_v17 = vld [vmem:[#allocation2 + $0x5c] sm:$0x1] }
  0x63   : > { %5576 = vmatmul.msk.bf16.gmra.mxu1 %vm1024_vm2, %v6376_v25  ;;  %9112 = vst [vmem:[#allocation7_spill] sm:$0xff] %v6414_v11  ;;  %v1193_v15 = vunpack.c.l.b16 %v896_v54  ;;  %v1428_v26 = vrot.slane %v708_v37, 5  ;;  %v720_v30 = vsel %vm6253_vm7, %v712_v61, %v719_v62  ;;  %v905_v32 = vrot.slane %v903_v0, 7 }
  0x64   : > { %5592 = vmatmul.msk.bf16.gmra.mxu2 %vm1024_vm2, %v6368_v10  ;;  %v1418_v1 = vsel %vm6283_vm10, %v1416_v44, %v6412_v5  ;;  %v1433_v5 = vrot.slane %v714_v4, 4  ;;  %v906_v33 = vshll.u32 %v6436_v45, 16  ;;  %v914_v35 = vrot.slane %v9034_v7, 7  ;;  %v5645_v45 = vld [vmem:[%s9020_s1 + $0xa] sm:$0x3] }
  0x65   : > { %v9037_v36 = vshll.u32 %v6442_v51, 16  ;;  %v1591_v38 = vunpack.c.l.b16 %v1418_v1  ;;  %v6473_v4 = vpack.c.b16 %v1193_v15, %v1192_v13  ;;  %v736_v44 = vshrl.u32 %v541_v29, 16 }
  0x66   : > { %v1177_v49 = vunpack.c.l.b16 %v720_v30  ;;  %v1429_v50 = vor.u32 %v1428_v26, %v1427_v3  ;;  %v1434_v54 = vor.u32 %v1433_v5, %v6463_v27  ;;  %v1437_v57 = vshll.u32 %v538_v17, 16 }
  0x67   : > { %9113 = vst [vmem:[#allocation8_spill] sm:$0xff] %v6473_v4  ;;  %v5490_v52 = vrot.slane %v898_v31, 11  ;;  %v908_v59 = vor.u32 %v906_v33, %v905_v32  ;;  %v910_v60 = vrot.slane %v905_v32, 4  ;;  %v917_v61 = vor.u32 %v9037_v36, %v914_v35 }
  0x68   : > { %v722_v62 = vshrl.u32 %v539_v41, 16  ;;  %v6480_v12 = vpack.c.b16 %v1592_v40, %v1591_v38  ;;  %v738_v13 = vrot.slane %v736_v44, 7  ;;  %v739_v15 = vshll.u32 %v541_v29, 16  ;;  %v6493_v38 = vld [vmem:[#allocation2 + $0xf4] sm:$0xf] }
  0x69   : > { %v6484_v3 = vpack.c.b16 %v1177_v49, %v1176_v48  ;;  %v1430_v19 = vrot.slane %v1429_v50, 4  ;;  %v1435_v26 = vrot.slane %v1434_v54, 4  ;;  %v1439_v5 = vrot.slane %v1437_v57, 5  ;;  %v6495_v40 = vld [vmem:[#allocation2 + $0xf8] sm:$0xf] }
  0x6a   : > { %v909_v30 = vsel %vm6253_vm7, %v5490_v52, %v908_v59  ;;  %v918_v31 = vsel %vm6253_vm7, %v910_v60, %v917_v61  ;;  %v5482_v32 = vrot.slane %v722_v62, 11  ;;  %v741_v29 = vor.u32 %v739_v15, %v738_v13  ;;  %v464_v41 = vld [vmem:[#allocation2 + $0xcc] sm:$0x1]  ;;  %v375_v50 = vld [vmem:[%s6225_s26 + $0x38] sm:$0xf] }
  0x6b   : > { %v1432_v48 = vsel %vm6283_vm10, %v1430_v19, %v6463_v27  ;;  %v1194_v49 = vunpack.c.l.b16 %v909_v30  ;;  %v376_v54 = vld [vmem:[%s6225_s26 + $0x3c] sm:$0xf]  ;;  %v1440_v57 = vsel %vm6283_vm10, %v1435_v26, %v1439_v5  ;;  %v1195_v52 = vunpack.c.l.b16 %v918_v31  ;;  %497 = vst.msk [vmem:[#allocation2 + $0x84] sm:$0xf] %vm393_vm1, %v375_v50  ;;  %v575_v19 = vld [vmem:[#allocation2 + $0xf0] sm:$0xf] }
  0x6c   : > { %v6511_v62 = vrot.slane %v739_v15, 5  ;;  %v1447_v27 = vrot.slane %v736_v44, 4  ;;  %498 = vst.msk [vmem:[#allocation2 + $0x88] sm:$0xf] %vm393_vm1, %v376_v54  ;;  %v9032_v26 = vshrl.u32 %v6495_v40, 16  ;;  %v1594_v5 = vunpack.c.l.b16 %v1440_v57  ;;  %v6531_v57 = vld [vmem:[#allocation2 + $0x74] sm:$0xff] }
  0x6d   : > { %v6520_v15 = vpack.c.b16 %v1195_v52, %v1194_v49  ;;  %v542_v30 = vld [vmem:[#allocation2 + $0x6c] sm:$0x1]  ;;  %v9035_v49 = vshll.u32 %v6495_v40, 16  ;;  %v543_v52 = vld [vmem:[#allocation2 + $0x70] sm:$0xf] }
  0x6e   : > { %5585 = vmatmul.msk.bf16.vlgmr.msrb.gmra.mxu3 %vm1024_vm2, %v6414_v11  ;;  %v1451_v54 = vshll.u32 %v542_v30, 16 }
  0x6f   : > { %9114 = vst [vmem:[#allocation9_spill] sm:$0xff] %v6520_v15 }
  0x71   : > { %5562 = vmatmul.msk.bf16.gmra.mxu0 %vm1024_vm2, %v5985_v18  ;;  %v540_v18 = vld [vmem:[#allocation2 + $0x64] sm:$0xf] }
  0x72   : > { %v727_v37 = vshrl.u32 %v540_v18, 16  ;;  %v730_v6 = vshll.u32 %v540_v18, 16  ;;  %v449_v18 = vld [vmem:[#allocation2 + $0x7c] sm:$0x1] }
  0x73   : > { %5577 = vmatmul.msk.bf16.gmra.mxu1 %vm1024_vm2, %v6425_v22 }
  0x74   : > { %5593 = vmatmul.msk.bf16.gmra.mxu2 %vm1024_vm2, %v6423_v21  ;;  %v729_v1 = vrot.slane %v727_v37, 7  ;;  %v1441_v59 = vrot.slane %v727_v37, 4  ;;  %v1442_v60 = vrot.slane %v730_v6, 5  ;;  %v465_v37 = vsel %vm6238_vm5, 0, %v464_v41 }
  0x75   : > { %466 = vst [vmem:[#allocation2 + $0xcc] sm:$0x1] %v465_v37  ;;  %v9036_v41 = vshll.u32 %v6493_v38, 16 }
  0x76   : > { %v732_v17 = vor.u32 %v730_v6, %v729_v1  ;;  %v734_v35 = vrot.slane %v729_v1, 4  ;;  %v9033_v1 = vshrl.u32 %v6493_v38, 16  ;;  %v1593_v6 = vunpack.c.l.b16 %v1432_v48 }
  0x77   : > { %v936_v48 = vrot.slane %v9032_v26, 7  ;;  %v1453_v26 = vrot.slane %v1451_v54, 5 }
  0x78   : > { %v733_v61 = vsel %vm6253_vm7, %v5482_v32, %v732_v17  ;;  %v742_v13 = vsel %vm6253_vm7, %v734_v35, %v741_v29  ;;  %v1443_v32 = vor.u32 %v1442_v60, %v1441_v59  ;;  %v1448_v17 = vor.u32 %v1447_v27, %v6511_v62  ;;  %v6523_v29 = vld [vmem:[#allocation2 + $0x78] sm:$0xf] }
  0x79   : > { %v1178_v44 = vunpack.c.l.b16 %v733_v61  ;;  %v1179_v31 = vunpack.c.l.b16 %v742_v13  ;;  %v920_v35 = vshrl.u32 %v575_v19, 16  ;;  %v927_v50 = vrot.slane %v9033_v1, 7 }
  0x7a   : > { %v758_v59 = vshrl.u32 %v6523_v29, 16  ;;  %v6534_v60 = vpack.c.b16 %v1594_v5, %v1593_v6  ;;  %v1444_v27 = vrot.slane %v1443_v32, 4  ;;  %v1449_v13 = vrot.slane %v1448_v17, 4 }
  0x7b   : > { %v6536_v61 = vpack.c.b16 %v1179_v31, %v1178_v44  ;;  %v5491_v19 = vrot.slane %v920_v35, 11  ;;  %v930_v37 = vor.u32 %v9036_v41, %v927_v50  ;;  %v932_v30 = vrot.slane %v927_v50, 4  ;;  %v452_v35 = vld [vmem:[#allocation2 + $0x8c] sm:$0x1]  ;;  %v467_v50 = vld [vmem:[#allocation2 + $0xdc] sm:$0x1] }
  0x7c   : > { %v939_v2 = vor.u32 %v9035_v49, %v936_v48  ;;  %v744_v1 = vshrl.u32 %v543_v52, 16  ;;  %v760_v5 = vrot.slane %v758_v59, 7  ;;  %v761_v44 = vshll.u32 %v6523_v29, 16  ;;  %v547_v49 = vld [vmem:[#allocation2 + $0x80] sm:$0xf] }
  0x7d   : > { %v1525_v31 = vrot.slane %v859_v46, 4  ;;  %v1526_v32 = vrot.slane %v862_v63, 5  ;;  %v6553_v17 = vrot.slane %v871_v8, 5  ;;  %v1446_v29 = vsel %vm6283_vm10, %v1444_v27, %v6511_v62  ;;  %v377_v27 = vld [vmem:[%s6225_s26 + $0x40] sm:$0xf] }
  0x7e   : > { %5586 = vmatmul.msk.bf16.gmra.mxu3 %vm1024_vm2, %v6473_v4  ;;  %v931_v34 = vsel %vm6253_vm7, %v5491_v19, %v930_v37  ;;  %v940_v46 = vsel %vm6253_vm7, %v932_v30, %v939_v2  ;;  %v5483_v63 = vrot.slane %v744_v1, 11  ;;  %v1834_v62 = vsel %vm1073_vm0, %v5607_v43, 0  ;;  %v378_v19 = vld [vmem:[%s6225_s26 + $0x44] sm:$0xf]  ;;  %499 = vst.msk [vmem:[#allocation2 + $0x94] sm:$0xf] %vm393_vm1, %v377_v27 }
  0x7f   : > { %v763_v54 = vor.u32 %v761_v44, %v760_v5  ;;  %1843 = vmatpush.bf16.msrb.mxu3 %v1834_v62  ;;  %v453_v2 = vsel %vm6238_vm5, 0, %v452_v35  ;;  %v468_v52 = vsel %vm6238_vm5, 0, %v467_v50  ;;  %v1196_v37 = vunpack.c.l.b16 %v931_v34  ;;  %v566_v5 = vld [vmem:[#allocation2 + $0xcc] sm:$0x1]  ;;  %v6581_v62 = vld [vmem:[#allocation2 + $0x88] sm:$0xf] }
  0x80   : > { %454 = vst [vmem:[#allocation2 + $0x8c] sm:$0x1] %v453_v2  ;;  %v1197_v30 = vunpack.c.l.b16 %v940_v46  ;;  %v1595_v43 = vunpack.c.l.b16 %v1446_v29  ;;  %v6588_v34 = vrot.slane %v761_v44, 5  ;;  %v1527_v29 = vor.u32 %v1526_v32, %v1525_v31  ;;  %v6598_v44 = vld [vmem:[#allocation2 + $0x84] sm:$0xff] }
  0x81   : > { %5563 = vmatmul.msk.bf16.gmra.mxu0 %vm1024_vm2, %v5986_v55  ;;  %v450_v55 = vsel %vm6238_vm5, 0, %v449_v18  ;;  %v544_v18 = vld [vmem:[#allocation2 + $0x74] sm:$0xf]  ;;  %500 = vst.msk [vmem:[#allocation2 + $0x98] sm:$0xf] %vm393_vm1, %v378_v19  ;;  %v1535_v19 = vshll.u32 %v566_v5, 16 }
  0x82   : > { %451 = vst [vmem:[#allocation2 + $0x7c] sm:$0x1] %v450_v55  ;;  %v749_v55 = vshrl.u32 %v544_v18, 16  ;;  %v752_v6 = vshll.u32 %v544_v18, 16  ;;  %v1531_v18 = vrot.slane %v868_v53, 4  ;;  %v1454_v53 = vsel %vm6283_vm10, %v1449_v13, %v1453_v26 }
  0x83   : > { %5578 = vmatmul.msk.bf16.gmra.mxu1 %vm1024_vm2, %v6484_v3  ;;  %v548_v13 = vld [vmem:[#allocation2 + $0x84] sm:$0xf]  ;;  %469 = vst [vmem:[#allocation2 + $0xdc] sm:$0x1] %v468_v52  ;;  %v6593_v27 = vpack.c.b16 %v1197_v30, %v1196_v37  ;;  %v1528_v31 = vrot.slane %v1527_v29, 4  ;;  %v1537_v37 = vrot.slane %v1535_v19, 5 }
  0x84   : > { %5594 = vmatmul.msk.bf16.gmra.mxu2 %vm1024_vm2, %v6480_v12  ;;  %v751_v7 = vrot.slane %v749_v55, 7  ;;  %v1455_v26 = vrot.slane %v749_v55, 4  ;;  %v1456_v1 = vrot.slane %v752_v6, 5  ;;  %v1461_v55 = vrot.slane %v758_v59, 4  ;;  %v470_v29 = vld [vmem:[#allocation2 + $0xec] sm:$0x1] }
  0x85   : > { %v771_v2 = vshrl.u32 %v548_v13, 16  ;;  %9115 = vst [vmem:[#allocation10_spill] sm:$0xff] %v6593_v27  ;;  %v774_v30 = vshll.u32 %v548_v13, 16 }
  0x86   : > { %v754_v8 = vor.u32 %v752_v6, %v751_v7  ;;  %v756_v48 = vrot.slane %v751_v7, 4  ;;  %v1596_v7 = vunpack.c.l.b16 %v1454_v53  ;;  %v1532_v53 = vor.u32 %v1531_v18, %v6553_v17 }
  0x87   : > { %v1457_v59 = vor.u32 %v1456_v1, %v1455_v26  ;;  %v766_v18 = vshrl.u32 %v547_v49, 16  ;;  %v773_v36 = vrot.slane %v771_v2, 7  ;;  %v455_v1 = vld [vmem:[#allocation2 + $0x9c] sm:$0x1]  ;;  %v1530_v49 = vsel %vm6283_vm10, %v1528_v31, %v6553_v17 }
  0x88   : > { %v755_v35 = vsel %vm6253_vm7, %v5483_v63, %v754_v8  ;;  %v764_v50 = vsel %vm6253_vm7, %v756_v48, %v763_v54  ;;  %v780_v63 = vshrl.u32 %v6581_v62, 16  ;;  %v6596_v48 = vpack.c.b16 %v1596_v7, %v1595_v43 }
  0x89   : > { %v546_v46 = vld [vmem:[#allocation2 + $0x7c] sm:$0x1]  ;;  %v1180_v8 = vunpack.c.l.b16 %v755_v35  ;;  %v1181_v41 = vunpack.c.l.b16 %v764_v50  ;;  %v1462_v54 = vor.u32 %v1461_v55, %v6588_v34  ;;  %v1533_v32 = vrot.slane %v1532_v53, 4 }
  0x8a   : > { %v1465_v52 = vshll.u32 %v546_v46, 16  ;;  %v782_v5 = vrot.slane %v780_v63, 7  ;;  %v783_v35 = vshll.u32 %v6581_v62, 16  ;;  %v1458_v26 = vrot.slane %v1457_v59, 4 }
  0x8b   : > { %v6604_v43 = vpack.c.b16 %v1181_v41, %v1180_v8  ;;  %v1463_v7 = vrot.slane %v1462_v54, 4  ;;  %v5484_v55 = vrot.slane %v766_v18, 11  ;;  %v1538_v13 = vsel %vm6283_vm10, %v1533_v32, %v1537_v37  ;;  %v379_v18 = vld [vmem:[%s6225_s26 + $0x48] sm:$0xf]  ;;  %v380_v37 = vld [vmem:[%s6225_s26 + $0x4c] sm:$0xf] }
  0x8c   : > { %v1467_v50 = vrot.slane %v1465_v52, 5  ;;  %v776_v41 = vor.u32 %v774_v30, %v773_v36  ;;  %v778_v62 = vrot.slane %v773_v36, 4  ;;  %v785_v46 = vor.u32 %v783_v35, %v782_v5  ;;  %501 = vst.msk [vmem:[#allocation2 + $0xa4] sm:$0xf] %vm393_vm1, %v379_v18 }
  0x8d   : > { %v1469_v19 = vrot.slane %v771_v2, 4  ;;  %v456_v17 = vsel %vm6238_vm5, 0, %v455_v1  ;;  %v1470_v8 = vrot.slane %v774_v30, 5  ;;  %v1539_v59 = vrot.slane %v881_v56, 4  ;;  %v6645_v30 = vld [vmem:[#allocation2 + $0x94] sm:$0xf] }
  0x8e   : > { %5587 = vmatmul.msk.bf16.gmra.mxu3 %vm1024_vm2, %v6520_v15  ;;  %v1540_v36 = vrot.slane %v884_v14, 5  ;;  %457 = vst [vmem:[#allocation2 + $0x9c] sm:$0x1] %v456_v17  ;;  %v471_v54 = vsel %vm6238_vm5, 0, %v470_v29  ;;  %v1460_v52 = vsel %vm6283_vm10, %v1458_v26, %v6588_v34  ;;  %v1468_v2 = vsel %vm6283_vm10, %v1463_v7, %v1467_v50  ;;  %v570_v50 = vld [vmem:[#allocation2 + $0xdc] sm:$0x1] }
  0x8f   : > { %v1607_v31 = vunpack.c.l.b16 %v1530_v49  ;;  %v1608_v32 = vunpack.c.l.b16 %v1538_v13  ;;  %472 = vst [vmem:[#allocation2 + $0xec] sm:$0x1] %v471_v54  ;;  %v777_v39 = vsel %vm6253_vm7, %v5484_v55, %v776_v41  ;;  %v786_v56 = vsel %vm6253_vm7, %v778_v62, %v785_v46  ;;  %v6650_v49 = vld [vmem:[#allocation2 + $0x98] sm:$0xf]  ;;  %v550_v13 = vld [vmem:[#allocation2 + $0x8c] sm:$0x1] }
  0x90   : > { %v6640_v14 = vrot.slane %v893_v16, 5  ;;  %v1545_v34 = vrot.slane %v890_v58, 4  ;;  %502 = vst.msk [vmem:[#allocation2 + $0xa8] sm:$0xf] %vm393_vm1, %v380_v37  ;;  %v1597_v5 = vunpack.c.l.b16 %v1460_v52  ;;  %v1598_v26 = vunpack.c.l.b16 %v1468_v2  ;;  %v551_v17 = vld [vmem:[#allocation2 + $0x90] sm:$0xf] }
  0x91   : > { %5564 = vmatmul.msk.bf16.gmra.mxu0 %vm1024_vm2, %v6531_v57  ;;  %v6648_v1 = vrot.slane %v783_v35, 5  ;;  %v1475_v7 = vrot.slane %v780_v63, 4  ;;  %v1182_v55 = vunpack.c.l.b16 %v777_v39  ;;  %v1183_v16 = vunpack.c.l.b16 %v786_v56  ;;  %v6657_v54 = vld [vmem:[#allocation2 + $0x94] sm:$0xff]  ;;  %v5663_v39 = vld [vmem:[%s9020_s1 + $0xc] sm:$0x3] }
  0x92   : > { %v6590_v6 = vpop.f32.mrf.mxu0  ;;  %v1471_v41 = vor.u32 %v1470_v8, %v1469_v19  ;;  %v1541_v47 = vor.u32 %v1540_v36, %v1539_v59  ;;  %v6652_v58 = vpack.c.b16 %v1608_v32, %v1607_v31  ;;  %v1546_v62 = vor.u32 %v1545_v34, %v6640_v14 }
  0x93   : > { %5579 = vmatmul.msk.bf16.gmra.mxu1 %vm1024_vm2, %v6536_v61  ;;  %v793_v46 = vshrl.u32 %v6645_v30, 16  ;;  %v1549_v29 = vshll.u32 %v570_v50, 16  ;;  %v9038_v35 = vshrl.u32 %v6650_v49, 16  ;;  %v1476_v63 = vor.u32 %v1475_v7, %v6648_v1 }
  0x94   : > { %5595 = vmatmul.msk.bf16.gmra.mxu2 %vm1024_vm2, %v6534_v60  ;;  %9116 = vst [vmem:[#allocation11_spill] sm:$0xff] %v6652_v58  ;;  %v1479_v52 = vshll.u32 %v550_v13, 16  ;;  %v6660_v2 = vpack.c.b16 %v1598_v26, %v1597_v5  ;;  %v6662_v18 = vpack.c.b16 %v1183_v16, %v1182_v55  ;;  %v1472_v8 = vrot.slane %v1471_v41, 4  ;;  %v458_v16 = vld [vmem:[#allocation2 + $0xac] sm:$0x1] }
  0x95   : > { %v1542_v59 = vrot.slane %v1541_v47, 4  ;;  %v1547_v36 = vrot.slane %v1546_v62, 4  ;;  %v788_v31 = vshrl.u32 %v551_v17, 16  ;;  %v795_v32 = vrot.slane %v793_v46, 7 }
  0x96   : > { %v796_v37 = vshll.u32 %v6645_v30, 16  ;;  %v1551_v56 = vrot.slane %v1549_v29, 5  ;;  %v804_v34 = vrot.slane %v9038_v35, 7  ;;  %v805_v5 = vshll.u32 %v6650_v49, 16 }
  0x97   : > { %v2268_v26 = vsel %vm1073_vm0, %v5663_v39, 0  ;;  %v1477_v50 = vrot.slane %v1476_v63, 4  ;;  %v1481_v55 = vrot.slane %v1479_v52, 5  ;;  %v1474_v47 = vsel %vm6283_vm10, %v1472_v8, %v6648_v1 }
  0x98   : > { %2277 = vmatpush.bf16.msrb.mxu2 %v2268_v26  ;;  %v1544_v62 = vsel %vm6283_vm10, %v1542_v59, %v6640_v14  ;;  %v5485_v29 = vrot.slane %v788_v31, 11  ;;  %v798_v17 = vor.u32 %v796_v37, %v795_v32  ;;  %v800_v63 = vrot.slane %v795_v32, 4  ;;  %v574_v59 = vld [vmem:[#allocation2 + $0xec] sm:$0x1] }
  0x99   : > { %v1552_v52 = vsel %vm6283_vm10, %v1547_v36, %v1551_v56  ;;  %v807_v1 = vor.u32 %v805_v5, %v804_v34  ;;  %v1553_v8 = vrot.slane %v903_v0, 4  ;;  %v459_v39 = vsel %vm6238_vm5, 0, %v458_v16  ;;  %v381_v34 = vld [vmem:[%s6225_s26 + $0x50] sm:$0xf] }
  0x9a   : > { %v6617_v53 = vpop.f32.mrf.mxu0  ;;  %v1482_v14 = vsel %vm6283_vm10, %v1477_v50, %v1481_v55  ;;  %v1554_v31 = vrot.slane %v906_v33, 5  ;;  %v9117_v32 = vshll.u32 %v6442_v51, 16  ;;  %460 = vst [vmem:[#allocation2 + $0xac] sm:$0x1] %v459_v39  ;;  %v9118_v56 = vshrl.u32 %v6442_v51, 16 }
  0x9b   : > { %v1599_v50 = vunpack.c.l.b16 %v1474_v47  ;;  %v1609_v55 = vunpack.c.l.b16 %v1544_v62  ;;  %v1610_v35 = vunpack.c.l.b16 %v1552_v52  ;;  %v6720_v33 = vld [vmem:[#allocation2 + $0xa4] sm:$0xf]  ;;  %503 = vst.msk [vmem:[#allocation2 + $0xb4] sm:$0xf] %vm393_vm1, %v381_v34  ;;  %v1600_v39 = vunpack.c.l.b16 %v1482_v14  ;;  %v6728_v47 = vld [vmem:[#allocation2 + $0xa8] sm:$0xf] }
  0x9c   : > { %v6707_v26 = vrot.slane %v9117_v32, 5  ;;  %v1559_v0 = vrot.slane %v9118_v56, 4  ;;  %v799_v51 = vsel %vm6253_vm7, %v5485_v29, %v798_v17  ;;  %v808_v32 = vsel %vm6253_vm7, %v800_v63, %v807_v1  ;;  %v554_v63 = vld [vmem:[#allocation2 + $0x9c] sm:$0x1] }
  0x9d   : > { %v1483_v52 = vrot.slane %v793_v46, 4  ;;  %v1484_v56 = vrot.slane %v796_v37, 5  ;;  %v9119_v14 = vshrl.u32 %v6650_v49, 16  ;;  %v1555_v1 = vor.u32 %v1554_v31, %v1553_v8  ;;  %v555_v46 = vld [vmem:[#allocation2 + $0xa0] sm:$0xf] }
  0x9e   : > { %5588 = vmatmul.msk.bf16.gmra.mxu3 %vm1024_vm2, %v6593_v27  ;;  %v6733_v27 = vrot.slane %v805_v5, 5  ;;  %v6743_v30 = vpack.c.b16 %v1610_v35, %v1609_v55  ;;  %v815_v37 = vshrl.u32 %v6720_v33, 16  ;;  %v1184_v5 = vunpack.c.l.b16 %v799_v51 }
  0x9f   : > { %v1489_v34 = vrot.slane %v9119_v14, 4  ;;  %v1493_v8 = vshll.u32 %v554_v63, 16  ;;  %v810_v55 = vshrl.u32 %v555_v46, 16  ;;  %v818_v51 = vshll.u32 %v6720_v33, 16 }
  0xa0   : > { %9120 = vst [vmem:[#allocation12_spill] sm:$0xff] %v6743_v30  ;;  %v817_v49 = vrot.slane %v815_v37, 7 }
  0xa1   : > { %5565 = vmatmul.msk.bf16.gmra.mxu0 %vm1024_vm2, %v6598_v44  ;;  %v1490_v14 = vor.u32 %v1489_v34, %v6733_v27 }
  0xa3   : > { %5580 = vmatmul.msk.bf16.gmra.mxu1 %vm1024_vm2, %v6604_v43  ;;  %v1491_v63 = vrot.slane %v1490_v14, 4  ;;  %v822_v14 = vrot.slane %v817_v49, 4 }
  0xa4   : > { %5596 = vmatmul.msk.bf16.gmra.mxu2 %vm1024_vm2, %v6596_v48 }
  0xae   : > { %v6664_v19 = vpop.f32.mrf.mxu0  ;;  %5602 = vmatmul.msk.bf16.vlgmr.msra.gmra.mxu3 %vm1024_vm2, %v6652_v58 }
  0xb0   : > { %v1274_v7 = vpop.f32.mrf.mxu1 }
  0xb1   : > { %5566 = vmatmul.msk.bf16.gmra.mxu0 %vm1024_vm2, %v6657_v54  ;;  %v6681_v13 = vadd.f32 %v1274_v7, %v6590_v6  ;;  %v6683_v41 = vpop.f32.mrf.mxu3  ;;  %v473_v6 = vld [vmem:[#allocation2 + $0xfc] sm:$0x1]  ;;  %v382_v7 = vld [vmem:[%s6225_s26 + $0x54] sm:$0xf] }
  0xb2   : > { %v474_v16 = vsel %vm6238_vm5, 0, %v473_v6  ;;  %v2114_v6 = vsel %vm1073_vm0, %v5645_v45, 0  ;;  %504 = vst.msk [vmem:[#allocation2 + $0xb8] sm:$0xf] %vm393_vm1, %v382_v7  ;;  %v1560_v7 = vor.u32 %v1559_v0, %v6707_v26  ;;  %v1563_v45 = vshll.u32 %v574_v59, 16 }
  0xb3   : > { %5581 = vmatmul.msk.bf16.gmra.mxu1 %vm1024_vm2, %v6662_v18  ;;  %475 = vst [vmem:[#allocation2 + $0xfc] sm:$0x1] %v474_v16  ;;  %v6747_v16 = vpack.c.b16 %v1600_v39, %v1599_v50  ;;  %v1556_v59 = vrot.slane %v1555_v1, 4  ;;  %v9122_v50 = vshrl.u32 %v6728_v47, 16 }
  0xb4   : > { %5597 = vmatmul.msk.bf16.gmra.mxu2 %vm1024_vm2, %v6660_v2  ;;  %2123 = vmatpush.bf16.msrb.mxu1 %v2114_v6  ;;  %v1185_v6 = vunpack.c.l.b16 %v808_v32  ;;  %v1561_v35 = vrot.slane %v1560_v7, 4  ;;  %v1565_v0 = vrot.slane %v1563_v45, 5  ;;  %v827_v32 = vshll.u32 %v6728_v47, 16 }
  0xb5   : > { %v826_v39 = vrot.slane %v9122_v50, 7  ;;  %v1495_v45 = vrot.slane %v1493_v8, 5  ;;  %v1558_v33 = vsel %vm6283_vm10, %v1556_v59, %v6707_v26 }
  0xb6   : > { %v6709_v36 = vpop.f32.mrf.mxu0  ;;  %v1566_v46 = vsel %vm6283_vm10, %v1561_v35, %v1565_v0  ;;  %v1611_v0 = vunpack.c.l.b16 %v1558_v33 }
  0xb7   : > { %v829_v50 = vor.u32 %v827_v32, %v826_v39  ;;  %v1496_v59 = vsel %vm6283_vm10, %v1491_v63, %v1495_v45  ;;  %v9126_v45 = vshll.u32 %v6495_v40, 16 }
  0xb8   : > { %v1276_v62 = vpop.f32.mrf.mxu1  ;;  %v1602_v15 = vunpack.c.l.b16 %v1496_v59 }
  0xb9   : > { %v6738_v29 = vadd.f32 %v1276_v62, %v6617_v53  ;;  %v6740_v17 = vpop.f32.mrf.mxu3  ;;  %v6749_v53 = vld [vmem:[#allocation2 + $0xa4] sm:$0xff]  ;;  %v1485_v62 = vor.u32 %v1484_v56, %v1483_v52  ;;  %v6760_v52 = vpack.c.b16 %v1185_v6, %v1184_v5  ;;  %v461_v5 = vld [vmem:[#allocation2 + $0xbc] sm:$0x1]  ;;  %v5486_v6 = vrot.slane %v810_v55, 11  ;;  %v6815_v58 = vld [vmem:[#allocation2 + $0xb4] sm:$0xff] }
  0xba   : > { %9121 = vst [vmem:[#allocation13_spill] sm:$0xff] %v6749_v53  ;;  %v1612_v55 = vunpack.c.l.b16 %v1566_v46  ;;  %v1571_v33 = vrot.slane %v9126_v45, 5  ;;  %v9127_v46 = vshrl.u32 %v6495_v40, 16  ;;  %v578_v20 = vld [vmem:[#allocation2 + $0xfc] sm:$0x1] }
  0xbb   : > { %v1486_v34 = vrot.slane %v1485_v62, 4  ;;  %v820_v62 = vor.u32 %v818_v51, %v817_v49 }
  0xbd   : > { %v1488_v26 = vsel %vm6283_vm10, %v1486_v34, %v6733_v27  ;;  %v821_v39 = vsel %vm6253_vm7, %v5486_v6, %v820_v62  ;;  %v9125_v34 = vshll.u32 %v6493_v38, 16 }
  0xbe   : > { %v6752_v31 = vpop.f32.mrf.mxu0  ;;  %5603 = vmatmul.msk.bf16.gmra.mxu3 %vm1024_vm2, %v6743_v30  ;;  %v1186_v45 = vunpack.c.l.b16 %v821_v39  ;;  %v558_v30 = vld [vmem:[#allocation2 + $0xac] sm:$0x1] }
  0xbf   : > { %v1568_v63 = vrot.slane %v9125_v34, 5  ;;  %v6811_v34 = vld [vmem:[#allocation2 + $0xb8] sm:$0xf] }
  0xc0   : > { %v1279_v56 = vpop.f32.mrf.mxu1 }
  0xc1   : > { %5567 = vmatmul.msk.bf16.gmra.mxu0 %vm1024_vm2, %v6749_v53  ;;  %v6765_v1 = vadd.f32 %v1279_v56, %v6664_v19  ;;  %v6767_v7 = vpop.f32.mrf.mxu3  ;;  %v462_v19 = vsel %vm6238_vm5, 0, %v461_v5  ;;  %v830_v56 = vsel %vm6253_vm7, %v822_v14, %v829_v50  ;;  %v9124_v5 = vshrl.u32 %v6493_v38, 16 }
  0xc2   : > { %463 = vst [vmem:[#allocation2 + $0xbc] sm:$0x1] %v462_v19  ;;  %v1573_v19 = vrot.slane %v9127_v46, 4  ;;  %v6807_v14 = vpack.c.b16 %v1612_v55, %v1611_v0  ;;  %v1497_v50 = vrot.slane %v815_v37, 4  ;;  %v1498_v38 = vrot.slane %v818_v51, 5 }
  0xc3   : > { %5582 = vmatmul.msk.bf16.gmra.mxu1 %vm1024_vm2, %v6760_v52  ;;  %v1567_v27 = vrot.slane %v9124_v5, 4  ;;  %v6809_v5 = vld [vmem:[#allocation2 + $0xb4] sm:$0xf]  ;;  %v1187_v40 = vunpack.c.l.b16 %v830_v56  ;;  %v1501_v46 = vrot.slane %v827_v32, 5  ;;  %v559_v0 = vld [vmem:[#allocation2 + $0xb0] sm:$0xf] }
  0xc4   : > { %5598 = vmatmul.msk.bf16.gmra.mxu2 %vm1024_vm2, %v6747_v16  ;;  %9128 = vst [vmem:[#allocation15_spill] sm:$0xff] %v6807_v14  ;;  %v837_v37 = vshrl.u32 %v6809_v5, 16  ;;  %v846_v51 = vshrl.u32 %v6811_v34, 16  ;;  %v1499_v32 = vor.u32 %v1498_v38, %v1497_v50  ;;  %v849_v50 = vshll.u32 %v6811_v34, 16 }
  0xc5   : > { %v1569_v4 = vor.u32 %v1568_v63, %v1567_v27  ;;  %v1507_v27 = vshll.u32 %v558_v30, 16 }
  0xc6   : > { %v6785_v35 = vpop.f32.mrf.mxu0 }
  0xc7   : > { %v1691_v8 = vpop.f32.mrf.mxu2  ;;  %v1570_v63 = vrot.slane %v1569_v4, 4  ;;  %v1500_v4 = vrot.slane %v1499_v32, 4 }
  0xc8   : > { %v6788_v49 = vadd.f32 %v1691_v8, %v6681_v13  ;;  %v1281_v13 = vpop.f32.mrf.mxu1  ;;  %v1601_v8 = vunpack.c.l.b16 %v1488_v26  ;;  %v9129_v26 = vshrl.u32 %v6728_v47, 16 }
  0xc9   : > { %v6803_v6 = vadd.f32 %v1281_v13, %v6709_v36  ;;  %v6805_v62 = vpop.f32.mrf.mxu3  ;;  %v1574_v36 = vor.u32 %v1573_v19, %v1571_v33  ;;  %v1577_v13 = vshll.u32 %v578_v20, 16  ;;  %v6828_v20 = vpack.c.b16 %v1187_v40, %v1186_v45 }
  0xca   : > { %9123 = vst [vmem:[#allocation14_spill] sm:$0xff] %v6788_v49  ;;  %v1503_v59 = vrot.slane %v9129_v26, 4  ;;  %v6819_v11 = vpack.c.b16 %v1602_v15, %v1601_v8  ;;  %v832_v49 = vshrl.u32 %v559_v0, 16  ;;  %v839_v15 = vrot.slane %v837_v37, 7 }
  0xcb   : > { %v1575_v19 = vrot.slane %v1574_v36, 4  ;;  %v1579_v26 = vrot.slane %v1577_v13, 5  ;;  %v840_v8 = vshll.u32 %v6809_v5, 16  ;;  %v1509_v40 = vrot.slane %v1507_v27, 5 }
  0xcc   : > { %v1504_v56 = vor.u32 %v1503_v59, %v1501_v46  ;;  %v1572_v59 = vsel %vm6283_vm10, %v1570_v63, %v1571_v33  ;;  %v5487_v34 = vrot.slane %v832_v49, 11  ;;  %v1502_v32 = vsel %vm6283_vm10, %v1500_v4, %v1501_v46  ;;  %v5680_v33 = vld [vmem:[%s9020_s1 + $0xe] sm:$0x3] }
  0xcd   : > { %v1580_v5 = vsel %vm6283_vm10, %v1575_v19, %v1579_v26  ;;  %v842_v36 = vor.u32 %v840_v8, %v839_v15  ;;  %v2402_v63 = vsel %vm1073_vm0, %v5680_v33, 0  ;;  %v1515_v33 = vrot.slane %v849_v50, 5 }
  0xce   : > { %v6821_v39 = vpop.f32.mrf.mxu0  ;;  %5604 = vmatmul.msk.bf16.gmra.mxu3 %vm1024_vm2, %v6807_v14  ;;  %v1505_v30 = vrot.slane %v1504_v56, 4  ;;  %v1613_v56 = vunpack.c.l.b16 %v1572_v59  ;;  %v1614_v27 = vunpack.c.l.b16 %v1580_v5  ;;  %v1511_v5 = vrot.slane %v837_v37, 4  ;;  %v5701_v37 = vld [vmem:[%s9020_s1 + $0x10] sm:$0x3] }
  0xcf   : > { %v1693_v55 = vpop.f32.mrf.mxu2  ;;  %v843_v26 = vsel %vm6253_vm7, %v5487_v34, %v842_v36  ;;  %2411 = vmatpush.bf16.msra.mxu3 %v2402_v63  ;;  %v1517_v14 = vrot.slane %v846_v51, 4 }
  0xd0   : > { %v6824_v47 = vadd.f32 %v1693_v55, %v6738_v29  ;;  %v1284_v53 = vpop.f32.mrf.mxu1  ;;  %v848_v29 = vrot.slane %v846_v51, 7  ;;  %v1510_v49 = vsel %vm6283_vm10, %v1505_v30, %v1509_v40  ;;  %v6863_v59 = vpack.c.b16 %v1614_v27, %v1613_v56  ;;  %v6034_v27 = vld [vmem:[#allocation2 + $0x14] sm:$0xff] }
  0xd1   : > { %5568 = vmatmul.msk.bf16.gmra.mxu0 %vm1024_vm2, %v6815_v58  ;;  %v1285_v38 = vadd.f32 %v1284_v53, %v6752_v31  ;;  %v6835_v45 = vpop.f32.mrf.mxu3  ;;  %v844_v53 = vrot.slane %v839_v15, 4  ;;  %v1604_v4 = vunpack.c.l.b16 %v1510_v49  ;;  %v1512_v30 = vrot.slane %v840_v8, 5 }
  0xd2   : > { %v851_v31 = vor.u32 %v849_v50, %v848_v29  ;;  %v1603_v29 = vunpack.c.l.b16 %v1502_v32  ;;  %v1188_v40 = vunpack.c.l.b16 %v843_v26  ;;  %v1518_v50 = vor.u32 %v1517_v14, %v1515_v33 }
  0xd3   : > { %5583 = vmatmul.msk.bf16.gmra.mxu1 %vm1024_vm2, %v6828_v20  ;;  %v2548_v32 = vsel %vm1073_vm0, %v5701_v37, 0 }
  0xd4   : > { %5599 = vmatmul.msk.bf16.gmra.mxu2 %vm1024_vm2, %v6819_v11  ;;  %2557 = vmatpush.bf16.msra.mxu0 %v2548_v32  ;;  %v1519_v14 = vrot.slane %v1518_v50, 4 }
  0xd6   : > { %v1103_v0 = vpop.f32.mrf.mxu0 }
  0xd7   : > { %v1696_v13 = vpop.f32.mrf.mxu2 }
  0xd8   : > { %v6846_v55 = vadd.f32 %v1696_v13, %v6765_v1  ;;  %v1286_v19 = vpop.f32.mrf.mxu1  ;;  %v852_v1 = vsel %vm6253_vm7, %v844_v53, %v851_v31  ;;  %v6868_v31 = vpack.c.b16 %v1604_v4, %v1603_v29 }
  0xd9   : > { %v1287_v46 = vadd.f32 %v1286_v19, %v6785_v35  ;;  %v6861_v15 = vpop.f32.mrf.mxu3  ;;  %v1189_v13 = vunpack.c.l.b16 %v852_v1  ;;  %v1513_v35 = vor.u32 %v1512_v30, %v1511_v5 }
  0xda   : > { %9130 = vst [vmem:[#allocation16_spill] sm:$0xff] %v6846_v55  ;;  %v562_v55 = vld [vmem:[#allocation2 + $0xbc] sm:$0x1] }
  0xdb   : > { %v6875_v8 = vpack.c.b16 %v1189_v13, %v1188_v40  ;;  %v1521_v51 = vshll.u32 %v562_v55, 16  ;;  %v1514_v63 = vrot.slane %v1513_v35, 4 }
  0xdd   : > { %v1523_v55 = vrot.slane %v1521_v51, 5  ;;  %v1516_v29 = vsel %vm6283_vm10, %v1514_v63, %v1515_v33  ;;  %v6900_v33 = vld [vmem:[#allocation2 + $0x24] sm:$0xff] }
  0xde   : > { %v1106_v36 = vpop.f32.mrf.mxu0  ;;  %5605 = vmatmul.msk.bf16.gmra.mxu3 %vm1024_vm2, %v6863_v59  ;;  %v1605_v40 = vunpack.c.l.b16 %v1516_v29 }
  0xdf   : > { %v1698_v34 = vpop.f32.mrf.mxu2 }
  0xe0   : > { %v6866_v53 = vadd.f32 %v1698_v34, %v6803_v6  ;;  %v1289_v56 = vpop.f32.mrf.mxu1 }
  0xe1   : > { %5629 = vmatmul.msk.bf16.vlgmr.msrb.gmra.mxu0 %vm1024_vm2, %v6034_v27  ;;  %v1290_v6 = vadd.f32 %v1289_v56, %v6821_v39  ;;  %v6880_v49 = vpop.f32.mrf.mxu3  ;;  %v1524_v39 = vsel %vm6283_vm10, %v1519_v14, %v1523_v55 }
  0xe2   : > { %v1606_v13 = vunpack.c.l.b16 %v1524_v39  ;;  %v6920_v39 = vld [vmem:[#allocation2 + $0x34] sm:$0xff] }
  0xe3   : > { %5584 = vmatmul.msk.bf16.gmra.mxu1 %vm1024_vm2, %v6875_v8 }
  0xe4   : > { %5600 = vmatmul.msk.bf16.gmra.mxu2 %vm1024_vm2, %v6868_v31  ;;  %v6896_v50 = vpack.c.b16 %v1606_v13, %v1605_v40 }
  0xe6   : > { %v1108_v26 = vpop.f32.mrf.mxu0 }
  0xe7   : > { %v1701_v19 = vpop.f32.mrf.mxu2 }
  0xe8   : > { %v6886_v1 = vadd.f32 %v1701_v19, %v1285_v38  ;;  %v1291_v4 = vpop.f32.mrf.mxu1 }
  0xe9   : > { %v1292_v5 = vadd.f32 %v1291_v4, %v1103_v0  ;;  %v6892_v30 = vpop.f32.mrf.mxu3 }
  0xee   : > { %v1111_v35 = vpop.f32.mrf.mxu0  ;;  %5608 = vmatmul.msk.bf16.vlgmr.msrb.gmra.mxu3 %vm1024_vm2, %v6304_v42 }
  0xef   : > { %v1703_v34 = vpop.f32.mrf.mxu2 }
  0xf0   : > { %v6894_v37 = vadd.f32 %v1703_v34, %v1287_v46  ;;  %v1294_v38 = vpop.f32.mrf.mxu1 }
  0xf1   : > { %5630 = vmatmul.msk.bf16.gmra.mxu0 %vm1024_vm2, %v6900_v33  ;;  %v1295_v0 = vadd.f32 %v1294_v38, %v1106_v36  ;;  %v1334_v51 = vpop.f32.mrf.mxu3 }
  0xf2   : > { %v6907_v32 = vadd.f32 %v1334_v51, %v6683_v41 }
  0xf3   : > { %5646 = vmatmul.msk.bf16.vlgmr.msrb.gmra.mxu1 %vm1024_vm2, %v6324_v23 }
  0xf4   : > { %5601 = vmatmul.msk.bf16.gmra.mxu2 %vm1024_vm2, %v6896_v50 }
  0xf6   : > { %v1113_v56 = vpop.f32.mrf.mxu0 }
  0xf7   : > { %v1706_v46 = vpop.f32.mrf.mxu2 }
  0xf8   : > { %v6911_v42 = vadd.f32 %v1706_v46, %v1290_v6  ;;  %v1296_v27 = vpop.f32.mrf.mxu1 }
  0xf9   : > { %v1297_v63 = vadd.f32 %v1296_v27, %v1108_v26  ;;  %v1336_v14 = vpop.f32.mrf.mxu3 }
  0xfa   : > { %v6914_v55 = vadd.f32 %v1336_v14, %v6740_v17 }
  0xfe   : > { %v1116_v19 = vpop.f32.mrf.mxu0  ;;  %5609 = vmatmul.msk.bf16.gmra.mxu3 %vm1024_vm2, %v6327_v24 }
  0xff   : > { %v1708_v36 = vpop.f32.mrf.mxu2 }
 0x100   : > { %v6916_v29 = vadd.f32 %v1708_v36, %v1292_v5  ;;  %v1299_v41 = vpop.f32.mrf.mxu1 }
 0x101   : > { %5631 = vmatmul.msk.bf16.gmra.mxu0 %vm1024_vm2, %v6920_v39  ;;  %v1300_v23 = vadd.f32 %v1299_v41, %v1111_v35  ;;  %v1339_v6 = vpop.f32.mrf.mxu3 }
 0x102   : > { %v6927_v17 = vadd.f32 %v1339_v6, %v6767_v7  ;;  %v6940_v7 = vld [vmem:[#allocation2 + $0x44] sm:$0xff] }
 0x103   : > { %5647 = vmatmul.msk.bf16.gmra.mxu1 %vm1024_vm2, %v6368_v10 }
 0x104   : > { %5664 = vmatmul.msk.bf16.vlgmr.msrb.gmra.mxu2 %vm1024_vm2, %v6327_v24 }
 0x106   : > { %v1118_v4 = vpop.f32.mrf.mxu0 }
 0x107   : > { %v1711_v26 = vpop.f32.mrf.mxu2 }
 0x108   : > { %v6931_v5 = vadd.f32 %v1711_v26, %v1295_v0  ;;  %v1301_v40 = vpop.f32.mrf.mxu1 }
 0x109   : > { %v1302_v13 = vadd.f32 %v1301_v40, %v1113_v56  ;;  %v1341_v34 = vpop.f32.mrf.mxu3 }
 0x10a   : > { %v6934_v38 = vadd.f32 %v1341_v34, %v6805_v62 }
 0x10e   : > { %v1121_v51 = vpop.f32.mrf.mxu0  ;;  %5610 = vmatmul.msk.bf16.gmra.mxu3 %vm1024_vm2, %v6376_v25 }
 0x10f   : > { %v1713_v35 = vpop.f32.mrf.mxu2 }
 0x110   : > { %v6936_v46 = vadd.f32 %v1713_v35, %v1297_v63  ;;  %v1304_v24 = vpop.f32.mrf.mxu1 }
 0x111   : > { %5632 = vmatmul.msk.bf16.gmra.mxu0 %vm1024_vm2, %v6940_v7  ;;  %v1305_v0 = vadd.f32 %v1304_v24, %v1116_v19  ;;  %v1344_v27 = vpop.f32.mrf.mxu3 }
 0x112   : > { %v6947_v62 = vadd.f32 %v1344_v27, %v6835_v45  ;;  %v6960_v45 = vld [vmem:[#allocation2 + $0x54] sm:$0xff] }
 0x113   : > { %5648 = vmatmul.msk.bf16.gmra.mxu1 %vm1024_vm2, %v6423_v21  ;;  %9131 = vst [vmem:[#allocation17_spill] sm:$0xff] %v6960_v45 }
 0x114   : > { %5665 = vmatmul.msk.bf16.gmra.mxu2 %vm1024_vm2, %v6376_v25 }
 0x116   : > { %v1123_v63 = vpop.f32.mrf.mxu0 }
 0x117   : > { %v1716_v56 = vpop.f32.mrf.mxu2 }
 0x118   : > { %v6951_v14 = vadd.f32 %v1716_v56, %v1300_v23  ;;  %v1306_v36 = vpop.f32.mrf.mxu1 }
 0x119   : > { %v1307_v41 = vadd.f32 %v1306_v36, %v1118_v4  ;;  %v1346_v6 = vpop.f32.mrf.mxu3 }
 0x11a   : > { %v6954_v26 = vadd.f32 %v1346_v6, %v6861_v15 }
 0x11e   : > { %v1126_v40 = vpop.f32.mrf.mxu0  ;;  %5611 = vmatmul.msk.bf16.gmra.mxu3 %vm1024_vm2, %v6425_v22 }
 0x11f   : > { %v1718_v19 = vpop.f32.mrf.mxu2 }
 0x120   : > { %v6956_v34 = vadd.f32 %v1718_v19, %v1302_v13  ;;  %v1309_v25 = vpop.f32.mrf.mxu1 }
 0x121   : > { %5633 = vmatmul.msk.bf16.gmra.mxu0 %vm1024_vm2, %v6960_v45  ;;  %v1310_v23 = vadd.f32 %v1309_v25, %v1121_v51  ;;  %v1349_v35 = vpop.f32.mrf.mxu3 }
 0x122   : > { %v6967_v15 = vadd.f32 %v1349_v35, %v6880_v49  ;;  %v6980_v49 = vld [vmem:[#allocation2 + $0x64] sm:$0xff] }
 0x123   : > { %5649 = vmatmul.msk.bf16.gmra.mxu1 %vm1024_vm2, %v6480_v12  ;;  %9132 = vst [vmem:[#allocation18_spill] sm:$0xff] %v6980_v49 }
 0x124   : > { %5666 = vmatmul.msk.bf16.gmra.mxu2 %vm1024_vm2, %v6425_v22 }
 0x126   : > { %v1128_v13 = vpop.f32.mrf.mxu0 }
 0x127   : > { %v1721_v4 = vpop.f32.mrf.mxu2 }
 0x128   : > { %v6971_v24 = vadd.f32 %v1721_v4, %v1305_v0  ;;  %v1311_v27 = vpop.f32.mrf.mxu1 }
 0x129   : > { %v1312_v56 = vadd.f32 %v1311_v27, %v1123_v63  ;;  %v1351_v36 = vpop.f32.mrf.mxu3 }
 0x12a   : > { %v6974_v6 = vadd.f32 %v1351_v36, %v6892_v30 }
 0x12e   : > { %v1131_v19 = vpop.f32.mrf.mxu0  ;;  %5612 = vmatmul.msk.bf16.gmra.mxu3 %vm1024_vm2, %v6484_v3 }
 0x12f   : > { %v1723_v51 = vpop.f32.mrf.mxu2 }
 0x130   : > { %v6976_v25 = vadd.f32 %v1723_v51, %v1307_v41  ;;  %v1314_v22 = vpop.f32.mrf.mxu1 }
 0x131   : > { %5634 = vmatmul.msk.bf16.gmra.mxu0 %vm1024_vm2, %v6980_v49  ;;  %v1315_v0 = vadd.f32 %v1314_v22, %v1126_v40  ;;  %v1751_v35 = vpop.f32.mrf.mxu3 }
 0x132   : > { %v6987_v30 = vadd.f32 %v1751_v35, %v6907_v32 }
 0x133   : > { %5650 = vmatmul.msk.bf16.gmra.mxu1 %vm1024_vm2, %v6534_v60 }
 0x134   : > { %5667 = vmatmul.msk.bf16.gmra.mxu2 %vm1024_vm2, %v6484_v3 }
 0x136   : > { %v1133_v41 = vpop.f32.mrf.mxu0 }
 0x137   : > { %v1726_v63 = vpop.f32.mrf.mxu2 }
 0x138   : > { %v6991_v4 = vadd.f32 %v1726_v63, %v1310_v23  ;;  %v1316_v27 = vpop.f32.mrf.mxu1 }
 0x139   : > { %v1317_v36 = vadd.f32 %v1316_v27, %v1128_v13  ;;  %v1753_v51 = vpop.f32.mrf.mxu3 }
 0x13a   : > { %v6994_v49 = vadd.f32 %v1753_v51, %v6914_v55 }
 0x13e   : > { %v1136_v22 = vpop.f32.mrf.mxu0  ;;  %5613 = vmatmul.msk.bf16.gmra.mxu3 %vm1024_vm2, %v6536_v61 }
 0x13f   : > { %v1728_v40 = vpop.f32.mrf.mxu2 }
 0x140   : > { %v6996_v45 = vadd.f32 %v1728_v40, %v1312_v56  ;;  %v1319_v3 = vpop.f32.mrf.mxu1 }
 0x141   : > { %5635 = vmatmul.msk.bf16.gmra.mxu0 %vm1024_vm2, %v6531_v57  ;;  %v1320_v32 = vadd.f32 %v1319_v3, %v1131_v19  ;;  %v1756_v23 = vpop.f32.mrf.mxu3 }
 0x142   : > { %v7005_v13 = vadd.f32 %v1756_v23, %v6927_v17 }
 0x143   : > { %5651 = vmatmul.msk.bf16.gmra.mxu1 %vm1024_vm2, %v6596_v48 }
 0x144   : > { %5668 = vmatmul.msk.bf16.gmra.mxu2 %vm1024_vm2, %v6536_v61 }
 0x146   : > { %v1138_v56 = vpop.f32.mrf.mxu0 }
 0x147   : > { %v1731_v55 = vpop.f32.mrf.mxu2 }
 0x148   : > { %v7009_v35 = vadd.f32 %v1731_v55, %v1315_v0  ;;  %v1321_v63 = vpop.f32.mrf.mxu1 }
 0x149   : > { %v1322_v27 = vadd.f32 %v1321_v63, %v1133_v41  ;;  %v1758_v51 = vpop.f32.mrf.mxu3 }
 0x14a   : > { %v7012_v57 = vadd.f32 %v1758_v51, %v6934_v38 }
 0x14e   : > { %v1141_v40 = vpop.f32.mrf.mxu0  ;;  %5614 = vmatmul.msk.bf16.gmra.mxu3 %vm1024_vm2, %v6604_v43 }
 0x14f   : > { %v1733_v19 = vpop.f32.mrf.mxu2 }
 0x150   : > { %v7014_v3 = vadd.f32 %v1733_v19, %v1317_v36  ;;  %v1324_v61 = vpop.f32.mrf.mxu1 }
 0x151   : > { %5636 = vmatmul.msk.bf16.gmra.mxu0 %vm1024_vm2, %v6598_v44  ;;  %v1325_v17 = vadd.f32 %v1324_v61, %v1136_v22  ;;  %v1761_v0 = vpop.f32.mrf.mxu3 }
 0x152   : > { %v7023_v41 = vadd.f32 %v1761_v0, %v6947_v62 }
 0x153   : > { %5652 = vmatmul.msk.bf16.gmra.mxu1 %vm1024_vm2, %v6660_v2 }
 0x154   : > { %5669 = vmatmul.msk.bf16.gmra.mxu2 %vm1024_vm2, %v6604_v43  ;;  %9133 = vst [vmem:[#allocation19_spill] sm:$0xff] %v7023_v41 }
 0x156   : > { %v1143_v36 = vpop.f32.mrf.mxu0 }
 0x157   : > { %v1736_v38 = vpop.f32.mrf.mxu2 }
 0x158   : > { %v7027_v23 = vadd.f32 %v1736_v38, %v1320_v32  ;;  %v1326_v55 = vpop.f32.mrf.mxu1 }
 0x159   : > { %v1327_v63 = vadd.f32 %v1326_v55, %v1138_v56  ;;  %v1763_v51 = vpop.f32.mrf.mxu3 }
 0x15a   : > { %v7030_v44 = vadd.f32 %v1763_v51, %v6954_v26 }
 0x15c   : > { %9134 = vst [vmem:[#allocation20_spill] sm:$0xff] %v7030_v44 }
 0x15e   : > { %v1979_v19 = vpop.f32.mrf.mxu0  ;;  %5615 = vmatmul.msk.bf16.gmra.mxu3 %vm1024_vm2, %v6662_v18 }
 0x15f   : > { %v1738_v22 = vpop.f32.mrf.mxu2 }
 0x160   : > { %v7032_v61 = vadd.f32 %v1738_v22, %v1322_v27  ;;  %v1329_v43 = vpop.f32.mrf.mxu1 }
 0x161   : > { %5637 = vmatmul.msk.bf16.gmra.mxu0 %vm1024_vm2, %v6657_v54  ;;  %v1330_v62 = vadd.f32 %v1329_v43, %v1141_v40  ;;  %v1766_v32 = vpop.f32.mrf.mxu3 }
 0x162   : > { %v7041_v56 = vadd.f32 %v1766_v32, %v6967_v15 }
 0x163   : > { %5653 = vmatmul.msk.bf16.gmra.mxu1 %vm1024_vm2, %v6747_v16 }
 0x164   : > { %5670 = vmatmul.msk.bf16.gmra.mxu2 %vm1024_vm2, %v6662_v18  ;;  %9135 = vst [vmem:[#allocation21_spill] sm:$0xff] %v7041_v56  ;;  %v3352_v18 = vld [vmem:[%s9023_s4] sm:$0xf] }
 0x165   : > { %v3674_v15 = vsel %vm3484_vm11, %v3352_v18, 0 }
 0x166   : > { %v1981_v27 = vpop.f32.mrf.mxu0  ;;  %3683 = vmatpush.bf16.msra.mxu2 %v3674_v15 }
 0x167   : > { %v1741_v26 = vpop.f32.mrf.mxu2 }
 0x168   : > { %v7045_v0 = vadd.f32 %v1741_v26, %v1325_v17  ;;  %v1331_v38 = vpop.f32.mrf.mxu1 }
 0x169   : > { %v1332_v55 = vadd.f32 %v1331_v38, %v1143_v36  ;;  %v1768_v51 = vpop.f32.mrf.mxu3  ;;  %v9137_v36 = vld [vmem:[#allocation13_spill] sm:$0xff] }
 0x16a   : > { %v7048_v54 = vadd.f32 %v1768_v51, %v6974_v6 }
 0x16c   : > { %9136 = vst [vmem:[#allocation22_spill] sm:$0xff] %v7048_v54 }
 0x16e   : > { %v1984_v22 = vpop.f32.mrf.mxu0  ;;  %5616 = vmatmul.msk.bf16.gmra.mxu3 %vm1024_vm2, %v6760_v52 }
 0x16f   : > { %v1743_v40 = vpop.f32.mrf.mxu2 }
 0x170   : > { %v7050_v43 = vadd.f32 %v1743_v40, %v1327_v63  ;;  %v2125_v17 = vpop.f32.mrf.mxu1  ;;  %v9138_v63 = vld [vmem:[#allocation14_spill] sm:$0xff] }
 0x171   : > { %5638 = vmatmul.msk.bf16.gmra.mxu0 %vm1024_vm2, %v9137_v36  ;;  %v1845_v6 = vpop.f32.mrf.mxu3  ;;  %v5734_v36 = vld [vmem:[%s9023_s4 + $0x4] sm:$0xf] }
 0x172   : > { %v1925_v32 = vadd.f32 %v1845_v6, %v9138_v63  ;;  %v3486_v15 = vsel %vm3484_vm11, %v5734_v36, 0 }
 0x173   : > { %5654 = vmatmul.msk.bf16.gmra.mxu1 %vm1024_vm2, %v6819_v11 }
 0x174   : > { %5671 = vmatmul.msk.bf16.gmra.mxu2 %vm1024_vm2, %v6760_v52  ;;  %v2059_v26 = vadd.f32 %v1979_v19, %v1925_v32  ;;  %3495 = vmatpush.bf16.msra.mxu1 %v3486_v15 }
 0x176   : > { %v1986_v51 = vpop.f32.mrf.mxu0  ;;  %v2205_v18 = vadd.f32 %v2125_v17, %v2059_v26  ;;  %v9139_v26 = vld [vmem:[#allocation16_spill] sm:$0xff] }
 0x177   : > { %v1746_v38 = vpop.f32.mrf.mxu2 }
 0x178   : > { %v7065_v40 = vadd.f32 %v1746_v38, %v1330_v62  ;;  %v2127_v54 = vpop.f32.mrf.mxu1 }
 0x179   : > { %v1847_v52 = vpop.f32.mrf.mxu3 }
 0x17a   : > { %v1926_v6 = vadd.f32 %v1847_v52, %v6824_v47 }
 0x17c   : > { %v2060_v63 = vadd.f32 %v1981_v27, %v1926_v6 }
 0x17e   : > { %v1989_v44 = vpop.f32.mrf.mxu0  ;;  %v2206_v32 = vadd.f32 %v2127_v54, %v2060_v63  ;;  %5617 = vmatmul.msk.bf16.gmra.mxu3 %vm1024_vm2, %v6828_v20 }
 0x17f   : > { %v1748_v56 = vpop.f32.mrf.mxu2 }
 0x180   : > { %v7072_v19 = vadd.f32 %v1748_v56, %v1332_v55  ;;  %v2130_v62 = vpop.f32.mrf.mxu1 }
 0x181   : > { %5639 = vmatmul.msk.bf16.gmra.mxu0 %vm1024_vm2, %v6815_v58  ;;  %v1850_v17 = vpop.f32.mrf.mxu3 }
 0x182   : > { %v1927_v38 = vadd.f32 %v1850_v17, %v9139_v26 }
 0x183   : > { %5655 = vmatmul.msk.bf16.gmra.mxu1 %vm1024_vm2, %v6868_v31 }
 0x184   : > { %5672 = vmatmul.msk.bf16.gmra.mxu2 %vm1024_vm2, %v6828_v20  ;;  %v2061_v47 = vadd.f32 %v1984_v22, %v1927_v38  ;;  %v7090_v22 = vld [vmem:[#allocation2 + $0xc4] sm:$0xff] }
 0x185   : > { %9140 = vst [vmem:[#allocation13_spill] sm:$0xff] %v7090_v22 }
 0x186   : > { %v1991_v27 = vpop.f32.mrf.mxu0  ;;  %v2207_v54 = vadd.f32 %v2130_v62, %v2061_v47 }
 0x187   : > { %v2279_v56 = vpop.f32.mrf.mxu2 }
 0x188   : > { %v7083_v55 = vadd.f32 %v2279_v56, %v2205_v18  ;;  %v2132_v36 = vpop.f32.mrf.mxu1 }
 0x189   : > { %v1852_v15 = vpop.f32.mrf.mxu3 }
 0x18a   : > { %v1928_v52 = vadd.f32 %v1852_v15, %v6866_v53 }
 0x18c   : > { %v2062_v58 = vadd.f32 %v1986_v51, %v1928_v52 }
 0x18e   : > { %v1994_v63 = vpop.f32.mrf.mxu0  ;;  %v2208_v20 = vadd.f32 %v2132_v36, %v2062_v58  ;;  %5618 = vmatmul.msk.bf16.gmra.mxu3 %vm1024_vm2, %v6875_v8 }
 0x18f   : > { %v2281_v6 = vpop.f32.mrf.mxu2 }
 0x190   : > { %v7086_v41 = vadd.f32 %v2281_v6, %v2206_v32  ;;  %v2135_v17 = vpop.f32.mrf.mxu1 }
 0x191   : > { %5640 = vmatmul.msk.bf16.gmra.mxu0 %vm1024_vm2, %v7090_v22  ;;  %v1855_v18 = vpop.f32.mrf.mxu3  ;;  %v391_v22 = vld [vmem:[%s6225_s26 + $0x78] sm:$0xf] }
 0x192   : > { %v1929_v53 = vadd.f32 %v1855_v18, %v6886_v1  ;;  %v9143_v1 = vld [vmem:[#allocation7_spill] sm:$0xff]  ;;  %513 = vst.msk [vmem:[#allocation2 + $0x104] sm:$0xf] %vm393_vm1, %v391_v22 }
 0x193   : > { %5656 = vmatmul.msk.bf16.gmra.mxu1 %vm1024_vm2, %v6896_v50 }
 0x194   : > { %5673 = vmatmul.msk.bf16.gmra.mxu2 %vm1024_vm2, %v6875_v8  ;;  %v2063_v51 = vadd.f32 %v1989_v44, %v1929_v53  ;;  %v7106_v44 = vld [vmem:[#allocation2 + $0xd4] sm:$0xff] }
 0x195   : > { %9144 = vst [vmem:[#allocation7_spill] sm:$0xff] %v7106_v44 }
 0x196   : > { %v1996_v62 = vpop.f32.mrf.mxu0  ;;  %v2209_v38 = vadd.f32 %v2135_v17, %v2063_v51 }
 0x197   : > { %v2284_v32 = vpop.f32.mrf.mxu2 }
 0x198   : > { %v7099_v26 = vadd.f32 %v2284_v32, %v2207_v54  ;;  %v2137_v47 = vpop.f32.mrf.mxu1 }
 0x199   : > { %v1857_v56 = vpop.f32.mrf.mxu3 }
 0x19a   : > { %9141 = vst [vmem:[#allocation14_spill] sm:$0xff] %v7099_v26  ;;  %v1930_v36 = vadd.f32 %v1857_v56, %v6894_v37 }
 0x19c   : > { %v2064_v15 = vadd.f32 %v1991_v27, %v1930_v36  ;;  %v9145_v27 = vld [vmem:[#allocation11_spill] sm:$0xff] }
 0x19e   : > { %v1999_v58 = vpop.f32.mrf.mxu0  ;;  %v2210_v8 = vadd.f32 %v2137_v47, %v2064_v15  ;;  %5619 = vmatmul.msk.bf16.gmra.mxu3 %vm1024_vm2, %v9143_v1 }
 0x19f   : > { %v2286_v52 = vpop.f32.mrf.mxu2 }
 0x1a0   : > { %v7102_v6 = vadd.f32 %v2286_v52, %v2208_v20  ;;  %v2140_v18 = vpop.f32.mrf.mxu1 }
 0x1a1   : > { %5641 = vmatmul.msk.bf16.gmra.mxu0 %vm1024_vm2, %v7106_v44  ;;  %v1860_v54 = vpop.f32.mrf.mxu3 }
 0x1a2   : > { %9142 = vst [vmem:[#allocation16_spill] sm:$0xff] %v7102_v6  ;;  %v1931_v37 = vadd.f32 %v1860_v54, %v6911_v42  ;;  %v9148_v54 = vld [vmem:[#allocation8_spill] sm:$0xff] }
 0x1a3   : > { %5657 = vmatmul.msk.bf16.gmra.mxu1 %vm1024_vm2, %v9145_v27 }
 0x1a4   : > { %5674 = vmatmul.msk.bf16.gmra.mxu2 %vm1024_vm2, %v9143_v1  ;;  %v2065_v20 = vadd.f32 %v1994_v63, %v1931_v37  ;;  %v392_v63 = vld [vmem:[%s6225_s26 + $0x7c] sm:$0xf]  ;;  %v7125_v37 = vld [vmem:[#allocation2 + $0xe4] sm:$0xff]  ;;  %s8710_s26 = scalar_lea.vmem %s9029_s10, %s5979_s23 }
 0x1a5   : > { %9149 = vst [vmem:[#allocation8_spill] sm:$0xff] %v7125_v37 }
 0x1a6   : > { %v2001_v53 = vpop.f32.mrf.mxu0  ;;  %v2211_v32 = vadd.f32 %v2140_v18, %v2065_v20  ;;  %514 = vst.msk [vmem:[#allocation2 + $0x108] sm:$0xf] %vm393_vm1, %v392_v63  ;;  %v476_v63 = vld [vmem:[#allocation2 + $0x10c] sm:$0x1] }
 0x1a7   : > { %v2289_v17 = vpop.f32.mrf.mxu2 }
 0x1a8   : > { %v7115_v51 = vadd.f32 %v2289_v17, %v2209_v38  ;;  %v2142_v47 = vpop.f32.mrf.mxu1 }
 0x1a9   : > { %v1862_v56 = vpop.f32.mrf.mxu3 }
 0x1aa   : > { %9146 = vst [vmem:[#allocation11_spill] sm:$0xff] %v7115_v51  ;;  %v1932_v36 = vadd.f32 %v1862_v56, %v6916_v29 }
 0x1ac   : > { %v2066_v15 = vadd.f32 %v1996_v62, %v1932_v36 }
 0x1ae   : > { %v2004_v1 = vpop.f32.mrf.mxu0  ;;  %v2212_v42 = vadd.f32 %v2142_v47, %v2066_v15  ;;  %5620 = vmatmul.msk.bf16.gmra.mxu3 %vm1024_vm2, %v9148_v54 }
 0x1af   : > { %v2291_v52 = vpop.f32.mrf.mxu2 }
 0x1b0   : > { %v7118_v44 = vadd.f32 %v2291_v52, %v2210_v8  ;;  %v2145_v38 = vpop.f32.mrf.mxu1  ;;  %v9150_v8 = vld [vmem:[#allocation12_spill] sm:$0xff] }
 0x1b1   : > { %5642 = vmatmul.msk.bf16.gmra.mxu0 %vm1024_vm2, %v7125_v37  ;;  %v1865_v29 = vpop.f32.mrf.mxu3 }
 0x1b2   : > { %9147 = vst [vmem:[#allocation23_spill] sm:$0xff] %v7118_v44  ;;  %v1933_v62 = vadd.f32 %v1865_v29, %v6931_v5  ;;  %v477_v29 = vsel %vm6238_vm5, 0, %v476_v63  ;;  %v580_v63 = vld [vmem:[#allocation2 + $0x104] sm:$0xf] }
 0x1b3   : > { %5658 = vmatmul.msk.bf16.gmra.mxu1 %vm1024_vm2, %v9150_v8  ;;  %478 = vst [vmem:[#allocation2 + $0x10c] sm:$0x1] %v477_v29  ;;  %v9162_v8 = vld [vmem:[#allocation10_spill] sm:$0xff] }
 0x1b4   : > { %5675 = vmatmul.msk.bf16.gmra.mxu2 %vm1024_vm2, %v9148_v54  ;;  %v2067_v18 = vadd.f32 %v1999_v58, %v1933_v62  ;;  %v9156_v58 = vld [vmem:[#allocation9_spill] sm:$0xff] }
 0x1b6   : > { %v2006_v22 = vpop.f32.mrf.mxu0  ;;  %v2213_v47 = vadd.f32 %v2145_v38, %v2067_v18  ;;  %v6043_v38 = vld [vmem:[#allocation2 + $0xf4] sm:$0xff] }
 0x1b7   : > { %v2294_v20 = vpop.f32.mrf.mxu2 }
 0x1b8   : > { %v7135_v17 = vadd.f32 %v2294_v20, %v2211_v32  ;;  %v7137_v56 = vpop.f32.mrf.mxu1 }
 0x1b9   : > { %9152 = vst [vmem:[#allocation25_spill] sm:$0xff] %v7137_v56  ;;  %v1867_v36 = vpop.f32.mrf.mxu3  ;;  %v1809_v56 = vshrl.u32 %v580_v63, 16 }
 0x1ba   : > { %9151 = vst [vmem:[#allocation24_spill] sm:$0xff] %v7135_v17  ;;  %v1934_v15 = vadd.f32 %v1867_v36, %v6936_v46  ;;  %v582_v51 = vld [vmem:[#allocation2 + $0x10c] sm:$0x1] }
 0x1bb   : > { %v2091_v5 = vrot.slane %v1809_v56, 4 }
 0x1bc   : > { %v7140_v52 = vadd.f32 %v2001_v53, %v1934_v15  ;;  %v9157_v53 = vld [vmem:[#allocation15_spill] sm:$0xff] }
 0x1be   : > { %9153 = vst [vmem:[#allocation26_spill] sm:$0xff] %v7140_v52  ;;  %v2009_v37 = vpop.f32.mrf.mxu0  ;;  %5621 = vmatmul.msk.bf16.gmra.mxu3 %vm1024_vm2, %v9156_v58 }
 0x1bf   : > { %v2296_v54 = vpop.f32.mrf.mxu2 }
 0x1c0   : > { %v7144_v44 = vadd.f32 %v2296_v54, %v2212_v42  ;;  %v2150_v32 = vpop.f32.mrf.mxu1  ;;  %v581_v54 = vld [vmem:[#allocation2 + $0x108] sm:$0xf] }
 0x1c1   : > { %5643 = vmatmul.msk.bf16.gmra.mxu0 %vm1024_vm2, %v6043_v38  ;;  %v1870_v62 = vpop.f32.mrf.mxu3  ;;  %v1818_v52 = vshrl.u32 %v581_v54, 16 }
 0x1c2   : > { %9155 = vst [vmem:[#allocation27_spill] sm:$0xff] %v7144_v44  ;;  %v1935_v46 = vadd.f32 %v1870_v62, %v6951_v14  ;;  %v579_v14 = vld [vmem:[#allocation2 + $0x100] sm:$0xf]  ;;  %v1812_v62 = vshll.u32 %v580_v63, 16  ;;  %v1821_v44 = vshll.u32 %v581_v54, 16  ;;  %v2101_v54 = vshll.u32 %v582_v51, 16 }
 0x1c3   : > { %5659 = vmatmul.msk.bf16.gmra.mxu1 %vm1024_vm2, %v9157_v53  ;;  %v1820_v53 = vrot.slane %v1818_v52, 7 }
 0x1c4   : > { %5676 = vmatmul.msk.bf16.gmra.mxu2 %vm1024_vm2, %v9156_v58  ;;  %v2069_v18 = vadd.f32 %v2004_v1, %v1935_v46  ;;  %v5996_v46 = vld [vmem:[#allocation2 + $0x104] sm:$0xff]  ;;  %v2092_v17 = vrot.slane %v1812_v62, 5 }
 0x1c6   : > { %v7154_v20 = vpop.f32.mrf.mxu0  ;;  %v2215_v15 = vadd.f32 %v2150_v32, %v2069_v18 }
 0x1c7   : > { %v2299_v42 = vpop.f32.mrf.mxu2 }
 0x1c8   : > { %v7156_v36 = vadd.f32 %v2299_v42, %v2213_v47  ;;  %v7158_v29 = vpop.f32.mrf.mxu1  ;;  %v2095_v47 = vrot.slane %v1821_v44, 5  ;;  %v2097_v42 = vrot.slane %v1818_v52, 4 }
 0x1c9   : > { %9159 = vst [vmem:[#allocation28_spill] sm:$0xff] %v7158_v29  ;;  %v1872_v38 = vpop.f32.mrf.mxu3  ;;  %v1804_v29 = vshrl.u32 %v579_v14, 16 }
 0x1ca   : > { %9158 = vst [vmem:[#allocation9_spill] sm:$0xff] %v7156_v36  ;;  %v1936_v58 = vadd.f32 %v1872_v38, %v6956_v34  ;;  %v1811_v36 = vrot.slane %v1809_v56, 7  ;;  %v2098_v63 = vor.u32 %v2097_v42, %v2095_v47 }
 0x1cc   : > { %v7161_v1 = vadd.f32 %v2006_v22, %v1936_v58  ;;  %v2093_v22 = vor.u32 %v2092_v17, %v2091_v5  ;;  %v5606_v58 = vrot.slane %v1804_v29, 11  ;;  %v1816_v6 = vrot.slane %v1811_v36, 4 }
 0x1cd   : > { %v2099_v26 = vrot.slane %v2098_v63, 4  ;;  %v583_v63 = vld [vmem:[#allocation2 + $0x110] sm:$0xf] }
 0x1ce   : > { %9160 = vst [vmem:[#allocation29_spill] sm:$0xff] %v7161_v1  ;;  %v7165_v18 = vpop.f32.mrf.mxu0  ;;  %5622 = vmatmul.msk.bf16.gmra.mxu3 %vm1024_vm2, %v9162_v8  ;;  %v1814_v1 = vor.u32 %v1812_v62, %v1811_v36  ;;  %v2094_v14 = vrot.slane %v2093_v22, 4  ;;  %v7181_v36 = vld [vmem:[#allocation2 + $0x114] sm:$0xf] }
 0x1cf   : > { %v7163_v32 = vpop.f32.mrf.mxu2 }
 0x1d0   : > { %9161 = vst [vmem:[#allocation30_spill] sm:$0xff] %v7163_v32  ;;  %v2155_v34 = vpop.f32.mrf.mxu1  ;;  %v1823_v32 = vor.u32 %v1821_v44, %v1820_v53  ;;  %v1815_v51 = vsel %vm6253_vm7, %v5606_v58, %v1814_v1  ;;  %v7189_v1 = vld [vmem:[#allocation2 + $0x118] sm:$0xf] }
 0x1d1   : > { %5644 = vmatmul.msk.bf16.gmra.mxu0 %vm1024_vm2, %v5996_v46  ;;  %v1875_v38 = vpop.f32.mrf.mxu3  ;;  %v2103_v46 = vrot.slane %v2101_v54, 5  ;;  %v9061_v54 = vshrl.u32 %v7189_v1, 16 }
 0x1d2   : > { %v1937_v56 = vadd.f32 %v1875_v38, %v6971_v24  ;;  %v1824_v5 = vsel %vm6253_vm7, %v1816_v6, %v1823_v32  ;;  %v1827_v24 = vunpack.c.l.b16 %v1815_v51 }
 0x1d3   : > { %5660 = vmatmul.msk.bf16.gmra.mxu1 %vm1024_vm2, %v6863_v59  ;;  %v1828_v29 = vunpack.c.l.b16 %v1824_v5  ;;  %v2104_v42 = vsel %vm6283_vm10, %v2099_v26, %v2103_v46  ;;  %v2238_v26 = vshrl.u32 %v583_v63, 16  ;;  %v2254_v46 = vrot.slane %v9061_v54, 7 }
 0x1d4   : > { %5677 = vmatmul.msk.bf16.gmra.mxu2 %vm1024_vm2, %v9162_v8  ;;  %v2071_v52 = vadd.f32 %v2009_v37, %v1937_v56  ;;  %v2096_v37 = vsel %vm6283_vm10, %v2094_v14, %v2095_v47  ;;  %v9063_v14 = vshll.u32 %v7181_v36, 16 }
 0x1d5   : > { %v2107_v32 = vunpack.c.l.b16 %v2096_v37  ;;  %v1829_v38 = vpack.c.b16 %v1828_v29, %v1827_v24  ;;  %v5662_v24 = vrot.slane %v2238_v26, 11 }
 0x1d6   : > { %v2016_v44 = vpop.f32.mrf.mxu0  ;;  %v2217_v8 = vadd.f32 %v2155_v34, %v2071_v52  ;;  %v2108_v34 = vunpack.c.l.b16 %v2104_v42 }
 0x1d7   : > { %v2304_v17 = vpop.f32.mrf.mxu2 }
 0x1d8   : > { %v7179_v53 = vadd.f32 %v2304_v17, %v2215_v15  ;;  %v7183_v62 = vpop.f32.mrf.mxu1  ;;  %v9064_v15 = vshrl.u32 %v7181_v36, 16  ;;  %v7202_v52 = vpack.c.b16 %v2108_v34, %v2107_v32  ;;  %v9062_v17 = vshll.u32 %v7189_v1, 16 }
 0x1d9   : > { %v1877_v22 = vpop.f32.mrf.mxu3 }
 0x1da   : > { %v1938_v6 = vadd.f32 %v1877_v22, %v6976_v25  ;;  %v2245_v25 = vrot.slane %v9064_v15, 7  ;;  %v2257_v42 = vor.u32 %v9062_v17, %v2254_v46 }
 0x1dc   : > { %v7195_v58 = vadd.f32 %v7154_v20, %v1938_v6  ;;  %v2248_v29 = vor.u32 %v9063_v14, %v2245_v25  ;;  %v2250_v37 = vrot.slane %v2245_v25, 4 }
 0x1de   : > { %v2019_v56 = vpop.f32.mrf.mxu0  ;;  %5623 = vmatmul.msk.bf16.gmra.mxu3 %vm1024_vm2, %v1829_v38  ;;  %v2258_v63 = vsel %vm6253_vm7, %v2250_v37, %v2257_v42 }
 0x1df   : > { %v7197_v47 = vpop.f32.mrf.mxu2  ;;  %v2262_v46 = vunpack.c.l.b16 %v2258_v63 }
 0x1e0   : > { %v2160_v20 = vpop.f32.mrf.mxu1 }
 0x1e1   : > { %5702 = vmatmul.msk.bf16.vlgmr.msra.gmra.mxu0 %vm1024_vm2, %v6368_v10  ;;  %v1880_v51 = vpop.f32.mrf.mxu3 }
 0x1e2   : > { %v1939_v5 = vadd.f32 %v1880_v51, %v6991_v4  ;;  %v2249_v4 = vsel %vm6253_vm7, %v5662_v24, %v2248_v29 }
 0x1e3   : > { %5661 = vmatmul.msk.bf16.gmra.mxu1 %vm1024_vm2, %v7202_v52  ;;  %v2261_v51 = vunpack.c.l.b16 %v2249_v4 }
 0x1e4   : > { %5678 = vmatmul.msk.bf16.gmra.mxu2 %vm1024_vm2, %v1829_v38  ;;  %v2073_v22 = vadd.f32 %v7165_v18, %v1939_v5 }
 0x1e5   : > { %v2263_v5 = vpack.c.b16 %v2262_v46, %v2261_v51 }
 0x1e6   : > { %v2021_v10 = vpop.f32.mrf.mxu0  ;;  %v2219_v34 = vadd.f32 %v2160_v20, %v2073_v22 }
 0x1e7   : > { %v2309_v6 = vpop.f32.mrf.mxu2 }
 0x1e8   : > { %v7219_v32 = vadd.f32 %v2309_v6, %v2217_v8  ;;  %v7225_v38 = vpop.f32.mrf.mxu1 }
 0x1e9   : > { %v1882_v26 = vpop.f32.mrf.mxu3 }
 0x1ea   : > { %v1940_v25 = vadd.f32 %v1882_v26, %v6996_v45 }
 0x1ec   : > { %v7228_v54 = vadd.f32 %v2016_v44, %v1940_v25 }
 0x1ee   : > { %v2024_v8 = vpop.f32.mrf.mxu0  ;;  %5685 = vmatmul.msk.bf16.vlgmr.msra.gmra.mxu3 %vm1024_vm2, %v6900_v33 }
 0x1ef   : > { %v7230_v18 = vpop.f32.mrf.mxu2 }
 0x1f0   : > { %v2165_v20 = vpop.f32.mrf.mxu1 }
 0x1f1   : > { %5703 = vmatmul.msk.bf16.gmra.mxu0 %vm1024_vm2, %v6423_v21  ;;  %v1885_v24 = vpop.f32.mrf.mxu3 }
 0x1f2   : > { %v1941_v45 = vadd.f32 %v1885_v24, %v7009_v35 }
 0x1f4   : > { %5679 = vmatmul.msk.bf16.gmra.mxu2 %vm1024_vm2, %v2263_v5  ;;  %v2075_v29 = vadd.f32 %v2019_v56, %v1941_v45 }
 0x1f6   : > { %v2026_v44 = vpop.f32.mrf.mxu0  ;;  %v2221_v22 = vadd.f32 %v2165_v20, %v2075_v29 }
 0x1f7   : > { %v2314_v37 = vpop.f32.mrf.mxu2 }
 0x1f8   : > { %v7238_v42 = vadd.f32 %v2314_v37, %v2219_v34  ;;  %v7240_v6 = vpop.f32.mrf.mxu1 }
 0x1f9   : > { %v1887_v4 = vpop.f32.mrf.mxu3 }
 0x1fa   : > { %v1942_v33 = vadd.f32 %v1887_v4, %v7014_v3 }
 0x1fc   : > { %v7243_v63 = vadd.f32 %v2021_v10, %v1942_v33 }
 0x1fe   : > { %v2029_v21 = vpop.f32.mrf.mxu0  ;;  %5686 = vmatmul.msk.bf16.gmra.mxu3 %vm1024_vm2, %v6920_v39 }
 0x1ff   : > { %v7245_v26 = vpop.f32.mrf.mxu2 }
 0x200   : > { %v2170_v35 = vpop.f32.mrf.mxu1 }
 0x201   : > { %5704 = vmatmul.msk.bf16.gmra.mxu0 %vm1024_vm2, %v6480_v12  ;;  %v1890_v56 = vpop.f32.mrf.mxu3 }
 0x202   : > { %v1943_v34 = vadd.f32 %v1890_v56, %v7027_v23 }
 0x204   : > { %v2077_v25 = vadd.f32 %v2024_v8, %v1943_v34 }
 0x206   : > { %v2031_v46 = vpop.f32.mrf.mxu0  ;;  %v2223_v3 = vadd.f32 %v2170_v35, %v2077_v25 }
 0x207   : > { %v2319_v51 = vpop.f32.mrf.mxu2 }
 0x208   : > { %v7252_v5 = vadd.f32 %v2319_v51, %v2221_v22  ;;  %v7254_v10 = vpop.f32.mrf.mxu1 }
 0x209   : > { %v1892_v20 = vpop.f32.mrf.mxu3 }
 0x20a   : > { %v1944_v24 = vadd.f32 %v1892_v20, %v7032_v61 }
 0x20c   : > { %v7257_v45 = vadd.f32 %v2026_v44, %v1944_v24 }
 0x20e   : > { %v2034_v29 = vpop.f32.mrf.mxu0  ;;  %5687 = vmatmul.msk.bf16.gmra.mxu3 %vm1024_vm2, %v6940_v7 }
 0x20f   : > { %v7259_v39 = vpop.f32.mrf.mxu2 }
 0x210   : > { %v2175_v12 = vpop.f32.mrf.mxu1 }
 0x211   : > { %5705 = vmatmul.msk.bf16.gmra.mxu0 %vm1024_vm2, %v6534_v60  ;;  %v1895_v23 = vpop.f32.mrf.mxu3  ;;  %v9165_v60 = vld [vmem:[#allocation17_spill] sm:$0xff] }
 0x212   : > { %v1945_v8 = vadd.f32 %v1895_v23, %v7045_v0 }
 0x214   : > { %v2079_v37 = vadd.f32 %v2029_v21, %v1945_v8 }
 0x216   : > { %v2036_v4 = vpop.f32.mrf.mxu0  ;;  %v2225_v61 = vadd.f32 %v2175_v12, %v2079_v37 }
 0x217   : > { %v2324_v22 = vpop.f32.mrf.mxu2 }
 0x218   : > { %v7266_v33 = vadd.f32 %v2324_v22, %v2223_v3  ;;  %v7268_v44 = vpop.f32.mrf.mxu1 }
 0x219   : > { %9163 = vst [vmem:[#allocation10_spill] sm:$0xff] %v7268_v44  ;;  %v1897_v35 = vpop.f32.mrf.mxu3 }
 0x21a   : > { %v1946_v56 = vadd.f32 %v1897_v35, %v7050_v43 }
 0x21c   : > { %v7271_v34 = vadd.f32 %v2031_v46, %v1946_v56 }
 0x21e   : > { %9164 = vst [vmem:[#allocation31_spill] sm:$0xff] %v7271_v34  ;;  %v2039_v25 = vpop.f32.mrf.mxu0  ;;  %5688 = vmatmul.msk.bf16.gmra.mxu3 %vm1024_vm2, %v9165_v60 }
 0x21f   : > { %v7273_v7 = vpop.f32.mrf.mxu2 }
 0x220   : > { %v2180_v0 = vpop.f32.mrf.mxu1 }
 0x221   : > { %5706 = vmatmul.msk.bf16.gmra.mxu0 %vm1024_vm2, %v6596_v48  ;;  %v1900_v21 = vpop.f32.mrf.mxu3  ;;  %v9169_v48 = vld [vmem:[#allocation18_spill] sm:$0xff] }
 0x222   : > { %v1947_v51 = vadd.f32 %v1900_v21, %v7065_v40 }
 0x224   : > { %v2081_v3 = vadd.f32 %v2034_v29, %v1947_v51 }
 0x226   : > { %v2041_v24 = vpop.f32.mrf.mxu0  ;;  %v2227_v43 = vadd.f32 %v2180_v0, %v2081_v3 }
 0x227   : > { %v2329_v20 = vpop.f32.mrf.mxu2 }
 0x228   : > { %v7280_v12 = vadd.f32 %v2329_v20, %v2225_v61  ;;  %v7282_v46 = vpop.f32.mrf.mxu1 }
 0x229   : > { %9166 = vst [vmem:[#allocation17_spill] sm:$0xff] %v7282_v46  ;;  %v1902_v23 = vpop.f32.mrf.mxu3 }
 0x22a   : > { %v1948_v8 = vadd.f32 %v1902_v23, %v7072_v19 }
 0x22c   : > { %v7285_v37 = vadd.f32 %v2036_v4, %v1948_v8 }
 0x22e   : > { %9167 = vst [vmem:[#allocation32_spill] sm:$0xff] %v7285_v37  ;;  %v2044_v35 = vpop.f32.mrf.mxu0  ;;  %5689 = vmatmul.msk.bf16.gmra.mxu3 %vm1024_vm2, %v9169_v48 }
 0x22f   : > { %v7287_v22 = vpop.f32.mrf.mxu2 }
 0x230   : > { %9168 = vst [vmem:[#allocation33_spill] sm:$0xff] %v7287_v22  ;;  %v2185_v40 = vpop.f32.mrf.mxu1 }
 0x231   : > { %5707 = vmatmul.msk.bf16.gmra.mxu0 %vm1024_vm2, %v6660_v2  ;;  %v1905_v29 = vpop.f32.mrf.mxu3  ;;  %v6044_v2 = vld [vmem:[#allocation2 + $0x74] sm:$0xff] }
 0x232   : > { %v1949_v61 = vadd.f32 %v1905_v29, %v6987_v30 }
 0x234   : > { %v2083_v56 = vadd.f32 %v2039_v25, %v1949_v61 }
 0x236   : > { %v2046_v0 = vpop.f32.mrf.mxu0  ;;  %v2229_v19 = vadd.f32 %v2185_v40, %v2083_v56 }
 0x237   : > { %v2334_v60 = vpop.f32.mrf.mxu2 }
 0x238   : > { %v7294_v21 = vadd.f32 %v2334_v60, %v2227_v43  ;;  %v7296_v4 = vpop.f32.mrf.mxu1 }
 0x239   : > { %9171 = vst [vmem:[#allocation34_spill] sm:$0xff] %v7296_v4  ;;  %v1907_v51 = vpop.f32.mrf.mxu3 }
 0x23a   : > { %9170 = vst [vmem:[#allocation18_spill] sm:$0xff] %v7294_v21  ;;  %v1950_v3 = vadd.f32 %v1907_v51, %v6994_v49 }
 0x23c   : > { %v7299_v20 = vadd.f32 %v2041_v24, %v1950_v3 }
 0x23e   : > { %9172 = vst [vmem:[#allocation35_spill] sm:$0xff] %v7299_v20  ;;  %v2049_v8 = vpop.f32.mrf.mxu0  ;;  %5690 = vmatmul.msk.bf16.gmra.mxu3 %vm1024_vm2, %v6044_v2  ;;  %v9196_v20 = vld [vmem:[#allocation13_spill] sm:$0xff] }
 0x23f   : > { %v7301_v23 = vpop.f32.mrf.mxu2 }
 0x240   : > { %9173 = vst [vmem:[#allocation36_spill] sm:$0xff] %v7301_v23  ;;  %v2190_v30 = vpop.f32.mrf.mxu1 }
 0x241   : > { %5708 = vmatmul.msk.bf16.gmra.mxu0 %vm1024_vm2, %v6747_v16  ;;  %v1910_v25 = vpop.f32.mrf.mxu3  ;;  %v6045_v16 = vld [vmem:[#allocation2 + $0x84] sm:$0xff] }
 0x242   : > { %v1951_v43 = vadd.f32 %v1910_v25, %v7005_v13  ;;  %v9179_v25 = vmov 0  }
 0x243   : > { %2776 = vst.msk [vmem:[#allocation3] sm:$0xf] %vm2775_vm12, %v9179_v25 }
 0x244   : > { %v2085_v48 = vadd.f32 %v2044_v35, %v1951_v43  ;;  %2777 = vst.msk [vmem:[#allocation3 + $0x4] sm:$0xf] %vm2775_vm12, %v9179_v25 }
 0x245   : > { %2778 = vst.msk [vmem:[#allocation3 + $0x8] sm:$0xf] %vm2775_vm12, %v9179_v25 }
 0x246   : > { %v2051_v29 = vpop.f32.mrf.mxu0  ;;  %v2231_v49 = vadd.f32 %v2190_v30, %v2085_v48  ;;  %2785 = vst.msk [vmem:[#allocation3 + $0x110] sm:$0xf] %vm2775_vm12, %v9179_v25 }
 0x247   : > { %v2339_v40 = vpop.f32.mrf.mxu2  ;;  %2786 = vst.msk [vmem:[#allocation3 + $0x114] sm:$0xf] %vm2775_vm12, %v9179_v25 }
 0x248   : > { %v7307_v61 = vadd.f32 %v2339_v40, %v2229_v19  ;;  %v7309_v24 = vpop.f32.mrf.mxu1  ;;  %v9178_v19 = vld [vmem:[#allocation19_spill] sm:$0xff]  ;;  %2787 = vst.msk [vmem:[#allocation3 + $0x118] sm:$0xf] %vm2775_vm12, %v9179_v25 }
 0x249   : > { %9175 = vst [vmem:[#allocation38_spill] sm:$0xff] %v7309_v24  ;;  %v1912_v56 = vpop.f32.mrf.mxu3 }
 0x24a   : > { %9174 = vst [vmem:[#allocation37_spill] sm:$0xff] %v7307_v61  ;;  %v1952_v60 = vadd.f32 %v1912_v56, %v7012_v57  ;;  %v9182_v56 = vld [vmem:[#allocation20_spill] sm:$0xff] }
 0x24b   : > { %2792 = vst.msk [vmem:[#allocation3 + $0x10] sm:$0xf] %vm2775_vm12, %v9179_v25 }
 0x24c   : > { %v7312_v51 = vadd.f32 %v2046_v0, %v1952_v60  ;;  %2793 = vst.msk [vmem:[#allocation3 + $0x20] sm:$0xf] %vm2775_vm12, %v9179_v25 }
 0x24d   : > { %2794 = vst.msk [vmem:[#allocation3 + $0x30] sm:$0xf] %vm2775_vm12, %v9179_v25 }
 0x24e   : > { %9176 = vst [vmem:[#allocation39_spill] sm:$0xff] %v7312_v51  ;;  %v2054_v2 = vpop.f32.mrf.mxu0  ;;  %5691 = vmatmul.msk.bf16.gmra.mxu3 %vm1024_vm2, %v6045_v16 }
 0x24f   : > { %v7314_v3 = vpop.f32.mrf.mxu2  ;;  %2795 = vst.msk [vmem:[#allocation3 + $0x40] sm:$0xf] %vm2775_vm12, %v9179_v25 }
 0x250   : > { %9177 = vst [vmem:[#allocation40_spill] sm:$0xff] %v7314_v3  ;;  %v2195_v13 = vpop.f32.mrf.mxu1 }
 0x251   : > { %5709 = vmatmul.msk.bf16.gmra.mxu0 %vm1024_vm2, %v6819_v11  ;;  %v1915_v35 = vpop.f32.mrf.mxu3  ;;  %2796 = vst.msk [vmem:[#allocation3 + $0x50] sm:$0xf] %vm2775_vm12, %v9179_v25 }
 0x252   : > { %v1953_v30 = vadd.f32 %v1915_v35, %v9178_v19  ;;  %v6046_v35 = vld [vmem:[#allocation2 + $0x94] sm:$0xff]  ;;  %2797 = vst.msk [vmem:[#allocation3 + $0x60] sm:$0xf] %vm2775_vm12, %v9179_v25  ;;  %v9185_v19 = vld [vmem:[#allocation21_spill] sm:$0xff] }
 0x253   : > { %2798 = vst.msk [vmem:[#allocation3 + $0x70] sm:$0xf] %vm2775_vm12, %v9179_v25 }
 0x254   : > { %v2087_v57 = vadd.f32 %v2049_v8, %v1953_v30  ;;  %2799 = vst.msk [vmem:[#allocation3 + $0x80] sm:$0xf] %vm2775_vm12, %v9179_v25 }
 0x255   : > { %2800 = vst.msk [vmem:[#allocation3 + $0x90] sm:$0xf] %vm2775_vm12, %v9179_v25 }
 0x256   : > { %v2056_v43 = vpop.f32.mrf.mxu0  ;;  %v2233_v40 = vadd.f32 %v2195_v13, %v2087_v57  ;;  %2801 = vst.msk [vmem:[#allocation3 + $0xa0] sm:$0xf] %vm2775_vm12, %v9179_v25  ;;  %v7367_v57 = vld [vmem:[#allocation3 + $0x4] sm:$0xf] }
 0x257   : > { %v2344_v0 = vpop.f32.mrf.mxu2  ;;  %2802 = vst.msk [vmem:[#allocation3 + $0xb0] sm:$0xf] %vm2775_vm12, %v9179_v25 }
 0x258   : > { %v7326_v48 = vadd.f32 %v2344_v0, %v2231_v49  ;;  %v7334_v8 = vpop.f32.mrf.mxu1  ;;  %v7369_v0 = vld [vmem:[#allocation3 + $0x8] sm:$0xf]  ;;  %2803 = vst.msk [vmem:[#allocation3 + $0xc0] sm:$0xf] %vm2775_vm12, %v9179_v25 }
 0x259   : > { %v1917_v11 = vpop.f32.mrf.mxu3  ;;  %9181 = vst [vmem:[#allocation41_spill] sm:$0xff] %v7334_v8 }
 0x25a   : > { %9180 = vst [vmem:[#allocation19_spill] sm:$0xff] %v7326_v48  ;;  %v1954_v60 = vadd.f32 %v1917_v11, %v9182_v56  ;;  %v5998_v56 = vld [vmem:[#allocation3 + $0x4] sm:$0xff] }
 0x25b   : > { %2804 = vst.msk [vmem:[#allocation3 + $0xd0] sm:$0xf] %vm2775_vm12, %v9179_v25  ;;  %5799 = vmatmul.msk.bf16.vlgmr.msra.gmra.mxu1 %vm3435_vm13, %v5998_v56 }
 0x25c   : > { %v7343_v49 = vadd.f32 %v2051_v29, %v1954_v60  ;;  %2805 = vst.msk [vmem:[#allocation3 + $0xe0] sm:$0xf] %vm2775_vm12, %v9179_v25 }
 0x25d   : > { %2806 = vst.msk [vmem:[#allocation3 + $0xf0] sm:$0xf] %vm2775_vm12, %v9179_v25 }
 0x25e   : > { %9183 = vst [vmem:[#allocation20_spill] sm:$0xff] %v7343_v49  ;;  %v7349_v13 = vpop.f32.mrf.mxu0  ;;  %5692 = vmatmul.msk.bf16.gmra.mxu3 %vm1024_vm2, %v6046_v35  ;;  %v9068_v49 = vshll.u32 %v7367_v57, 16 }
 0x25f   : > { %v7347_v16 = vpop.f32.mrf.mxu2  ;;  %2807 = vst.msk [vmem:[#allocation3 + $0x100] sm:$0xf] %vm2775_vm12, %v9179_v25 }
 0x260   : > { %9184 = vst [vmem:[#allocation42_spill] sm:$0xff] %v7347_v16  ;;  %v2200_v11 = vpop.f32.mrf.mxu1 }
 0x261   : > { %5710 = vmatmul.msk.bf16.gmra.mxu0 %vm1024_vm2, %v6868_v31  ;;  %v1920_v29 = vpop.f32.mrf.mxu3  ;;  %2791 = vst.msk [vmem:[#allocation3] sm:$0xf] %vm2775_vm12, %v9179_v25 }
 0x262   : > { %v1955_v30 = vadd.f32 %v1920_v29, %v9185_v19  ;;  %v9065_v29 = vshrl.u32 %v7367_v57, 16  ;;  %v9066_v19 = vshrl.u32 %v7369_v0, 16  ;;  %2808 = vst.msk [vmem:[#allocation3 + $0x110] sm:$0xf] %vm2775_vm12, %v9179_v25 }
 0x264   : > { %v2089_v31 = vadd.f32 %v2054_v2, %v1955_v30  ;;  %v3017_v30 = vrot.slane %v9066_v19, 7  ;;  %v6047_v19 = vld [vmem:[#allocation2 + $0xa4] sm:$0xff] }
 0x266   : > { %v7375_v35 = vpop.f32.mrf.mxu0  ;;  %v2235_v14 = vadd.f32 %v2200_v11, %v2089_v31  ;;  %v9067_v11 = vshll.u32 %v7369_v0, 16  ;;  %v9187_v31 = vld [vmem:[#allocation22_spill] sm:$0xff] }
 0x267   : > { %v2349_v60 = vpop.f32.mrf.mxu2 }
 0x268   : > { %v7381_v17 = vadd.f32 %v2349_v60, %v2233_v40  ;;  %v3008_v40 = vrot.slane %v9065_v29, 7  ;;  %v3020_v29 = vor.u32 %v9067_v11, %v3017_v30  ;;  %v2928_v30 = vld [vmem:[#allocation3] sm:$0xf] }
 0x269   : > { %v1922_v2 = vpop.f32.mrf.mxu3  ;;  %v3001_v11 = vshrl.u32 %v2928_v30, 16 }
 0x26a   : > { %9186 = vst [vmem:[#allocation21_spill] sm:$0xff] %v7381_v17  ;;  %v1956_v56 = vadd.f32 %v1922_v2, %v9187_v31  ;;  %v3013_v17 = vrot.slane %v3008_v40, 4  ;;  %v5831_v2 = vld [vmem:[%s9023_s4 + $0x8] sm:$0xf]  ;;  %v2812_v31 = vld [vmem:[#allocation3 + $0x1c] sm:$0x1] }
 0x26b   : > { %v4088_v25 = vsel %vm3484_vm11, %v5831_v2, 0 }
 0x26c   : > { %v7400_v60 = vadd.f32 %v2056_v43, %v1956_v56  ;;  %v9190_v43 = vmov 0  ;;  %4097 = vmatpush.bf16.msrb.mxu3 %v4088_v25  ;;  %v3021_v2 = vsel %vm6253_vm7, %v3013_v17, %v3020_v29  ;;  %v5718_v25 = vrot.slane %v3001_v11, 11  ;;  %v5866_v11 = vld [vmem:[%s9023_s4 + $0x10] sm:$0xf] }
 0x26d   : > { %v9191_v43 = vsel %vm7415_vm15, 4294967295, %v9190_v43 }
 0x26e   : > { %9188 = vst [vmem:[#allocation22_spill] sm:$0xff] %v7400_v60  ;;  %v7404_v8 = vpop.f32.mrf.mxu0  ;;  %5693 = vmatmul.msk.bf16.gmra.mxu3 %vm1024_vm2, %v6047_v19  ;;  %v2813_v19 = vsel %vm7415_vm15, 0, %v2812_v31  ;;  %v3011_v60 = vor.u32 %v9068_v49, %v3008_v40  ;;  %v7437_v31 = vld [vmem:[%s9022_s3] ss:$0 sm:$0xff]  ;;  %v3578_v40 = vunpack.c.l.b16 %v3021_v2 }
 0x26f   : > { %v7402_v15 = vpop.f32.mrf.mxu2  ;;  %9192 = vst [vmem:[#allocation44_spill] sm:$0xff] %v9191_v43 }
 0x270   : > { %9189 = vst [vmem:[#allocation43_spill] sm:$0xff] %v7402_v15  ;;  %v3012_v17 = vsel %vm6253_vm7, %v5718_v25, %v3011_v60  ;;  %v4376_v60 = vsel %vm3484_vm11, %v5866_v11, 0 }
 0x271   : > { %5711 = vmatmul.msk.bf16.gmra.mxu0 %vm1024_vm2, %v6896_v50  ;;  %v2413_v56 = vpop.f32.mrf.mxu3  ;;  %2814 = vst [vmem:[#allocation3 + $0x1c] sm:$0x1] %v2813_v19  ;;  %v7431_v50 = vld [vmem:[%s9021_s2] ss:$0 sm:$0xff]  ;;  %v3577_v19 = vunpack.c.l.b16 %v3012_v17  ;;  %4385 = vmatpush.bf16.msrb.mxu1 %v4376_v60 }
 0x272   : > { %v2493_v15 = vadd.f32 %v2413_v56, %v7083_v55 }
 0x273   : > { %v3609_v2 = vpack.c.b16 %v3578_v40, %v3577_v19  ;;  %v2815_v40 = vld [vmem:[#allocation3 + $0x2c] sm:$0x1] }
 0x274   : > { %v2639_v16 = vadd.f32 %v7349_v13, %v2493_v15  ;;  %v5887_v15 = vld [vmem:[%s9023_s4 + $0x14] sm:$0xf]  ;;  %v5849_v13 = vld [vmem:[%s9023_s4 + $0xc] sm:$0xf] }
 0x275   : > { %v4522_v56 = vsel %vm3484_vm11, %v5887_v15, 0  ;;  %5815 = vmatmul.msk.bf16.vlgmr.msra.gmra.mxu2 %vm3435_vm13, %v3609_v2 }
 0x276   : > { %v2566_v49 = vpop.f32.mrf.mxu0  ;;  %v2675_v29 = vmul.f32 %v7431_v50, %v2639_v16  ;;  %4531 = vmatpush.bf16.msrb.mxu2 %v4522_v56  ;;  %v9194_v56 = vld [vmem:[#allocation14_spill] sm:$0xff] }
 0x277   : > { %v2354_v30 = vpop.f32.mrf.mxu2 }
 0x278   : > { %v7441_v55 = vadd.f32 %v2354_v30, %v2235_v14  ;;  %v4242_v14 = vsel %vm3484_vm11, %v5849_v13, 0  ;;  %v2711_v16 = vadd.f32 %v7437_v31, %v2675_v29  ;;  %v6048_v29 = vld [vmem:[#allocation2 + $0xb4] sm:$0xff]  ;;  %v2935_v48 = vld [vmem:[#allocation3 + $0x1c] sm:$0x1] }
 0x279   : > { %4251 = vmatpush.bf16.msrb.mxu0 %v4242_v14  ;;  %v2415_v25 = vpop.f32.mrf.mxu3 }
 0x27a   : > { %9193 = vst [vmem:[#allocation45_spill] sm:$0xff] %v7441_v55  ;;  %v2743_v30 = vmax.f32 %v2711_v16, 0.0  ;;  %v2494_v17 = vadd.f32 %v2415_v25, %v7086_v41  ;;  %v2816_v41 = vsel %vm7415_vm15, 0, %v2815_v40  ;;  %v2932_v25 = vld [vmem:[#allocation3 + $0x10] sm:$0xf] }
 0x27b   : > { %2817 = vst [vmem:[#allocation3 + $0x2c] sm:$0x1] %v2816_v41 }
 0x27c   : > { %v2863_v55 = vpack.c.bf16 %v2743_v30, %v2743_v30  ;;  %v2640_v24 = vadd.f32 %v7375_v35, %v2494_v17 }
 0x27e   : > { %v7460_v15 = vpop.f32.mrf.mxu0  ;;  %2896 = vst.msk [vmem:[#allocation3 + $0x14] sm:$0xf] %vm2775_vm12, %v2863_v55  ;;  %v2676_v13 = vmul.f32 %v7431_v50, %v2640_v24  ;;  %5694 = vmatmul.msk.bf16.gmra.mxu3 %vm1024_vm2, %v6048_v29 }
 0x280   : > { %v2712_v19 = vadd.f32 %v7437_v31, %v2676_v13 }
 0x281   : > { %5712 = vmatmul.msk.bf16.gmra.mxu0 %vm1024_vm2, %v9145_v27  ;;  %v2418_v11 = vpop.f32.mrf.mxu3 }
 0x282   : > { %v2744_v35 = vmax.f32 %v2712_v19, 0.0  ;;  %v2495_v14 = vadd.f32 %v2418_v11, %v9194_v56  ;;  %v3023_v19 = vshrl.u32 %v2932_v25, 16 }
 0x284   : > { %v2864_v55 = vpack.c.bf16 %v2744_v35, %v2744_v35  ;;  %v2641_v24 = vadd.f32 %v7404_v8, %v2495_v14  ;;  %v9195_v35 = vld [vmem:[#allocation16_spill] sm:$0xff]  ;;  %v5719_v4 = vrot.slane %v3023_v19, 11 }
 0x285   : > { %v2933_v16 = vld [vmem:[#allocation3 + $0x14] sm:$0xf] }
 0x286   : > { %v7472_v60 = vpop.f32.mrf.mxu0  ;;  %2897 = vst.msk [vmem:[#allocation3 + $0x18] sm:$0xf] %vm2775_vm12, %v2864_v55  ;;  %v2677_v2 = vmul.f32 %v7431_v50, %v2641_v24  ;;  %v3028_v27 = vshrl.u32 %v2933_v16, 16  ;;  %v3031_v30 = vshll.u32 %v2933_v16, 16 }
 0x288   : > { %v2713_v17 = vadd.f32 %v7437_v31, %v2677_v2  ;;  %v3779_v13 = vrot.slane %v3028_v27, 4  ;;  %v3780_v29 = vrot.slane %v3031_v30, 5  ;;  %v3030_v41 = vrot.slane %v3028_v27, 7 }
 0x289   : > { %v2420_v40 = vpop.f32.mrf.mxu3 }
 0x28a   : > { %v2745_v11 = vmax.f32 %v2713_v17, 0.0  ;;  %v2496_v8 = vadd.f32 %v2420_v40, %v9195_v35  ;;  %v3781_v56 = vor.u32 %v3780_v29, %v3779_v13  ;;  %v3033_v16 = vor.u32 %v3031_v30, %v3030_v41  ;;  %v2818_v13 = vld [vmem:[#allocation3 + $0x3c] sm:$0x1]  ;;  %v9197_v40 = vld [vmem:[#allocation12_spill] sm:$0xff] }
 0x28c   : > { %v2865_v14 = vpack.c.bf16 %v2745_v11, %v2745_v11  ;;  %v2642_v51 = vadd.f32 %v2566_v49, %v2496_v8  ;;  %v3782_v17 = vrot.slane %v3781_v56, 4  ;;  %v3789_v49 = vshll.u32 %v2935_v48, 16  ;;  %v9198_v56 = vld [vmem:[#allocation11_spill] sm:$0xff] }
 0x28d   : > { %v5999_v55 = vld [vmem:[#allocation3 + $0x14] sm:$0xff]  ;;  %v2819_v8 = vsel %vm7415_vm15, 0, %v2818_v13 }
 0x28e   : > { %v7478_v3 = vpop.f32.mrf.mxu0  ;;  %v2934_v24 = vld [vmem:[#allocation3 + $0x18] sm:$0xf]  ;;  %2898 = vst.msk [vmem:[#allocation3 + $0x24] sm:$0xf] %vm2775_vm12, %v2865_v14  ;;  %v2678_v2 = vmul.f32 %v7431_v50, %v2642_v51  ;;  %5695 = vmatmul.msk.bf16.gmra.mxu3 %vm1024_vm2, %v9196_v20  ;;  %5800 = vmatmul.msk.bf16.gmra.mxu1 %vm3435_vm13, %v5999_v55  ;;  %v3034_v51 = vsel %vm6253_vm7, %v5719_v4, %v3033_v16  ;;  %v3035_v20 = vrot.slane %v3030_v41, 4 }
 0x28f   : > { %v3037_v25 = vshrl.u32 %v2934_v24, 16  ;;  %v3040_v27 = vshll.u32 %v2934_v24, 16  ;;  %2820 = vst [vmem:[#allocation3 + $0x3c] sm:$0x1] %v2819_v8  ;;  %v3579_v41 = vunpack.c.l.b16 %v3034_v51 }
 0x290   : > { %v2714_v29 = vadd.f32 %v7437_v31, %v2678_v2 }
 0x291   : > { %5713 = vmatmul.msk.bf16.gmra.mxu0 %vm1024_vm2, %v9197_v40  ;;  %v3039_v30 = vrot.slane %v3037_v25, 7  ;;  %v3783_v19 = vrot.slane %v3040_v27, 5  ;;  %v3785_v11 = vrot.slane %v3037_v25, 4  ;;  %v2423_v35 = vpop.f32.mrf.mxu3  ;;  %v3791_v40 = vrot.slane %v3789_v49, 5 }
 0x292   : > { %v2746_v14 = vmax.f32 %v2714_v29, 0.0  ;;  %v2497_v48 = vadd.f32 %v2423_v35, %v9198_v56 }
 0x293   : > { %v3042_v55 = vor.u32 %v3040_v27, %v3039_v30  ;;  %v3784_v24 = vsel %vm6283_vm10, %v3782_v17, %v3783_v19  ;;  %v3786_v2 = vor.u32 %v3785_v11, %v3783_v19  ;;  %v2936_v17 = vld [vmem:[#allocation3 + $0x20] sm:$0xf] }
 0x294   : > { %v2866_v61 = vpack.c.bf16 %v2746_v14, %v2746_v14  ;;  %v2643_v25 = vadd.f32 %v7460_v15, %v2497_v48  ;;  %v3045_v8 = vshrl.u32 %v2936_v17, 16  ;;  %v3993_v14 = vunpack.c.l.b16 %v3784_v24  ;;  %v9200_v17 = vld [vmem:[#allocation7_spill] sm:$0xff] }
 0x295   : > { %v3043_v4 = vsel %vm6253_vm7, %v3035_v20, %v3042_v55  ;;  %v2937_v13 = vld [vmem:[#allocation3 + $0x24] sm:$0xf]  ;;  %v3787_v29 = vrot.slane %v3786_v2, 4  ;;  %v9199_v55 = vld [vmem:[#allocation23_spill] sm:$0xff] }
 0x296   : > { %v3580_v16 = vunpack.c.l.b16 %v3043_v4  ;;  %v7498_v23 = vpop.f32.mrf.mxu0  ;;  %2899 = vst.msk [vmem:[#allocation3 + $0x28] sm:$0xf] %vm2775_vm12, %v2866_v61  ;;  %v2679_v27 = vmul.f32 %v7431_v50, %v2643_v25  ;;  %v3050_v30 = vshrl.u32 %v2937_v13, 16  ;;  %v3053_v19 = vshll.u32 %v2937_v13, 16 }
 0x297   : > { %v3792_v15 = vsel %vm6283_vm10, %v3787_v29, %v3791_v40 }
 0x298   : > { %v7502_v49 = vpack.c.b16 %v3580_v16, %v3579_v41  ;;  %v2715_v11 = vadd.f32 %v7437_v31, %v2679_v27  ;;  %v3994_v35 = vunpack.c.l.b16 %v3792_v15  ;;  %v3793_v51 = vrot.slane %v3050_v30, 4  ;;  %v2939_v16 = vld [vmem:[#allocation3 + $0x2c] sm:$0x1] }
 0x299   : > { %v2425_v20 = vpop.f32.mrf.mxu3  ;;  %v3052_v61 = vrot.slane %v3050_v30, 7  ;;  %v3794_v56 = vrot.slane %v3053_v19, 5  ;;  %v5720_v15 = vrot.slane %v3045_v8, 11 }
 0x29a   : > { %5816 = vmatmul.msk.bf16.gmra.mxu2 %vm3435_vm13, %v7502_v49  ;;  %v2747_v48 = vmax.f32 %v2715_v11, 0.0  ;;  %v2498_v2 = vadd.f32 %v2425_v20, %v9199_v55  ;;  %v7510_v25 = vpack.c.b16 %v3994_v35, %v3993_v14  ;;  %v9201_v14 = vld [vmem:[#allocation15_spill] sm:$0xff] }
 0x29b   : > { %v3795_v4 = vor.u32 %v3794_v56, %v3793_v51  ;;  %v3055_v46 = vor.u32 %v3053_v19, %v3052_v61  ;;  %v2821_v51 = vld [vmem:[#allocation3 + $0x4c] sm:$0x1] }
 0x29c   : > { %v2867_v41 = vpack.c.bf16 %v2747_v48, %v2747_v48  ;;  %v2644_v40 = vadd.f32 %v7472_v60, %v2498_v2  ;;  %v3803_v60 = vshll.u32 %v2939_v16, 16  ;;  %v3057_v2 = vrot.slane %v3052_v61, 4 }
 0x29d   : > { %v6000_v13 = vld [vmem:[#allocation3 + $0x24] sm:$0xff]  ;;  %v3796_v35 = vrot.slane %v3795_v4, 4  ;;  %v3056_v55 = vsel %vm6253_vm7, %v5720_v15, %v3055_v46 }
 0x29e   : > { %v7513_v29 = vpop.f32.mrf.mxu0  ;;  %v2938_v27 = vld [vmem:[#allocation3 + $0x28] sm:$0xf]  ;;  %2900 = vst.msk [vmem:[#allocation3 + $0x34] sm:$0xf] %vm2775_vm12, %v2867_v41  ;;  %v2680_v24 = vmul.f32 %v7431_v50, %v2644_v40  ;;  %5696 = vmatmul.msk.bf16.gmra.mxu3 %vm1024_vm2, %v9200_v17  ;;  %5801 = vmatmul.msk.bf16.gmra.mxu1 %vm3435_vm13, %v6000_v13  ;;  %v2822_v41 = vsel %vm7415_vm15, 0, %v2821_v51  ;;  %v9202_v4 = vld [vmem:[#allocation24_spill] sm:$0xff]  ;;  %v3581_v51 = vunpack.c.l.b16 %v3056_v55 }
 0x29f   : > { %v3059_v30 = vshrl.u32 %v2938_v27, 16  ;;  %v3062_v11 = vshll.u32 %v2938_v27, 16  ;;  %2823 = vst [vmem:[#allocation3 + $0x4c] sm:$0x1] %v2822_v41 }
 0x2a0   : > { %v2716_v20 = vadd.f32 %v7437_v31, %v2680_v24  ;;  %v407_v24 = vld [vmem:[#allocation2 + $0x11c] sm:$0x1] }
 0x2a1   : > { %5714 = vmatmul.msk.bf16.gmra.mxu0 %vm1024_vm2, %v9201_v14  ;;  %v3061_v19 = vrot.slane %v3059_v30, 7  ;;  %v3797_v8 = vrot.slane %v3062_v11, 5  ;;  %v3799_v56 = vrot.slane %v3059_v30, 4  ;;  %v2428_v48 = vpop.f32.mrf.mxu3  ;;  %v3805_v14 = vrot.slane %v3803_v60, 5 }
 0x2a2   : > { %v2748_v40 = vmax.f32 %v2716_v20, 0.0  ;;  %v2499_v16 = vadd.f32 %v2428_v48, %v9202_v4  ;;  %v408_v15 = vsel %vm6238_vm5, 0, %v407_v24 }
 0x2a3   : > { %v3064_v13 = vor.u32 %v3062_v11, %v3061_v19  ;;  %v3798_v27 = vsel %vm6283_vm10, %v3796_v35, %v3797_v8  ;;  %v3800_v17 = vor.u32 %v3799_v56, %v3797_v8  ;;  %409 = vst [vmem:[#allocation2 + $0x11c] sm:$0x1] %v408_v15  ;;  %v2940_v19 = vld [vmem:[#allocation3 + $0x30] sm:$0xf] }
 0x2a4   : > { %v2868_v30 = vpack.c.bf16 %v2748_v40, %v2748_v40  ;;  %v2645_v37 = vadd.f32 %v7478_v3, %v2499_v16  ;;  %v3067_v16 = vshrl.u32 %v2940_v19, 16  ;;  %v3995_v24 = vunpack.c.l.b16 %v3798_v27 }
 0x2a5   : > { %v3065_v46 = vsel %vm6253_vm7, %v3057_v2, %v3064_v13  ;;  %v2941_v11 = vld [vmem:[#allocation3 + $0x34] sm:$0xf]  ;;  %v3801_v35 = vrot.slane %v3800_v17, 4 }
 0x2a6   : > { %v3582_v20 = vunpack.c.l.b16 %v3065_v46  ;;  %v7535_v48 = vpop.f32.mrf.mxu0  ;;  %2901 = vst.msk [vmem:[#allocation3 + $0x38] sm:$0xf] %vm2775_vm12, %v2868_v30  ;;  %v2681_v60 = vmul.f32 %v7431_v50, %v2645_v37  ;;  %v3072_v8 = vshrl.u32 %v2941_v11, 16  ;;  %v3075_v3 = vshll.u32 %v2941_v11, 16  ;;  %v9205_v30 = vld [vmem:[#allocation27_spill] sm:$0xff] }
 0x2a7   : > { %v3806_v2 = vsel %vm6283_vm10, %v3801_v35, %v3805_v14  ;;  %v5721_v21 = vrot.slane %v3067_v16, 11 }
 0x2a8   : > { %v7539_v56 = vpack.c.b16 %v3582_v20, %v3581_v51  ;;  %v2717_v55 = vadd.f32 %v7437_v31, %v2681_v60  ;;  %v3996_v41 = vunpack.c.l.b16 %v3806_v2  ;;  %v3807_v40 = vrot.slane %v3072_v8, 4 }
 0x2a9   : > { %v2430_v4 = vpop.f32.mrf.mxu3  ;;  %v3074_v13 = vrot.slane %v3072_v8, 7  ;;  %v3808_v37 = vrot.slane %v3075_v3, 5  ;;  %v9207_v8 = vld [vmem:[#allocation8_spill] sm:$0xff] }
 0x2aa   : > { %9204 = vst [vmem:[#allocation14_spill] sm:$0xff] %v7539_v56  ;;  %5817 = vmatmul.msk.bf16.gmra.mxu2 %vm3435_vm13, %v7539_v56  ;;  %v2749_v17 = vmax.f32 %v2717_v55, 0.0  ;;  %v2500_v46 = vadd.f32 %v2430_v4, %v9205_v30  ;;  %v7547_v15 = vpack.c.b16 %v3996_v41, %v3995_v24  ;;  %v479_v11 = vld [vmem:[#allocation2 + $0x11c] sm:$0x1] }
 0x2ab   : > { %v3809_v51 = vor.u32 %v3808_v37, %v3807_v40  ;;  %v3077_v22 = vor.u32 %v3075_v3, %v3074_v13  ;;  %v480_v27 = vsel %vm6238_vm5, 0, %v479_v11  ;;  %v2824_v4 = vld [vmem:[#allocation3 + $0x5c] sm:$0x1]  ;;  %v3079_v30 = vrot.slane %v3074_v13, 4  ;;  %v9210_v13 = vld [vmem:[#allocation25_spill] sm:$0xff] }
 0x2ac   : > { %9206 = vst [vmem:[#allocation16_spill] sm:$0xff] %v7547_v15  ;;  %v2869_v20 = vpack.c.bf16 %v2749_v17, %v2749_v17  ;;  %v2646_v14 = vadd.f32 %v7498_v23, %v2500_v46  ;;  %v2943_v23 = vld [vmem:[#allocation3 + $0x3c] sm:$0x1] }
 0x2ad   : > { %v6001_v35 = vld [vmem:[#allocation3 + $0x34] sm:$0xff]  ;;  %481 = vst [vmem:[#allocation2 + $0x11c] sm:$0x1] %v480_v27  ;;  %v3810_v40 = vrot.slane %v3809_v51, 4  ;;  %v3078_v17 = vsel %vm6253_vm7, %v5721_v21, %v3077_v22  ;;  %v3817_v46 = vshll.u32 %v2943_v23, 16  ;;  %v9208_v51 = vld [vmem:[#allocation9_spill] sm:$0xff] }
 0x2ae   : > { %v7550_v60 = vpop.f32.mrf.mxu0  ;;  %v2942_v2 = vld [vmem:[#allocation3 + $0x38] sm:$0xf]  ;;  %2902 = vst.msk [vmem:[#allocation3 + $0x44] sm:$0xf] %vm2775_vm12, %v2869_v20  ;;  %v2682_v19 = vmul.f32 %v7431_v50, %v2646_v14  ;;  %5697 = vmatmul.msk.bf16.gmra.mxu3 %vm1024_vm2, %v9207_v8  ;;  %5802 = vmatmul.msk.bf16.gmra.mxu1 %vm3435_vm13, %v6001_v35  ;;  %v2825_v20 = vsel %vm7415_vm15, 0, %v2824_v4  ;;  %v9209_v21 = vld [vmem:[#allocation26_spill] sm:$0xff] }
 0x2af   : > { %v3081_v55 = vshrl.u32 %v2942_v2, 16  ;;  %v3084_v41 = vshll.u32 %v2942_v2, 16  ;;  %2826 = vst [vmem:[#allocation3 + $0x5c] sm:$0x1] %v2825_v20  ;;  %v2214_v8 = vadd.f32 %v9210_v13, %v9209_v21  ;;  %v9213_v20 = vshll.u32 %v7181_v36, 16 }
 0x2b0   : > { %v2718_v3 = vadd.f32 %v7437_v31, %v2682_v19 }
 0x2b1   : > { %5715 = vmatmul.msk.bf16.gmra.mxu0 %vm1024_vm2, %v6863_v59  ;;  %v3083_v61 = vrot.slane %v3081_v55, 7  ;;  %v3811_v16 = vrot.slane %v3084_v41, 5  ;;  %v3813_v24 = vrot.slane %v3081_v55, 4  ;;  %v2433_v37 = vpop.f32.mrf.mxu3  ;;  %v3583_v55 = vunpack.c.l.b16 %v3078_v17 }
 0x2b2   : > { %v2750_v14 = vmax.f32 %v2718_v3, 0.0  ;;  %v2501_v11 = vadd.f32 %v2433_v37, %v9208_v51  ;;  %v2944_v3 = vld [vmem:[#allocation3 + $0x40] sm:$0xf]  ;;  %v2526_v17 = vrot.slane %v9213_v20, 5 }
 0x2b3   : > { %v3086_v35 = vor.u32 %v3084_v41, %v3083_v61  ;;  %v3812_v2 = vsel %vm6283_vm10, %v3810_v40, %v3811_v16  ;;  %v3814_v59 = vor.u32 %v3813_v24, %v3811_v16  ;;  %v3819_v61 = vrot.slane %v3817_v46, 5 }
 0x2b4   : > { %v2870_v27 = vpack.c.bf16 %v2750_v14, %v2750_v14  ;;  %v2647_v19 = vadd.f32 %v7513_v29, %v2501_v11  ;;  %v9211_v29 = vshrl.u32 %v7181_v36, 16  ;;  %v9214_v14 = vshll.u32 %v7189_v1, 16  ;;  %v2781_v36 = vld [vmem:[#allocation3 + $0xc] sm:$0x1] }
 0x2b5   : > { %v3087_v22 = vsel %vm6253_vm7, %v3079_v30, %v3086_v35  ;;  %v2945_v41 = vld [vmem:[#allocation3 + $0x44] sm:$0xf]  ;;  %v9215_v46 = vshrl.u32 %v7189_v1, 16  ;;  %v9216_v35 = vld [vmem:[#allocation30_spill] sm:$0xff]  ;;  %v3815_v21 = vrot.slane %v3814_v59, 4 }
 0x2b6   : > { %v3584_v23 = vunpack.c.l.b16 %v3087_v22  ;;  %v7574_v4 = vpop.f32.mrf.mxu0  ;;  %2903 = vst.msk [vmem:[#allocation3 + $0x48] sm:$0xf] %vm2775_vm12, %v2870_v27  ;;  %v2683_v40 = vmul.f32 %v7431_v50, %v2647_v19  ;;  %v3094_v16 = vshrl.u32 %v2945_v41, 16  ;;  %v3097_v24 = vshll.u32 %v2945_v41, 16 }
 0x2b7   : > { %v2525_v37 = vrot.slane %v9211_v29, 4  ;;  %v7586_v51 = vrot.slane %v9214_v14, 5  ;;  %v2531_v11 = vrot.slane %v9215_v46, 4  ;;  %v2368_v27 = vadd.f32 %v9216_v35, %v2214_v8  ;;  %v586_v14 = vld [vmem:[#allocation2 + $0x11c] sm:$0x1] }
 0x2b8   : > { %v7580_v30 = vpack.c.b16 %v3584_v23, %v3583_v55  ;;  %v2719_v19 = vadd.f32 %v7437_v31, %v2683_v40  ;;  %v3089_v22 = vshrl.u32 %v2944_v3, 16  ;;  %v3096_v55 = vrot.slane %v3094_v16, 7  ;;  %v2947_v3 = vld [vmem:[#allocation3 + $0x4c] sm:$0x1] }
 0x2b9   : > { %v2435_v13 = vpop.f32.mrf.mxu3  ;;  %v3821_v23 = vrot.slane %v3094_v16, 4  ;;  %v3822_v41 = vrot.slane %v3097_v24, 5  ;;  %v2527_v44 = vor.u32 %v2526_v17, %v2525_v37  ;;  %v2532_v1 = vor.u32 %v2531_v11, %v7586_v51 }
 0x2ba   : > { %9212 = vst [vmem:[#allocation13_spill] sm:$0xff] %v7580_v30  ;;  %5818 = vmatmul.msk.bf16.gmra.mxu2 %vm3435_vm13, %v7580_v30  ;;  %v2751_v29 = vmax.f32 %v2719_v19, 0.0  ;;  %v2502_v20 = vadd.f32 %v2435_v13, %v2368_v27  ;;  %v2782_v8 = vsel %vm7415_vm15, 0, %v2781_v36  ;;  %v3820_v59 = vsel %vm6283_vm10, %v3815_v21, %v3819_v61  ;;  %v6049_v61 = vld [vmem:[#allocation2 + $0xf4] sm:$0xff] }
 0x2bb   : > { %v5722_v35 = vrot.slane %v3089_v22, 11  ;;  %2783 = vst [vmem:[#allocation3 + $0xc] sm:$0x1] %v2782_v8  ;;  %v3997_v16 = vunpack.c.l.b16 %v3812_v2  ;;  %v3099_v37 = vor.u32 %v3097_v24, %v3096_v55  ;;  %v2535_v17 = vshll.u32 %v586_v14, 16  ;;  %v2827_v14 = vld [vmem:[#allocation3 + $0x6c] sm:$0x1] }
 0x2bc   : > { %v2871_v40 = vpack.c.bf16 %v2751_v29, %v2751_v29  ;;  %v2648_v46 = vadd.f32 %v7535_v48, %v2502_v20  ;;  %v3998_v11 = vunpack.c.l.b16 %v3820_v59  ;;  %v3823_v13 = vor.u32 %v3822_v41, %v3821_v23 }
 0x2bd   : > { %v6002_v34 = vld [vmem:[#allocation3 + $0x44] sm:$0xff]  ;;  %v3831_v22 = vshll.u32 %v2947_v3, 16  ;;  %v2528_v2 = vrot.slane %v2527_v44, 4  ;;  %v2533_v29 = vrot.slane %v2532_v1, 4  ;;  %v3100_v3 = vsel %vm6253_vm7, %v5722_v35, %v3099_v37 }
 0x2be   : > { %v7600_v19 = vpop.f32.mrf.mxu0  ;;  %v2946_v27 = vld [vmem:[#allocation3 + $0x48] sm:$0xf]  ;;  %2904 = vst.msk [vmem:[#allocation3 + $0x54] sm:$0xf] %vm2775_vm12, %v2871_v40  ;;  %v2684_v36 = vmul.f32 %v7431_v50, %v2648_v46  ;;  %5698 = vmatmul.msk.bf16.gmra.mxu3 %vm1024_vm2, %v6049_v61  ;;  %5803 = vmatmul.msk.bf16.gmra.mxu1 %vm3435_vm13, %v6002_v34  ;;  %v7606_v20 = vpack.c.b16 %v3998_v11, %v3997_v16  ;;  %v3824_v24 = vrot.slane %v3823_v13, 4  ;;  %v3101_v46 = vrot.slane %v3096_v55, 4 }
 0x2bf   : > { %v3103_v21 = vshrl.u32 %v2946_v27, 16  ;;  %v3106_v48 = vshll.u32 %v2946_v27, 16  ;;  %v2537_v34 = vrot.slane %v2535_v17, 5  ;;  %v2828_v44 = vsel %vm7415_vm15, 0, %v2827_v14  ;;  %v9219_v13 = vld [vmem:[#allocation28_spill] sm:$0xff] }
 0x2c0   : > { %9217 = vst [vmem:[#allocation12_spill] sm:$0xff] %v7606_v20  ;;  %v2720_v23 = vadd.f32 %v7437_v31, %v2684_v36  ;;  %v2530_v35 = vsel %vm6283_vm10, %v2528_v2, %v7586_v51  ;;  %v3833_v17 = vrot.slane %v3831_v22, 5  ;;  %v2948_v22 = vld [vmem:[#allocation3 + $0x50] sm:$0xf] }
 0x2c1   : > { %5716 = vmatmul.msk.bf16.gmra.mxu0 %vm1024_vm2, %v7202_v52  ;;  %v3105_v41 = vrot.slane %v3103_v21, 7  ;;  %v3825_v8 = vrot.slane %v3106_v48, 5  ;;  %v3827_v59 = vrot.slane %v3103_v21, 4  ;;  %v2438_v40 = vpop.f32.mrf.mxu3  ;;  %2829 = vst [vmem:[#allocation3 + $0x6c] sm:$0x1] %v2828_v44  ;;  %v9218_v52 = vld [vmem:[#allocation29_spill] sm:$0xff] }
 0x2c2   : > { %v2752_v1 = vmax.f32 %v2720_v23, 0.0  ;;  %v2503_v16 = vadd.f32 %v2438_v40, %v7179_v53  ;;  %v2216_v36 = vadd.f32 %v9219_v13, %v9218_v52  ;;  %v2809_v55 = vld [vmem:[#allocation3 + $0xc] sm:$0x1] }
 0x2c3   : > { %v3108_v27 = vor.u32 %v3106_v48, %v3105_v41  ;;  %v3826_v11 = vsel %vm6283_vm10, %v3824_v24, %v3825_v8  ;;  %v3828_v37 = vor.u32 %v3827_v59, %v3825_v8  ;;  %v2810_v48 = vsel %vm7415_vm15, 0, %v2809_v55 }
 0x2c4   : > { %v2872_v61 = vpack.c.bf16 %v2752_v1, %v2752_v1  ;;  %v2649_v21 = vadd.f32 %v7550_v60, %v2503_v16  ;;  %v3585_v24 = vunpack.c.l.b16 %v3100_v3  ;;  %v2538_v41 = vsel %vm6283_vm10, %v2533_v29, %v2537_v34  ;;  %2811 = vst [vmem:[#allocation3 + $0xc] sm:$0x1] %v2810_v48 }
 0x2c5   : > { %v3109_v53 = vsel %vm6253_vm7, %v3101_v46, %v3108_v27  ;;  %v2949_v51 = vld [vmem:[#allocation3 + $0x54] sm:$0xf]  ;;  %v3829_v2 = vrot.slane %v3828_v37, 4  ;;  %v2370_v40 = vadd.f32 %v7197_v47, %v2216_v36  ;;  %v2541_v29 = vunpack.c.l.b16 %v2530_v35  ;;  %v2951_v35 = vld [vmem:[#allocation3 + $0x5c] sm:$0x1] }
 0x2c6   : > { %v3586_v14 = vunpack.c.l.b16 %v3109_v53  ;;  %v7628_v23 = vpop.f32.mrf.mxu0  ;;  %2905 = vst.msk [vmem:[#allocation3 + $0x58] sm:$0xf] %vm2775_vm12, %v2872_v61  ;;  %v2685_v60 = vmul.f32 %v7431_v50, %v2649_v21  ;;  %v3116_v8 = vshrl.u32 %v2949_v51, 16  ;;  %v3119_v59 = vshll.u32 %v2949_v51, 16 }
 0x2c7   : > { %v3834_v3 = vsel %vm6283_vm10, %v3829_v2, %v3833_v17  ;;  %v2542_v34 = vunpack.c.l.b16 %v2538_v41  ;;  %v3111_v27 = vshrl.u32 %v2948_v22, 16  ;;  %v3999_v13 = vunpack.c.l.b16 %v3826_v11  ;;  %v6050_v2 = vld [vmem:[#allocation2 + $0x104] sm:$0xff] }
 0x2c8   : > { %v7635_v46 = vpack.c.b16 %v3586_v14, %v3585_v24  ;;  %v2721_v44 = vadd.f32 %v7437_v31, %v2685_v60  ;;  %v4000_v1 = vunpack.c.l.b16 %v3834_v3  ;;  %v3118_v52 = vrot.slane %v3116_v8, 7 }
 0x2c9   : > { %v2440_v16 = vpop.f32.mrf.mxu3  ;;  %v3835_v47 = vrot.slane %v3116_v8, 4  ;;  %v3836_v36 = vrot.slane %v3119_v59, 5  ;;  %v2543_v17 = vpack.c.b16 %v2542_v34, %v2541_v29  ;;  %v5723_v41 = vrot.slane %v3111_v27, 11 }
 0x2ca   : > { %9220 = vst [vmem:[#allocation11_spill] sm:$0xff] %v7635_v46  ;;  %5819 = vmatmul.msk.bf16.gmra.mxu2 %vm3435_vm13, %v7635_v46  ;;  %v2753_v55 = vmax.f32 %v2721_v44, 0.0  ;;  %v2504_v37 = vadd.f32 %v2440_v16, %v2370_v40  ;;  %v7643_v53 = vpack.c.b16 %v4000_v1, %v3999_v13  ;;  %v3121_v51 = vor.u32 %v3119_v59, %v3118_v52 }
 0x2cb   : > { %v3845_v8 = vshll.u32 %v2951_v35, 16  ;;  %v2218_v59 = vadd.f32 %v7183_v62, %v7195_v58  ;;  %v3123_v34 = vrot.slane %v3118_v52, 4 }
 0x2cc   : > { %v2873_v61 = vpack.c.bf16 %v2753_v55, %v2753_v55  ;;  %v2650_v21 = vadd.f32 %v7574_v4, %v2504_v37  ;;  %9221 = vst [vmem:[#allocation23_spill] sm:$0xff] %v7643_v53  ;;  %v3837_v4 = vor.u32 %v3836_v36, %v3835_v47  ;;  %v3122_v55 = vsel %vm6253_vm7, %v5723_v41, %v3121_v51 }
 0x2cd   : > { %v6003_v48 = vld [vmem:[#allocation3 + $0x54] sm:$0xff]  ;;  %v2372_v47 = vadd.f32 %v7230_v18, %v2218_v59  ;;  %v2952_v18 = vld [vmem:[#allocation3 + $0x60] sm:$0xf]  ;;  %v9226_v59 = vshrl.u32 %v7369_v0, 16 }
 0x2ce   : > { %v7645_v24 = vpop.f32.mrf.mxu0  ;;  %v2950_v14 = vld [vmem:[#allocation3 + $0x58] sm:$0xf]  ;;  %2906 = vst.msk [vmem:[#allocation3 + $0x64] sm:$0xf] %vm2775_vm12, %v2873_v61  ;;  %v2686_v11 = vmul.f32 %v7431_v50, %v2650_v21  ;;  %5699 = vmatmul.msk.bf16.gmra.mxu3 %vm1024_vm2, %v6050_v2  ;;  %5804 = vmatmul.msk.bf16.gmra.mxu1 %vm3435_vm13, %v6003_v48  ;;  %v3838_v1 = vrot.slane %v3837_v4, 4  ;;  %v3847_v21 = vrot.slane %v3845_v8, 5  ;;  %v3587_v48 = vunpack.c.l.b16 %v3122_v55 }
 0x2cf   : > { %v3125_v60 = vshrl.u32 %v2950_v14, 16  ;;  %v3128_v22 = vshll.u32 %v2950_v14, 16 }
 0x2d0   : > { %v2722_v40 = vadd.f32 %v7437_v31, %v2686_v11  ;;  %v9223_v11 = vshll.u32 %v7367_v57, 16 }
 0x2d1   : > { %5717 = vmatmul.msk.bf16.gmra.mxu0 %vm1024_vm2, %v2543_v17  ;;  %v3127_v3 = vrot.slane %v3125_v60, 7  ;;  %v3839_v44 = vrot.slane %v3128_v22, 5  ;;  %v2443_v29 = vpop.f32.mrf.mxu3  ;;  %v3841_v16 = vrot.slane %v3125_v60, 4  ;;  %v2830_v17 = vld [vmem:[#allocation3 + $0x7c] sm:$0x1] }
 0x2d2   : > { %v2754_v27 = vmax.f32 %v2722_v40, 0.0  ;;  %v2505_v13 = vadd.f32 %v2443_v29, %v7219_v32  ;;  %v9222_v32 = vshrl.u32 %v7367_v57, 16  ;;  %v3766_v2 = vrot.slane %v9223_v11, 5  ;;  %v2955_v11 = vld [vmem:[#allocation3 + $0x6c] sm:$0x1] }
 0x2d3   : > { %v3130_v37 = vor.u32 %v3128_v22, %v3127_v3  ;;  %v3840_v36 = vsel %vm6283_vm10, %v3838_v1, %v3839_v44  ;;  %v3842_v61 = vor.u32 %v3841_v16, %v3839_v44  ;;  %v2831_v8 = vsel %vm7415_vm15, 0, %v2830_v17  ;;  %v2931_v16 = vld [vmem:[#allocation3 + $0xc] sm:$0x1] }
 0x2d4   : > { %v2874_v62 = vpack.c.bf16 %v2754_v27, %v2754_v27  ;;  %v2651_v58 = vadd.f32 %v7600_v19, %v2505_v13  ;;  %v3765_v35 = vrot.slane %v9222_v32, 4  ;;  %v9225_v3 = vshll.u32 %v7369_v0, 16  ;;  %2832 = vst [vmem:[#allocation3 + $0x7c] sm:$0x1] %v2831_v8 }
 0x2d5   : > { %v3131_v52 = vsel %vm6253_vm7, %v3123_v34, %v3130_v37  ;;  %v2953_v51 = vld [vmem:[#allocation3 + $0x64] sm:$0xf]  ;;  %v3843_v60 = vrot.slane %v3842_v61, 4  ;;  %v3771_v57 = vrot.slane %v9226_v59, 4  ;;  %v3133_v1 = vshrl.u32 %v2952_v18, 16 }
 0x2d6   : > { %v3588_v14 = vunpack.c.l.b16 %v3131_v52  ;;  %v7666_v41 = vpop.f32.mrf.mxu0  ;;  %2907 = vst.msk [vmem:[#allocation3 + $0x68] sm:$0xf] %vm2775_vm12, %v2874_v62  ;;  %v2687_v19 = vmul.f32 %v7431_v50, %v2651_v58  ;;  %v3138_v22 = vshrl.u32 %v2953_v51, 16  ;;  %v3141_v4 = vshll.u32 %v2953_v51, 16  ;;  %v5997_v52 = vld [vmem:[#allocation2 + $0x114] sm:$0xff] }
 0x2d7   : > { %v7678_v44 = vrot.slane %v9225_v3, 5  ;;  %v3848_v29 = vsel %vm6283_vm10, %v3843_v60, %v3847_v21  ;;  %v3767_v61 = vor.u32 %v3766_v2, %v3765_v35  ;;  %v4001_v17 = vunpack.c.l.b16 %v3840_v36 }
 0x2d8   : > { %v7674_v40 = vpack.c.b16 %v3588_v14, %v3587_v48  ;;  %v2723_v34 = vadd.f32 %v7437_v31, %v2687_v19  ;;  %v4002_v27 = vunpack.c.l.b16 %v3848_v29  ;;  %v3849_v13 = vrot.slane %v3138_v22, 4 }
 0x2d9   : > { %v2445_v55 = vpop.f32.mrf.mxu3  ;;  %v3140_v37 = vrot.slane %v3138_v22, 7  ;;  %v3850_v62 = vrot.slane %v3141_v4, 5  ;;  %v3772_v21 = vor.u32 %v3771_v57, %v7678_v44  ;;  %v3775_v32 = vshll.u32 %v2931_v16, 16 }
 0x2da   : > { %9224 = vst [vmem:[#allocation7_spill] sm:$0xff] %v7674_v40  ;;  %5820 = vmatmul.msk.bf16.gmra.mxu2 %vm3435_vm13, %v7674_v40  ;;  %v2755_v0 = vmax.f32 %v2723_v34, 0.0  ;;  %v2506_v58 = vadd.f32 %v2445_v55, %v2372_v47  ;;  %v7688_v48 = vpack.c.b16 %v4002_v27, %v4001_v17  ;;  %v5724_v35 = vrot.slane %v3133_v1, 11  ;;  %v2833_v34 = vld [vmem:[#allocation3 + $0x8c] sm:$0x1] }
 0x2db   : > { %v3851_v14 = vor.u32 %v3850_v62, %v3849_v13  ;;  %v3143_v36 = vor.u32 %v3141_v4, %v3140_v37  ;;  %v3768_v2 = vrot.slane %v3767_v61, 4  ;;  %v3773_v59 = vrot.slane %v3772_v21, 4 }
 0x2dc   : > { %v2875_v18 = vpack.c.bf16 %v2755_v0, %v2755_v0  ;;  %v2652_v51 = vadd.f32 %v7628_v23, %v2506_v58  ;;  %v3777_v23 = vrot.slane %v3775_v32, 5  ;;  %v3859_v29 = vshll.u32 %v2955_v11, 16 }
 0x2dd   : > { %v6004_v60 = vld [vmem:[#allocation3 + $0x64] sm:$0xff]  ;;  %v3852_v57 = vrot.slane %v3851_v14, 4  ;;  %v3144_v55 = vsel %vm6253_vm7, %v5724_v35, %v3143_v36  ;;  %v3145_v61 = vrot.slane %v3140_v37, 4  ;;  %v3770_v17 = vsel %vm6283_vm10, %v3768_v2, %v7678_v44 }
 0x2de   : > { %v7691_v19 = vpop.f32.mrf.mxu0  ;;  %v2954_v22 = vld [vmem:[#allocation3 + $0x68] sm:$0xf]  ;;  %2908 = vst.msk [vmem:[#allocation3 + $0x74] sm:$0xf] %vm2775_vm12, %v2875_v18  ;;  %v2688_v47 = vmul.f32 %v7431_v50, %v2652_v51  ;;  %5700 = vmatmul.msk.bf16.gmra.mxu3 %vm1024_vm2, %v5997_v52  ;;  %5805 = vmatmul.msk.bf16.gmra.mxu1 %vm3435_vm13, %v6004_v60  ;;  %v2834_v62 = vsel %vm7415_vm15, 0, %v2833_v34  ;;  %v3778_v21 = vsel %vm6283_vm10, %v3773_v59, %v3777_v23  ;;  %v3861_v37 = vrot.slane %v3859_v29, 5 }
 0x2df   : > { %v3147_v8 = vshrl.u32 %v2954_v22, 16  ;;  %v3150_v3 = vshll.u32 %v2954_v22, 16  ;;  %2835 = vst [vmem:[#allocation3 + $0x8c] sm:$0x1] %v2834_v62  ;;  %v2220_v14 = vadd.f32 %v7225_v38, %v7228_v54  ;;  %v3991_v22 = vunpack.c.l.b16 %v3770_v17 }
 0x2e0   : > { %v2724_v16 = vadd.f32 %v7437_v31, %v2688_v47  ;;  %v3992_v47 = vunpack.c.l.b16 %v3778_v21 }
 0x2e1   : > { %5850 = vmatmul.msk.bf16.vlgmr.msrb.gmra.mxu0 %vm3435_vm13, %v7502_v49  ;;  %v3149_v4 = vrot.slane %v3147_v8, 7  ;;  %v3853_v1 = vrot.slane %v3150_v3, 5  ;;  %v3855_v27 = vrot.slane %v3147_v8, 4  ;;  %v2448_v13 = vpop.f32.mrf.mxu3  ;;  %v2956_v8 = vld [vmem:[#allocation3 + $0x70] sm:$0xf]  ;;  %v2374_v59 = vadd.f32 %v7245_v26, %v2220_v14 }
 0x2e2   : > { %v2756_v0 = vmax.f32 %v2724_v16, 0.0  ;;  %v2507_v58 = vadd.f32 %v2448_v13, %v7238_v42  ;;  %v3589_v42 = vunpack.c.l.b16 %v3144_v55  ;;  %v3155_v16 = vshrl.u32 %v2956_v8, 16 }
 0x2e3   : > { %v3152_v52 = vor.u32 %v3150_v3, %v3149_v4  ;;  %v3854_v49 = vsel %vm6283_vm10, %v3852_v57, %v3853_v1  ;;  %v3856_v32 = vor.u32 %v3855_v27, %v3853_v1 }
 0x2e4   : > { %v2876_v44 = vpack.c.bf16 %v2756_v0, %v2756_v0  ;;  %v2653_v18 = vadd.f32 %v7645_v24, %v2507_v58  ;;  %v4003_v1 = vunpack.c.l.b16 %v3854_v49  ;;  %v2959_v58 = vld [vmem:[#allocation3 + $0x7c] sm:$0x1] }
 0x2e5   : > { %v3153_v51 = vsel %vm6253_vm7, %v3145_v61, %v3152_v52  ;;  %v2957_v35 = vld [vmem:[#allocation3 + $0x74] sm:$0xf]  ;;  %v3857_v36 = vrot.slane %v3856_v32, 4  ;;  %v4023_v61 = vpack.c.b16 %v3992_v47, %v3991_v22 }
 0x2e6   : > { %v3590_v11 = vunpack.c.l.b16 %v3153_v51  ;;  %v7717_v60 = vpop.f32.mrf.mxu0  ;;  %2909 = vst.msk [vmem:[#allocation3 + $0x78] sm:$0xf] %vm2775_vm12, %v2876_v44  ;;  %v2689_v2 = vmul.f32 %v7431_v50, %v2653_v18  ;;  %v3160_v54 = vshrl.u32 %v2957_v35, 16  ;;  %v3163_v38 = vshll.u32 %v2957_v35, 16 }
 0x2e7   : > { %v3862_v24 = vsel %vm6283_vm10, %v3857_v36, %v3861_v37  ;;  %v5725_v37 = vrot.slane %v3155_v16, 11 }
 0x2e8   : > { %v7721_v3 = vpack.c.b16 %v3590_v11, %v3589_v42  ;;  %v2725_v23 = vadd.f32 %v7437_v31, %v2689_v2  ;;  %v4004_v57 = vunpack.c.l.b16 %v3862_v24  ;;  %v3863_v29 = vrot.slane %v3160_v54, 4  ;;  %v7738_v11 = vpop.f32.mrf.mxu1 }
 0x2e9   : > { %v2450_v34 = vpop.f32.mrf.mxu3  ;;  %v3162_v4 = vrot.slane %v3160_v54, 7  ;;  %v3864_v27 = vrot.slane %v3163_v38, 5  ;;  %v3873_v42 = vshll.u32 %v2959_v58, 16 }
 0x2ea   : > { %9227 = vst [vmem:[#allocation15_spill] sm:$0xff] %v7721_v3  ;;  %5821 = vmatmul.msk.bf16.gmra.mxu2 %vm3435_vm13, %v7721_v3  ;;  %v2757_v13 = vmax.f32 %v2725_v23, 0.0  ;;  %v2508_v55 = vadd.f32 %v2450_v34, %v2374_v59  ;;  %v7729_v17 = vpack.c.b16 %v4004_v57, %v4003_v1 }
 0x2eb   : > { %v3865_v62 = vor.u32 %v3864_v27, %v3863_v29  ;;  %v3165_v14 = vor.u32 %v3163_v38, %v3162_v4  ;;  %v3167_v8 = vrot.slane %v3162_v4, 4  ;;  %v3875_v57 = vrot.slane %v3873_v42, 5  ;;  %v7753_v4 = vpop.f32.mrf.mxu2 }
 0x2ec   : > { %v2877_v0 = vpack.c.bf16 %v2757_v13, %v2757_v13  ;;  %v2654_v26 = vadd.f32 %v7666_v41, %v2508_v55  ;;  %v2836_v41 = vld [vmem:[#allocation3 + $0x9c] sm:$0x1] }
 0x2ed   : > { %v6005_v52 = vld [vmem:[#allocation3 + $0x74] sm:$0xff]  ;;  %v3866_v51 = vrot.slane %v3865_v62, 4  ;;  %v3166_v47 = vsel %vm6253_vm7, %v5725_v37, %v3165_v14  ;;  %v2837_v54 = vsel %vm7415_vm15, 0, %v2836_v41 }
 0x2ee   : > { %v7732_v21 = vpop.f32.mrf.mxu0  ;;  %v2958_v32 = vld [vmem:[#allocation3 + $0x78] sm:$0xf]  ;;  %2910 = vst.msk [vmem:[#allocation3 + $0x84] sm:$0xf] %vm2775_vm12, %v2877_v0  ;;  %v2690_v49 = vmul.f32 %v7431_v50, %v2654_v26  ;;  %5832 = vmatmul.msk.bf16.vlgmr.msrb.gmra.mxu3 %vm3435_vm13, %v4023_v61  ;;  %5806 = vmatmul.msk.bf16.gmra.mxu1 %vm3435_vm13, %v6005_v52  ;;  %v3591_v1 = vunpack.c.l.b16 %v3166_v47  ;;  %v2222_v61 = vadd.f32 %v7240_v6, %v7243_v63  ;;  %v2960_v0 = vld [vmem:[#allocation3 + $0x80] sm:$0xf] }
 0x2ef   : > { %v3169_v44 = vshrl.u32 %v2958_v32, 16  ;;  %v3172_v18 = vshll.u32 %v2958_v32, 16  ;;  %2838 = vst [vmem:[#allocation3 + $0x9c] sm:$0x1] %v2837_v54  ;;  %v7774_v6 = vld [vmem:[%s9022_s3] ss:$0 sm:$0xff] }
 0x2f0   : > { %v2726_v22 = vadd.f32 %v7437_v31, %v2690_v49  ;;  %v2376_v37 = vadd.f32 %v7259_v39, %v2222_v61  ;;  %v3497_v14 = vpop.f32.mrf.mxu1 }
 0x2f1   : > { %5851 = vmatmul.msk.bf16.gmra.mxu0 %vm3435_vm13, %v7539_v56  ;;  %v3171_v35 = vrot.slane %v3169_v44, 7  ;;  %v3867_v36 = vrot.slane %v3172_v18, 5  ;;  %v3869_v2 = vrot.slane %v3169_v44, 4  ;;  %v2453_v50 = vpop.f32.mrf.mxu3 }
 0x2f2   : > { %v2758_v38 = vmax.f32 %v2726_v22, 0.0  ;;  %v2509_v24 = vadd.f32 %v2453_v50, %v7252_v5 }
 0x2f3   : > { %v3174_v59 = vor.u32 %v3172_v18, %v3171_v35  ;;  %v3868_v31 = vsel %vm6283_vm10, %v3866_v51, %v3867_v36  ;;  %v3870_v23 = vor.u32 %v3869_v2, %v3867_v36  ;;  %v3177_v51 = vshrl.u32 %v2960_v0, 16 }
 0x2f4   : > { %v2878_v29 = vpack.c.bf16 %v2758_v38, %v2758_v38  ;;  %v2655_v34 = vadd.f32 %v7691_v19, %v2509_v24  ;;  %v7763_v19 = vld [vmem:[%s9021_s2] ss:$0 sm:$0xff]  ;;  %v4005_v41 = vunpack.c.l.b16 %v3868_v31 }
 0x2f5   : > { %v3175_v16 = vsel %vm6253_vm7, %v3167_v8, %v3174_v59  ;;  %v2961_v5 = vld [vmem:[#allocation3 + $0x84] sm:$0xf]  ;;  %v3871_v55 = vrot.slane %v3870_v23, 4  ;;  %v2963_v8 = vld [vmem:[#allocation3 + $0x8c] sm:$0x1]  ;;  %v5726_v23 = vrot.slane %v3177_v51, 11 }
 0x2f6   : > { %v3592_v27 = vunpack.c.l.b16 %v3175_v16  ;;  %v7755_v13 = vpop.f32.mrf.mxu0  ;;  %2911 = vst.msk [vmem:[#allocation3 + $0x88] sm:$0xf] %vm2775_vm12, %v2878_v29  ;;  %v2691_v62 = vmul.f32 %v7763_v19, %v2655_v34  ;;  %v3182_v26 = vshrl.u32 %v2961_v5, 16  ;;  %v3185_v58 = vshll.u32 %v2961_v5, 16 }
 0x2f7   : > { %v3876_v32 = vsel %vm6283_vm10, %v3871_v55, %v3875_v57 }
 0x2f8   : > { %v7766_v52 = vpack.c.b16 %v3592_v27, %v3591_v1  ;;  %v2727_v63 = vadd.f32 %v7774_v6, %v2691_v62  ;;  %v4006_v49 = vunpack.c.l.b16 %v3876_v32  ;;  %v3877_v44 = vrot.slane %v3182_v26, 4  ;;  %v3685_v38 = vpop.f32.mrf.mxu2  ;;  %v2839_v27 = vld [vmem:[#allocation3 + $0xac] sm:$0x1] }
 0x2f9   : > { %v2455_v18 = vpop.f32.mrf.mxu3  ;;  %v3184_v42 = vrot.slane %v3182_v26, 7  ;;  %v3878_v22 = vrot.slane %v3185_v58, 5  ;;  %v7788_v29 = vadd.f32 %v3685_v38, %v3497_v14  ;;  %v3887_v1 = vshll.u32 %v2963_v8, 16  ;;  %v7799_v14 = vpop.f32.mrf.mxu1 }
 0x2fa   : > { %9228 = vst [vmem:[#allocation24_spill] sm:$0xff] %v7766_v52  ;;  %5822 = vmatmul.msk.bf16.gmra.mxu2 %vm3435_vm13, %v7766_v52  ;;  %v2759_v35 = vmax.f32 %v2727_v63, 0.0  ;;  %v2510_v39 = vadd.f32 %v2455_v18, %v2376_v37  ;;  %v7779_v36 = vpack.c.b16 %v4006_v49, %v4005_v41  ;;  %v2840_v32 = vsel %vm7415_vm15, 0, %v2839_v27 }
 0x2fb   : > { %v3879_v2 = vor.u32 %v3878_v22, %v3877_v44  ;;  %v3187_v57 = vor.u32 %v3185_v58, %v3184_v42  ;;  %v3189_v58 = vrot.slane %v3184_v42, 4  ;;  %2841 = vst [vmem:[#allocation3 + $0xac] sm:$0x1] %v2840_v32  ;;  %v3889_v51 = vrot.slane %v3887_v1, 5 }
 0x2fc   : > { %v2879_v50 = vpack.c.bf16 %v2759_v35, %v2759_v35  ;;  %v2656_v47 = vadd.f32 %v7717_v60, %v2510_v39 }
 0x2fd   : > { %v6006_v54 = vld [vmem:[#allocation3 + $0x84] sm:$0xff]  ;;  %v3880_v60 = vrot.slane %v3879_v2, 4  ;;  %v3188_v26 = vsel %vm6253_vm7, %v5726_v23, %v3187_v57 }
 0x2fe   : > { %v7782_v24 = vpop.f32.mrf.mxu0  ;;  %v2962_v59 = vld [vmem:[#allocation3 + $0x88] sm:$0xf]  ;;  %2912 = vst.msk [vmem:[#allocation3 + $0x94] sm:$0xf] %vm2775_vm12, %v2879_v50  ;;  %v2692_v31 = vmul.f32 %v7763_v19, %v2656_v47  ;;  %5833 = vmatmul.msk.bf16.gmra.mxu3 %vm3435_vm13, %v7510_v25  ;;  %5807 = vmatmul.msk.bf16.gmra.mxu1 %vm3435_vm13, %v6006_v54  ;;  %v3593_v35 = vunpack.c.l.b16 %v3188_v26  ;;  %v2224_v47 = vadd.f32 %v7254_v10, %v7257_v45  ;;  %v2964_v54 = vld [vmem:[#allocation3 + $0x90] sm:$0xf] }
 0x2ff   : > { %v3191_v34 = vshrl.u32 %v2962_v59, 16  ;;  %v3194_v16 = vshll.u32 %v2962_v59, 16  ;;  %v3199_v10 = vshrl.u32 %v2964_v54, 16 }
 0x300   : > { %v2728_v5 = vadd.f32 %v7774_v6, %v2692_v31  ;;  %v2378_v57 = vadd.f32 %v7273_v7, %v2224_v47 }
 0x301   : > { %5852 = vmatmul.msk.bf16.gmra.mxu0 %vm3435_vm13, %v7580_v30  ;;  %v3193_v55 = vrot.slane %v3191_v34, 7  ;;  %v3881_v61 = vrot.slane %v3194_v16, 5  ;;  %v3883_v62 = vrot.slane %v3191_v34, 4  ;;  %v2458_v0 = vpop.f32.mrf.mxu3 }
 0x302   : > { %v2760_v37 = vmax.f32 %v2728_v5, 0.0  ;;  %v2511_v63 = vadd.f32 %v2458_v0, %v7266_v33 }
 0x303   : > { %v3196_v49 = vor.u32 %v3194_v16, %v3193_v55  ;;  %v3882_v44 = vsel %vm6283_vm10, %v3880_v60, %v3881_v61  ;;  %v3884_v18 = vor.u32 %v3883_v62, %v3881_v61 }
 0x304   : > { %v2880_v41 = vpack.c.bf16 %v2760_v37, %v2760_v37  ;;  %v2657_v22 = vadd.f32 %v7732_v21, %v2511_v63  ;;  %v4007_v1 = vunpack.c.l.b16 %v3882_v44 }
 0x305   : > { %v3197_v42 = vsel %vm6253_vm7, %v3189_v58, %v3196_v49  ;;  %v2965_v33 = vld [vmem:[#allocation3 + $0x94] sm:$0xf]  ;;  %v3885_v50 = vrot.slane %v3884_v18, 4  ;;  %v2967_v58 = vld [vmem:[#allocation3 + $0x9c] sm:$0x1]  ;;  %v5727_v49 = vrot.slane %v3199_v10, 11  ;;  %v7842_v10 = vpop.f32.mrf.mxu2 }
 0x306   : > { %v3594_v39 = vunpack.c.l.b16 %v3197_v42  ;;  %v7806_v2 = vpop.f32.mrf.mxu0  ;;  %2913 = vst.msk [vmem:[#allocation3 + $0x98] sm:$0xf] %vm2775_vm12, %v2880_v41  ;;  %v2693_v8 = vmul.f32 %v7763_v19, %v2657_v22  ;;  %v3204_v38 = vshrl.u32 %v2965_v33, 16  ;;  %v3207_v59 = vshll.u32 %v2965_v33, 16  ;;  %v2842_v42 = vld [vmem:[#allocation3 + $0xbc] sm:$0x1] }
 0x307   : > { %v3890_v23 = vsel %vm6283_vm10, %v3885_v50, %v3889_v51  ;;  %v3901_v22 = vshll.u32 %v2967_v58, 16  ;;  %v9232_v58 = vld [vmem:[#allocation10_spill] sm:$0xff] }
 0x308   : > { %v7812_v21 = vpack.c.b16 %v3594_v39, %v3593_v35  ;;  %v2729_v31 = vadd.f32 %v7774_v6, %v2693_v8  ;;  %v4008_v34 = vunpack.c.l.b16 %v3890_v23  ;;  %v3891_v16 = vrot.slane %v3204_v38, 4 }
 0x309   : > { %v2460_v60 = vpop.f32.mrf.mxu3  ;;  %v3206_v45 = vrot.slane %v3204_v38, 7  ;;  %v3892_v27 = vrot.slane %v3207_v59, 5  ;;  %v2843_v38 = vsel %vm7415_vm15, 0, %v2842_v42 }
 0x30a   : > { %9229 = vst [vmem:[#allocation4_spill] sm:$0xff] %v7812_v21  ;;  %5823 = vmatmul.msk.bf16.gmra.mxu2 %vm3435_vm13, %v7812_v21  ;;  %v2761_v5 = vmax.f32 %v2729_v31, 0.0  ;;  %v2512_v55 = vadd.f32 %v2460_v60, %v2378_v57  ;;  %v7820_v61 = vpack.c.b16 %v4008_v34, %v4007_v1 }
 0x30b   : > { %v3893_v62 = vor.u32 %v3892_v27, %v3891_v16  ;;  %v7823_v26 = vpop.f32.mrf.mxu1  ;;  %v3209_v18 = vor.u32 %v3207_v59, %v3206_v45  ;;  %v3211_v54 = vrot.slane %v3206_v45, 4  ;;  %2844 = vst [vmem:[#allocation3 + $0xbc] sm:$0x1] %v2843_v38  ;;  %v3903_v16 = vrot.slane %v3901_v22, 5 }
 0x30c   : > { %9230 = vst [vmem:[#allocation27_spill] sm:$0xff] %v7820_v61  ;;  %v2881_v0 = vpack.c.bf16 %v2761_v5, %v2761_v5  ;;  %v2658_v7 = vadd.f32 %v7755_v13, %v2512_v55 }
 0x30d   : > { %v6007_v32 = vld [vmem:[#allocation3 + $0x94] sm:$0xff]  ;;  %v3894_v13 = vrot.slane %v3893_v62, 4  ;;  %v3210_v8 = vsel %vm6253_vm7, %v5727_v49, %v3209_v18  ;;  %v2968_v49 = vld [vmem:[#allocation3 + $0xa0] sm:$0xf] }
 0x30e   : > { %v7825_v37 = vpop.f32.mrf.mxu0  ;;  %v2966_v63 = vld [vmem:[#allocation3 + $0x98] sm:$0xf]  ;;  %2914 = vst.msk [vmem:[#allocation3 + $0xa4] sm:$0xf] %vm2775_vm12, %v2881_v0  ;;  %v2694_v44 = vmul.f32 %v7763_v19, %v2658_v7  ;;  %5834 = vmatmul.msk.bf16.gmra.mxu3 %vm3435_vm13, %v7547_v15  ;;  %5808 = vmatmul.msk.bf16.gmra.mxu1 %vm3435_vm13, %v6007_v32  ;;  %v3595_v5 = vunpack.c.l.b16 %v3210_v8 }
 0x30f   : > { %v3213_v51 = vshrl.u32 %v2966_v63, 16  ;;  %v3216_v41 = vshll.u32 %v2966_v63, 16  ;;  %v9231_v7 = vld [vmem:[#allocation31_spill] sm:$0xff] }
 0x310   : > { %v2730_v35 = vadd.f32 %v7774_v6, %v2694_v44  ;;  %v2226_v32 = vadd.f32 %v9232_v58, %v9231_v7 }
 0x311   : > { %5853 = vmatmul.msk.bf16.gmra.mxu0 %vm3435_vm13, %v7635_v46  ;;  %v3215_v39 = vrot.slane %v3213_v51, 7  ;;  %v3895_v33 = vrot.slane %v3216_v41, 5  ;;  %v3897_v50 = vrot.slane %v3213_v51, 4  ;;  %v2463_v47 = vpop.f32.mrf.mxu3 }
 0x312   : > { %v2762_v59 = vmax.f32 %v2730_v35, 0.0  ;;  %v2513_v23 = vadd.f32 %v2463_v47, %v7280_v12 }
 0x313   : > { %v3218_v57 = vor.u32 %v3216_v41, %v3215_v39  ;;  %v3896_v31 = vsel %vm6283_vm10, %v3894_v13, %v3895_v33  ;;  %v3898_v34 = vor.u32 %v3897_v50, %v3895_v33  ;;  %v7845_v27 = vpop.f32.mrf.mxu1  ;;  %v9234_v41 = vld [vmem:[#allocation33_spill] sm:$0xff]  ;;  %v3221_v33 = vshrl.u32 %v2968_v49, 16 }
 0x314   : > { %v2882_v60 = vpack.c.bf16 %v2762_v59, %v2762_v59  ;;  %v2659_v1 = vadd.f32 %v7782_v24, %v2513_v23  ;;  %v2380_v13 = vadd.f32 %v9234_v41, %v2226_v32  ;;  %v4009_v47 = vunpack.c.l.b16 %v3896_v31 }
 0x315   : > { %v3219_v45 = vsel %vm6253_vm7, %v3211_v54, %v3218_v57  ;;  %v2969_v62 = vld [vmem:[#allocation3 + $0xa4] sm:$0xf]  ;;  %v3899_v0 = vrot.slane %v3898_v34, 4 }
 0x316   : > { %v3596_v55 = vunpack.c.l.b16 %v3219_v45  ;;  %v7849_v12 = vpop.f32.mrf.mxu0  ;;  %2915 = vst.msk [vmem:[#allocation3 + $0xa8] sm:$0xf] %vm2775_vm12, %v2882_v60  ;;  %v2695_v63 = vmul.f32 %v7763_v19, %v2659_v1  ;;  %v3226_v24 = vshrl.u32 %v2969_v62, 16  ;;  %v3229_v18 = vshll.u32 %v2969_v62, 16  ;;  %v2971_v1 = vld [vmem:[#allocation3 + $0xac] sm:$0x1] }
 0x317   : > { %v3904_v51 = vsel %vm6283_vm10, %v3899_v0, %v3903_v16  ;;  %v5728_v62 = vrot.slane %v3221_v33, 11 }
 0x318   : > { %v7855_v44 = vpack.c.b16 %v3596_v55, %v3595_v5  ;;  %v2731_v22 = vadd.f32 %v7774_v6, %v2695_v63  ;;  %v4010_v42 = vunpack.c.l.b16 %v3904_v51  ;;  %v3905_v35 = vrot.slane %v3226_v24, 4  ;;  %v2845_v63 = vld [vmem:[#allocation3 + $0xcc] sm:$0x1] }
 0x319   : > { %v2465_v39 = vpop.f32.mrf.mxu3  ;;  %v3228_v50 = vrot.slane %v3226_v24, 7  ;;  %v3906_v8 = vrot.slane %v3229_v18, 5 }
 0x31a   : > { %9233 = vst [vmem:[#allocation8_spill] sm:$0xff] %v7855_v44  ;;  %5824 = vmatmul.msk.bf16.gmra.mxu2 %vm3435_vm13, %v7855_v44  ;;  %v2763_v54 = vmax.f32 %v2731_v22, 0.0  ;;  %v2514_v38 = vadd.f32 %v2465_v39, %v2380_v13  ;;  %v7863_v59 = vpack.c.b16 %v4010_v42, %v4009_v47  ;;  %v2846_v42 = vsel %vm7415_vm15, 0, %v2845_v63  ;;  %v9235_v39 = vld [vmem:[#allocation18_spill] sm:$0xff] }
 0x31b   : > { %v3907_v23 = vor.u32 %v3906_v8, %v3905_v35  ;;  %v7866_v60 = vpop.f32.mrf.mxu1  ;;  %v3231_v0 = vor.u32 %v3229_v18, %v3228_v50  ;;  %v3233_v22 = vrot.slane %v3228_v50, 4  ;;  %2847 = vst [vmem:[#allocation3 + $0xcc] sm:$0x1] %v2846_v42 }
 0x31c   : > { %v2883_v57 = vpack.c.bf16 %v2763_v54, %v2763_v54  ;;  %v2660_v34 = vadd.f32 %v7806_v2, %v2514_v38 }
 0x31d   : > { %v3690_v16 = vpop.f32.mrf.mxu2  ;;  %v6008_v5 = vld [vmem:[#allocation3 + $0xa4] sm:$0xff]  ;;  %v3908_v32 = vrot.slane %v3907_v23, 4  ;;  %v3232_v13 = vsel %vm6253_vm7, %v5728_v62, %v3231_v0 }
 0x31e   : > { %v7869_v45 = vadd.f32 %v3690_v16, %v7823_v26  ;;  %v7871_v55 = vpop.f32.mrf.mxu0  ;;  %v2970_v31 = vld [vmem:[#allocation3 + $0xa8] sm:$0xf]  ;;  %2916 = vst.msk [vmem:[#allocation3 + $0xb4] sm:$0xf] %vm2775_vm12, %v2883_v57  ;;  %v2696_v7 = vmul.f32 %v7763_v19, %v2660_v34  ;;  %5835 = vmatmul.msk.bf16.gmra.mxu3 %vm3435_vm13, %v7606_v20  ;;  %5809 = vmatmul.msk.bf16.gmra.mxu1 %vm3435_vm13, %v6008_v5  ;;  %v3915_v26 = vshll.u32 %v2971_v1, 16  ;;  %v3597_v5 = vunpack.c.l.b16 %v3232_v13 }
 0x31f   : > { %v3235_v2 = vshrl.u32 %v2970_v31, 16  ;;  %v3238_v58 = vshll.u32 %v2970_v31, 16 }
 0x320   : > { %v2732_v49 = vadd.f32 %v7774_v6, %v2696_v7  ;;  %v3917_v38 = vrot.slane %v3915_v26, 5  ;;  %v2972_v26 = vld [vmem:[#allocation3 + $0xb0] sm:$0xf] }
 0x321   : > { %5854 = vmatmul.msk.bf16.gmra.mxu0 %vm3435_vm13, %v7674_v40  ;;  %v3237_v24 = vrot.slane %v3235_v2, 7  ;;  %v3909_v18 = vrot.slane %v3238_v58, 5  ;;  %v3911_v51 = vrot.slane %v3235_v2, 4  ;;  %v2468_v41 = vpop.f32.mrf.mxu3  ;;  %v9236_v2 = vld [vmem:[#allocation32_spill] sm:$0xff] }
 0x322   : > { %v2764_v35 = vmax.f32 %v2732_v49, 0.0  ;;  %v2515_v33 = vadd.f32 %v2468_v41, %v9235_v39 }
 0x323   : > { %v3240_v47 = vor.u32 %v3238_v58, %v3237_v24  ;;  %v3910_v8 = vsel %vm6283_vm10, %v3908_v32, %v3909_v18  ;;  %v3912_v54 = vor.u32 %v3911_v51, %v3909_v18  ;;  %v7889_v16 = vpop.f32.mrf.mxu1  ;;  %v9237_v58 = vld [vmem:[#allocation17_spill] sm:$0xff]  ;;  %v9239_v18 = vld [vmem:[#allocation36_spill] sm:$0xff] }
 0x324   : > { %v2884_v23 = vpack.c.bf16 %v2764_v35, %v2764_v35  ;;  %v2661_v57 = vadd.f32 %v7825_v37, %v2515_v33  ;;  %v2228_v32 = vadd.f32 %v9237_v58, %v9236_v2  ;;  %v3243_v35 = vshrl.u32 %v2972_v26, 16 }
 0x325   : > { %v3692_v34 = vpop.f32.mrf.mxu2  ;;  %v3241_v50 = vsel %vm6253_vm7, %v3233_v22, %v3240_v47  ;;  %v2973_v0 = vld [vmem:[#allocation3 + $0xb4] sm:$0xf]  ;;  %v3913_v7 = vrot.slane %v3912_v54, 4  ;;  %v4011_v33 = vunpack.c.l.b16 %v3910_v8 }
 0x326   : > { %v7894_v1 = vadd.f32 %v3692_v34, %v7845_v27  ;;  %v3598_v31 = vunpack.c.l.b16 %v3241_v50  ;;  %v7896_v62 = vpop.f32.mrf.mxu0  ;;  %2917 = vst.msk [vmem:[#allocation3 + $0xb8] sm:$0xf] %vm2775_vm12, %v2884_v23  ;;  %v2697_v37 = vmul.f32 %v7763_v19, %v2661_v57  ;;  %v3248_v63 = vshrl.u32 %v2973_v0, 16 }
 0x327   : > { %v3251_v49 = vshll.u32 %v2973_v0, 16  ;;  %v3918_v27 = vsel %vm6283_vm10, %v3913_v7, %v3917_v38  ;;  %v2382_v51 = vadd.f32 %v9239_v18, %v2228_v32  ;;  %v2975_v0 = vld [vmem:[#allocation3 + $0xbc] sm:$0x1]  ;;  %v5729_v32 = vrot.slane %v3243_v35, 11 }
 0x328   : > { %v7902_v24 = vpack.c.b16 %v3598_v31, %v3597_v5  ;;  %v2733_v41 = vadd.f32 %v7774_v6, %v2697_v37  ;;  %v4012_v13 = vunpack.c.l.b16 %v3918_v27  ;;  %v3919_v22 = vrot.slane %v3248_v63, 4  ;;  %v2848_v18 = vld [vmem:[#allocation3 + $0xdc] sm:$0x1] }
 0x329   : > { %v2470_v42 = vpop.f32.mrf.mxu3  ;;  %v3250_v39 = vrot.slane %v3248_v63, 7  ;;  %v3920_v47 = vrot.slane %v3251_v49, 5 }
 0x32a   : > { %9238 = vst [vmem:[#allocation9_spill] sm:$0xff] %v7902_v24  ;;  %5825 = vmatmul.msk.bf16.gmra.mxu2 %vm3435_vm13, %v7902_v24  ;;  %v2765_v54 = vmax.f32 %v2733_v41, 0.0  ;;  %v2516_v23 = vadd.f32 %v2470_v42, %v2382_v51  ;;  %v7910_v57 = vpack.c.b16 %v4012_v13, %v4011_v33  ;;  %v2849_v33 = vsel %vm7415_vm15, 0, %v2848_v18 }
 0x32b   : > { %v3921_v34 = vor.u32 %v3920_v47, %v3919_v22  ;;  %v7913_v31 = vpop.f32.mrf.mxu1  ;;  %v3253_v37 = vor.u32 %v3251_v49, %v3250_v39  ;;  %v3255_v35 = vrot.slane %v3250_v39, 4  ;;  %2850 = vst [vmem:[#allocation3 + $0xdc] sm:$0x1] %v2849_v33 }
 0x32c   : > { %v2885_v38 = vpack.c.bf16 %v2765_v54, %v2765_v54  ;;  %v2662_v50 = vadd.f32 %v7849_v12, %v2516_v23  ;;  %v9240_v54 = vld [vmem:[#allocation37_spill] sm:$0xff] }
 0x32d   : > { %v3695_v5 = vpop.f32.mrf.mxu2  ;;  %v6009_v2 = vld [vmem:[#allocation3 + $0xb4] sm:$0xff]  ;;  %v3922_v27 = vrot.slane %v3921_v34, 4  ;;  %v3254_v42 = vsel %vm6253_vm7, %v5729_v32, %v3253_v37 }
 0x32e   : > { %v7916_v7 = vadd.f32 %v3695_v5, %v7866_v60  ;;  %v7918_v58 = vpop.f32.mrf.mxu0  ;;  %v2974_v8 = vld [vmem:[#allocation3 + $0xb8] sm:$0xf]  ;;  %2918 = vst.msk [vmem:[#allocation3 + $0xc4] sm:$0xf] %vm2775_vm12, %v2885_v38  ;;  %v2698_v26 = vmul.f32 %v7763_v19, %v2662_v50  ;;  %5836 = vmatmul.msk.bf16.gmra.mxu3 %vm3435_vm13, %v7643_v53  ;;  %5810 = vmatmul.msk.bf16.gmra.mxu1 %vm3435_vm13, %v6009_v2  ;;  %v3929_v60 = vshll.u32 %v2975_v0, 16  ;;  %v3599_v37 = vunpack.c.l.b16 %v3254_v42  ;;  %v9244_v42 = vld [vmem:[#allocation40_spill] sm:$0xff] }
 0x32f   : > { %v3257_v12 = vshrl.u32 %v2974_v8, 16  ;;  %v3260_v63 = vshll.u32 %v2974_v8, 16 }
 0x330   : > { %v2734_v51 = vadd.f32 %v7774_v6, %v2698_v26  ;;  %v3931_v5 = vrot.slane %v3929_v60, 5  ;;  %v9242_v60 = vld [vmem:[#allocation34_spill] sm:$0xff] }
 0x331   : > { %5855 = vmatmul.msk.bf16.gmra.mxu0 %vm3435_vm13, %v7721_v3  ;;  %v3259_v49 = vrot.slane %v3257_v12, 7  ;;  %v3923_v41 = vrot.slane %v3260_v63, 5  ;;  %v3925_v13 = vrot.slane %v3257_v12, 4  ;;  %v2473_v22 = vpop.f32.mrf.mxu3 }
 0x332   : > { %v2766_v47 = vmax.f32 %v2734_v51, 0.0  ;;  %v2517_v23 = vadd.f32 %v2473_v22, %v9240_v54  ;;  %v9241_v51 = vld [vmem:[#allocation35_spill] sm:$0xff] }
 0x333   : > { %v3262_v34 = vor.u32 %v3260_v63, %v3259_v49  ;;  %v3924_v38 = vsel %vm6283_vm10, %v3922_v27, %v3923_v41  ;;  %v3926_v50 = vor.u32 %v3925_v13, %v3923_v41  ;;  %v7936_v26 = vpop.f32.mrf.mxu1  ;;  %v2230_v49 = vadd.f32 %v9242_v60, %v9241_v51  ;;  %v2976_v41 = vld [vmem:[#allocation3 + $0xc0] sm:$0xf] }
 0x334   : > { %v2886_v0 = vpack.c.bf16 %v2766_v47, %v2766_v47  ;;  %v2663_v2 = vadd.f32 %v7871_v55, %v2517_v23 }
 0x335   : > { %v3697_v8 = vpop.f32.mrf.mxu2  ;;  %v3263_v39 = vsel %vm6253_vm7, %v3255_v35, %v3262_v34  ;;  %v2977_v27 = vld [vmem:[#allocation3 + $0xc4] sm:$0xf]  ;;  %v3927_v18 = vrot.slane %v3926_v50, 4  ;;  %v2384_v33 = vadd.f32 %v9244_v42, %v2230_v49  ;;  %v3265_v50 = vshrl.u32 %v2976_v41, 16  ;;  %v2979_v49 = vld [vmem:[#allocation3 + $0xcc] sm:$0x1] }
 0x336   : > { %v7941_v32 = vadd.f32 %v3697_v8, %v7889_v16  ;;  %v3600_v12 = vunpack.c.l.b16 %v3263_v39  ;;  %v7943_v63 = vpop.f32.mrf.mxu0  ;;  %2919 = vst.msk [vmem:[#allocation3 + $0xc8] sm:$0xf] %vm2775_vm12, %v2886_v0  ;;  %v2699_v55 = vmul.f32 %v7763_v19, %v2663_v2  ;;  %v3270_v13 = vshrl.u32 %v2977_v27, 16 }
 0x337   : > { %v3273_v22 = vshll.u32 %v2977_v27, 16  ;;  %v3932_v16 = vsel %vm6283_vm10, %v3927_v18, %v3931_v5  ;;  %v4013_v2 = vunpack.c.l.b16 %v3924_v38 }
 0x338   : > { %v7949_v35 = vpack.c.b16 %v3600_v12, %v3599_v37  ;;  %v2735_v47 = vadd.f32 %v7774_v6, %v2699_v55  ;;  %v4014_v54 = vunpack.c.l.b16 %v3932_v16  ;;  %v3933_v23 = vrot.slane %v3270_v13, 4 }
 0x339   : > { %v2475_v34 = vpop.f32.mrf.mxu3  ;;  %v3272_v0 = vrot.slane %v3270_v13, 7  ;;  %v3934_v8 = vrot.slane %v3273_v22, 5  ;;  %v5730_v13 = vrot.slane %v3265_v50, 11 }
 0x33a   : > { %9243 = vst [vmem:[#allocation26_spill] sm:$0xff] %v7949_v35  ;;  %5826 = vmatmul.msk.bf16.gmra.mxu2 %vm3435_vm13, %v7949_v35  ;;  %v2767_v39 = vmax.f32 %v2735_v47, 0.0  ;;  %v2518_v37 = vadd.f32 %v2475_v34, %v2384_v33  ;;  %v7957_v12 = vpack.c.b16 %v4014_v54, %v4013_v2 }
 0x33b   : > { %v3935_v27 = vor.u32 %v3934_v8, %v3933_v23  ;;  %v7960_v60 = vpop.f32.mrf.mxu1  ;;  %v3275_v42 = vor.u32 %v3273_v22, %v3272_v0  ;;  %v2851_v23 = vld [vmem:[#allocation3 + $0xec] sm:$0x1] }
 0x33c   : > { %v2887_v5 = vpack.c.bf16 %v2767_v39, %v2767_v39  ;;  %v2664_v18 = vadd.f32 %v7896_v62, %v2518_v37  ;;  %v3277_v37 = vrot.slane %v3272_v0, 4 }
 0x33d   : > { %v3700_v51 = vpop.f32.mrf.mxu2  ;;  %v6010_v16 = vld [vmem:[#allocation3 + $0xc4] sm:$0xff]  ;;  %v3936_v54 = vrot.slane %v3935_v27, 4  ;;  %v3276_v39 = vsel %vm6253_vm7, %v5730_v13, %v3275_v42  ;;  %v9245_v27 = vld [vmem:[#allocation19_spill] sm:$0xff] }
 0x33e   : > { %v7963_v55 = vadd.f32 %v3700_v51, %v7913_v31  ;;  %v7965_v41 = vpop.f32.mrf.mxu0  ;;  %v2978_v38 = vld [vmem:[#allocation3 + $0xc8] sm:$0xf]  ;;  %2920 = vst.msk [vmem:[#allocation3 + $0xd4] sm:$0xf] %vm2775_vm12, %v2887_v5  ;;  %v2700_v33 = vmul.f32 %v7763_v19, %v2664_v18  ;;  %5837 = vmatmul.msk.bf16.gmra.mxu3 %vm3435_vm13, %v7688_v48  ;;  %5811 = vmatmul.msk.bf16.gmra.mxu1 %vm3435_vm13, %v6010_v16  ;;  %v3943_v31 = vshll.u32 %v2979_v49, 16  ;;  %v2852_v5 = vsel %vm7415_vm15, 0, %v2851_v23 }
 0x33f   : > { %v3279_v62 = vshrl.u32 %v2978_v38, 16  ;;  %v3282_v47 = vshll.u32 %v2978_v38, 16  ;;  %2853 = vst [vmem:[#allocation3 + $0xec] sm:$0x1] %v2852_v5  ;;  %v3601_v42 = vunpack.c.l.b16 %v3276_v39 }
 0x340   : > { %v2736_v34 = vadd.f32 %v7774_v6, %v2700_v33  ;;  %v3945_v33 = vrot.slane %v3943_v31, 5  ;;  %v9247_v31 = vld [vmem:[#allocation38_spill] sm:$0xff] }
 0x341   : > { %5856 = vmatmul.msk.bf16.gmra.mxu0 %vm3435_vm13, %v7766_v52  ;;  %v3281_v22 = vrot.slane %v3279_v62, 7  ;;  %v3937_v50 = vrot.slane %v3282_v47, 5  ;;  %v3939_v2 = vrot.slane %v3279_v62, 4  ;;  %v2478_v8 = vpop.f32.mrf.mxu3 }
 0x342   : > { %v2768_v18 = vmax.f32 %v2736_v34, 0.0  ;;  %v2519_v51 = vadd.f32 %v2478_v8, %v9245_v27 }
 0x343   : > { %v3284_v49 = vor.u32 %v3282_v47, %v3281_v22  ;;  %v3938_v16 = vsel %vm6283_vm10, %v3936_v54, %v3937_v50  ;;  %v3940_v38 = vor.u32 %v3939_v2, %v3937_v50  ;;  %v7983_v40 = vpop.f32.mrf.mxu1  ;;  %v9246_v22 = vld [vmem:[#allocation39_spill] sm:$0xff]  ;;  %v2980_v2 = vld [vmem:[#allocation3 + $0xd0] sm:$0xf] }
 0x344   : > { %v2888_v52 = vpack.c.bf16 %v2768_v18, %v2768_v18  ;;  %v2665_v62 = vadd.f32 %v7918_v58, %v2519_v51  ;;  %v2232_v50 = vadd.f32 %v9247_v31, %v9246_v22 }
 0x345   : > { %v3702_v3 = vpop.f32.mrf.mxu2  ;;  %v3285_v0 = vsel %vm6253_vm7, %v3277_v37, %v3284_v49  ;;  %v2981_v54 = vld [vmem:[#allocation3 + $0xd4] sm:$0xf]  ;;  %v3941_v34 = vrot.slane %v3940_v38, 4 }
 0x346   : > { %v7988_v13 = vadd.f32 %v3702_v3, %v7936_v26  ;;  %v3602_v47 = vunpack.c.l.b16 %v3285_v0  ;;  %v7990_v23 = vpop.f32.mrf.mxu0  ;;  %2921 = vst.msk [vmem:[#allocation3 + $0xd8] sm:$0xf] %vm2775_vm12, %v2888_v52  ;;  %v2701_v58 = vmul.f32 %v7763_v19, %v2665_v62  ;;  %v3292_v8 = vshrl.u32 %v2981_v54, 16  ;;  %v9249_v26 = vld [vmem:[#allocation42_spill] sm:$0xff] }
 0x347   : > { %v3295_v5 = vshll.u32 %v2981_v54, 16  ;;  %v3946_v3 = vsel %vm6283_vm10, %v3941_v34, %v3945_v33  ;;  %v2386_v39 = vadd.f32 %v9249_v26, %v2232_v50  ;;  %v3287_v52 = vshrl.u32 %v2980_v2, 16 }
 0x348   : > { %v7996_v37 = vpack.c.b16 %v3602_v47, %v3601_v42  ;;  %v2737_v18 = vadd.f32 %v7774_v6, %v2701_v58  ;;  %v4016_v27 = vunpack.c.l.b16 %v3946_v3  ;;  %v3947_v51 = vrot.slane %v3292_v8, 4  ;;  %v2983_v58 = vld [vmem:[#allocation3 + $0xdc] sm:$0x1] }
 0x349   : > { %v2480_v49 = vpop.f32.mrf.mxu3  ;;  %v3294_v38 = vrot.slane %v3292_v8, 7  ;;  %v4015_v62 = vunpack.c.l.b16 %v3938_v16  ;;  %v3948_v0 = vrot.slane %v3295_v5, 5  ;;  %v5731_v8 = vrot.slane %v3287_v52, 11 }
 0x34a   : > { %9248 = vst [vmem:[#allocation25_spill] sm:$0xff] %v7996_v37  ;;  %5827 = vmatmul.msk.bf16.gmra.mxu2 %vm3435_vm13, %v7996_v37  ;;  %v2769_v54 = vmax.f32 %v2737_v18, 0.0  ;;  %v2520_v42 = vadd.f32 %v2480_v49, %v2386_v39  ;;  %v2854_v49 = vld [vmem:[#allocation3 + $0xfc] sm:$0x1] }
 0x34b   : > { %v8004_v47 = vpack.c.b16 %v4016_v27, %v4015_v62  ;;  %v3949_v22 = vor.u32 %v3948_v0, %v3947_v51  ;;  %v8007_v50 = vpop.f32.mrf.mxu1  ;;  %v3297_v39 = vor.u32 %v3295_v5, %v3294_v38  ;;  %v3957_v51 = vshll.u32 %v2983_v58, 16 }
 0x34c   : > { %v2889_v33 = vpack.c.bf16 %v2769_v54, %v2769_v54  ;;  %v2666_v34 = vadd.f32 %v7943_v63, %v2520_v42 }
 0x34d   : > { %v3705_v31 = vpop.f32.mrf.mxu2  ;;  %v8012_v26 = vld [vmem:[#allocation3 + $0xd4] sm:$0xff]  ;;  %v3298_v42 = vsel %vm6253_vm7, %v5731_v8, %v3297_v39 }
 0x34e   : > { %v8010_v3 = vadd.f32 %v3705_v31, %v7960_v60  ;;  %9250 = vst [vmem:[#allocation30_spill] sm:$0xff] %v8012_v26  ;;  %v8014_v2 = vpop.f32.mrf.mxu0  ;;  %v2982_v16 = vld [vmem:[#allocation3 + $0xd8] sm:$0xf]  ;;  %v2702_v18 = vmul.f32 %v7763_v19, %v2666_v34  ;;  %5838 = vmatmul.msk.bf16.gmra.mxu3 %vm3435_vm13, %v7729_v17  ;;  %5812 = vmatmul.msk.bf16.gmra.mxu1 %vm3435_vm13, %v8012_v26  ;;  %v3950_v60 = vrot.slane %v3949_v22, 4  ;;  %v2855_v34 = vsel %vm7415_vm15, 0, %v2854_v49  ;;  %v9251_v22 = vld [vmem:[#allocation21_spill] sm:$0xff] }
 0x34f   : > { %2922 = vst.msk [vmem:[#allocation3 + $0xe4] sm:$0xf] %vm2775_vm12, %v2889_v33  ;;  %v3301_v63 = vshrl.u32 %v2982_v16, 16  ;;  %v3304_v27 = vshll.u32 %v2982_v16, 16  ;;  %v3299_v33 = vrot.slane %v3294_v38, 4  ;;  %v3959_v26 = vrot.slane %v3957_v51, 5 }
 0x350   : > { %v2738_v62 = vadd.f32 %v7774_v6, %v2702_v18  ;;  %2856 = vst [vmem:[#allocation3 + $0xfc] sm:$0x1] %v2855_v34  ;;  %v3603_v39 = vunpack.c.l.b16 %v3298_v42  ;;  %v9253_v51 = vld [vmem:[#allocation41_spill] sm:$0xff] }
 0x351   : > { %5857 = vmatmul.msk.bf16.gmra.mxu0 %vm3435_vm13, %v7812_v21  ;;  %v3303_v5 = vrot.slane %v3301_v63, 7  ;;  %v3951_v52 = vrot.slane %v3304_v27, 5  ;;  %v3953_v0 = vrot.slane %v3301_v63, 4  ;;  %v2483_v54 = vpop.f32.mrf.mxu3 }
 0x352   : > { %v2770_v31 = vmax.f32 %v2738_v62, 0.0  ;;  %v2521_v58 = vadd.f32 %v2483_v54, %v9251_v22 }
 0x353   : > { %v3306_v16 = vor.u32 %v3304_v27, %v3303_v5  ;;  %v3952_v18 = vsel %vm6283_vm10, %v3950_v60, %v3951_v52  ;;  %v3954_v21 = vor.u32 %v3953_v0, %v3951_v52  ;;  %v8033_v56 = vpop.f32.mrf.mxu1  ;;  %v9252_v5 = vld [vmem:[#allocation20_spill] sm:$0xff] }
 0x354   : > { %v2890_v46 = vpack.c.bf16 %v2770_v31, %v2770_v31  ;;  %v2667_v63 = vadd.f32 %v7965_v41, %v2521_v58  ;;  %v2234_v52 = vadd.f32 %v9253_v51, %v9252_v5  ;;  %v2984_v0 = vld [vmem:[#allocation3 + $0xe0] sm:$0xf] }
 0x355   : > { %v3707_v30 = vpop.f32.mrf.mxu2  ;;  %v3307_v38 = vsel %vm6253_vm7, %v3299_v33, %v3306_v16  ;;  %v3955_v62 = vrot.slane %v3954_v21, 4 }
 0x356   : > { %v8038_v8 = vadd.f32 %v3707_v30, %v7983_v40  ;;  %v3604_v27 = vunpack.c.l.b16 %v3307_v38  ;;  %v8040_v49 = vpop.f32.mrf.mxu0  ;;  %v2985_v60 = vld [vmem:[#allocation3 + $0xe4] sm:$0xf]  ;;  %2923 = vst.msk [vmem:[#allocation3 + $0xe8] sm:$0xf] %vm2775_vm12, %v2890_v46  ;;  %v2703_v41 = vmul.f32 %v7763_v19, %v2667_v63  ;;  %v9255_v40 = vld [vmem:[#allocation43_spill] sm:$0xff]  ;;  %v3309_v46 = vshrl.u32 %v2984_v0, 16 }
 0x357   : > { %v3314_v54 = vshrl.u32 %v2985_v60, 16  ;;  %v3317_v34 = vshll.u32 %v2985_v60, 16  ;;  %v3960_v30 = vsel %vm6283_vm10, %v3955_v62, %v3959_v26  ;;  %v2388_v42 = vadd.f32 %v9255_v40, %v2234_v52 }
 0x358   : > { %v8046_v33 = vpack.c.b16 %v3604_v27, %v3603_v39  ;;  %v2739_v31 = vadd.f32 %v7774_v6, %v2703_v41  ;;  %v4018_v21 = vunpack.c.l.b16 %v3960_v30  ;;  %v4017_v63 = vunpack.c.l.b16 %v3952_v18  ;;  %v2987_v41 = vld [vmem:[#allocation3 + $0xec] sm:$0x1] }
 0x359   : > { %v3961_v22 = vrot.slane %v3314_v54, 4  ;;  %v2485_v58 = vpop.f32.mrf.mxu3  ;;  %v3316_v16 = vrot.slane %v3314_v54, 7  ;;  %v3962_v38 = vrot.slane %v3317_v34, 5  ;;  %v5732_v54 = vrot.slane %v3309_v46, 11 }
 0x35a   : > { %9254 = vst [vmem:[#allocation29_spill] sm:$0xff] %v8046_v33  ;;  %5828 = vmatmul.msk.bf16.gmra.mxu2 %vm3435_vm13, %v8046_v33  ;;  %v2771_v60 = vmax.f32 %v2739_v31, 0.0  ;;  %v2522_v39 = vadd.f32 %v2485_v58, %v2388_v42  ;;  %v8054_v27 = vpack.c.b16 %v4018_v21, %v4017_v63  ;;  %v2857_v58 = vld [vmem:[#allocation3 + $0x10c] sm:$0x1] }
 0x35b   : > { %v3963_v5 = vor.u32 %v3962_v38, %v3961_v22  ;;  %v8057_v52 = vpop.f32.mrf.mxu1  ;;  %v3319_v42 = vor.u32 %v3317_v34, %v3316_v16  ;;  %v3971_v22 = vshll.u32 %v2987_v41, 16 }
 0x35c   : > { %v2891_v26 = vpack.c.bf16 %v2771_v60, %v2771_v60  ;;  %v2668_v62 = vadd.f32 %v7990_v23, %v2522_v39 }
 0x35d   : > { %v3710_v51 = vpop.f32.mrf.mxu2  ;;  %v8062_v40 = vld [vmem:[#allocation3 + $0xe4] sm:$0xff]  ;;  %v3320_v39 = vsel %vm6253_vm7, %v5732_v54, %v3319_v42  ;;  %v3973_v54 = vrot.slane %v3971_v22, 5  ;;  %v9258_v22 = vld [vmem:[#allocation22_spill] sm:$0xff] }
 0x35e   : > { %v8060_v30 = vadd.f32 %v3710_v51, %v8007_v50  ;;  %9256 = vst [vmem:[#allocation28_spill] sm:$0xff] %v8062_v40  ;;  %v8064_v0 = vpop.f32.mrf.mxu0  ;;  %v2986_v18 = vld [vmem:[#allocation3 + $0xe8] sm:$0xf]  ;;  %v2704_v31 = vmul.f32 %v7763_v19, %v2668_v62  ;;  %5839 = vmatmul.msk.bf16.gmra.mxu3 %vm3435_vm13, %v7779_v36  ;;  %5813 = vmatmul.msk.bf16.gmra.mxu1 %vm3435_vm13, %v8062_v40  ;;  %v3964_v50 = vrot.slane %v3963_v5, 4  ;;  %v2858_v62 = vsel %vm7415_vm15, 0, %v2857_v58 }
 0x35f   : > { %2924 = vst.msk [vmem:[#allocation3 + $0xf4] sm:$0xf] %vm2775_vm12, %v2891_v26  ;;  %v3323_v23 = vshrl.u32 %v2986_v18, 16  ;;  %v3326_v21 = vshll.u32 %v2986_v18, 16  ;;  %v3321_v26 = vrot.slane %v3316_v16, 4  ;;  %v9257_v5 = vld [vmem:[#allocation45_spill] sm:$0xff] }
 0x360   : > { %v2740_v63 = vadd.f32 %v7774_v6, %v2704_v31  ;;  %v5905_v31 = vld [vmem:[%s9023_s4 + $0x18] sm:$0xf]  ;;  %2859 = vst [vmem:[#allocation3 + $0x10c] sm:$0x1] %v2858_v62 }
 0x361   : > { %5858 = vmatmul.msk.bf16.gmra.mxu0 %vm3435_vm13, %v7855_v44  ;;  %v3325_v34 = vrot.slane %v3323_v23, 7  ;;  %v3965_v46 = vrot.slane %v3326_v21, 5  ;;  %v3967_v38 = vrot.slane %v3323_v23, 4  ;;  %v2488_v60 = vpop.f32.mrf.mxu3  ;;  %v4676_v23 = vsel %vm3484_vm11, %v5905_v31, 0 }
 0x362   : > { %v2772_v51 = vmax.f32 %v2740_v63, 0.0  ;;  %v2523_v41 = vadd.f32 %v2488_v60, %v9257_v5  ;;  %4685 = vmatpush.bf16.msra.mxu3 %v4676_v23  ;;  %v3605_v60 = vunpack.c.l.b16 %v3320_v39 }
 0x363   : > { %v3328_v18 = vor.u32 %v3326_v21, %v3325_v34  ;;  %v3966_v44 = vsel %vm6283_vm10, %v3964_v50, %v3965_v46  ;;  %v3968_v40 = vor.u32 %v3967_v38, %v3965_v46  ;;  %v8087_v63 = vpop.f32.mrf.mxu1  ;;  %v2236_v38 = vadd.f32 %v7738_v11, %v9258_v22 }
 0x364   : > { %v2892_v16 = vpack.c.bf16 %v2772_v51, %v2772_v51  ;;  %v2669_v42 = vadd.f32 %v8014_v2, %v2523_v41  ;;  %v2988_v51 = vld [vmem:[#allocation3 + $0xf0] sm:$0xf] }
 0x365   : > { %v3712_v58 = vpop.f32.mrf.mxu2  ;;  %v3329_v21 = vsel %vm6253_vm7, %v3321_v26, %v3328_v18  ;;  %v3969_v46 = vrot.slane %v3968_v40, 4  ;;  %v2390_v39 = vadd.f32 %v7753_v4, %v2236_v38  ;;  %v3331_v11 = vshrl.u32 %v2988_v51, 16  ;;  %v5922_v4 = vld [vmem:[%s9023_s4 + $0x1c] sm:$0xf] }
 0x366   : > { %v8092_v34 = vadd.f32 %v3712_v58, %v8033_v56  ;;  %v3606_v50 = vunpack.c.l.b16 %v3329_v21  ;;  %v8094_v62 = vpop.f32.mrf.mxu0  ;;  %v2989_v5 = vld [vmem:[#allocation3 + $0xf4] sm:$0xf]  ;;  %2925 = vst.msk [vmem:[#allocation3 + $0xf8] sm:$0xf] %vm2775_vm12, %v2892_v16  ;;  %v2705_v2 = vmul.f32 %v7763_v19, %v2669_v42  ;;  %v4019_v16 = vunpack.c.l.b16 %v3966_v44  ;;  %v2991_v51 = vld [vmem:[#allocation3 + $0xfc] sm:$0x1] }
 0x367   : > { %v3336_v41 = vshrl.u32 %v2989_v5, 16  ;;  %v3339_v26 = vshll.u32 %v2989_v5, 16  ;;  %v3974_v56 = vsel %vm6283_vm10, %v3969_v46, %v3973_v54  ;;  %v5151_v54 = vld [vmem:[%s9026_s7] sm:$0x3] }
 0x368   : > { %v8100_v18 = vpack.c.b16 %v3606_v50, %v3605_v60  ;;  %v2741_v31 = vadd.f32 %v7774_v6, %v2705_v2  ;;  %v4020_v40 = vunpack.c.l.b16 %v3974_v56  ;;  %v5153_v6 = vsel %vm1073_vm0, %v5151_v54, 0 }
 0x369   : > { %v3975_v23 = vrot.slane %v3336_v41, 4  ;;  %v2490_v58 = vpop.f32.mrf.mxu3  ;;  %v3338_v19 = vrot.slane %v3336_v41, 7  ;;  %v3976_v42 = vrot.slane %v3339_v26, 5  ;;  %v4810_v50 = vsel %vm3484_vm11, %v5922_v4, 0  ;;  %5162 = vmatpush.bf16.msra.mxu2 %v5153_v6 }
 0x36a   : > { %9259 = vst [vmem:[#allocation31_spill] sm:$0xff] %v8100_v18  ;;  %5829 = vmatmul.msk.bf16.gmra.mxu2 %vm3435_vm13, %v8100_v18  ;;  %v2773_v21 = vmax.f32 %v2741_v31, 0.0  ;;  %v2524_v60 = vadd.f32 %v2490_v58, %v2390_v39  ;;  %v8116_v5 = vpack.c.b16 %v4020_v40, %v4019_v16  ;;  %4819 = vmatpush.bf16.msra.mxu0 %v4810_v50  ;;  %v5733_v40 = vrot.slane %v3331_v11, 11 }
 0x36b   : > { %v3977_v46 = vor.u32 %v3976_v42, %v3975_v23  ;;  %v8119_v2 = vpop.f32.mrf.mxu1  ;;  %v3341_v58 = vor.u32 %v3339_v26, %v3338_v19  ;;  %v6053_v23 = vld [vmem:[%s9021_s2] ss:$0 sm:$0xff]  ;;  %v3985_v11 = vshll.u32 %v2991_v51, 16 }
 0x36c   : > { %v2893_v22 = vpack.c.bf16 %v2773_v21, %v2773_v21  ;;  %v2670_v44 = vadd.f32 %v8040_v49, %v2524_v60  ;;  %v5943_v49 = vld [vmem:[%s9023_s4 + $0x20] sm:$0xf] }
 0x36d   : > { %v3715_v38 = vpop.f32.mrf.mxu2  ;;  %v8124_v56 = vld [vmem:[#allocation3 + $0xf4] sm:$0xff]  ;;  %v4956_v21 = vsel %vm3484_vm11, %v5943_v49, 0  ;;  %v3978_v26 = vrot.slane %v3977_v46, 4  ;;  %v6054_v60 = vld [vmem:[%s9022_s3] ss:$0 sm:$0xff] }
 0x36e   : > { %v8122_v41 = vadd.f32 %v3715_v38, %v8057_v52  ;;  %9260 = vst [vmem:[#allocation10_spill] sm:$0xff] %v8124_v56  ;;  %v8126_v39 = vpop.f32.mrf.mxu0  ;;  %v2990_v31 = vld [vmem:[#allocation3 + $0xf8] sm:$0xf]  ;;  %v2706_v16 = vmul.f32 %v6053_v23, %v2670_v44  ;;  %5840 = vmatmul.msk.bf16.gmra.mxu3 %vm3435_vm13, %v7820_v61  ;;  %5814 = vmatmul.msk.bf16.gmra.mxu1 %vm3435_vm13, %v8124_v56  ;;  %v3343_v38 = vrot.slane %v3338_v19, 4 }
 0x36f   : > { %2926 = vst.msk [vmem:[#allocation3 + $0x104] sm:$0xf] %vm2775_vm12, %v2893_v22  ;;  %v3345_v52 = vshrl.u32 %v2990_v31, 16  ;;  %v3348_v42 = vshll.u32 %v2990_v31, 16  ;;  %4965 = vmatpush.bf16.msra.mxu1 %v4956_v21  ;;  %v3342_v44 = vsel %vm6253_vm7, %v5733_v40, %v3341_v58 }
 0x370   : > { %v2742_v54 = vadd.f32 %v6054_v60, %v2706_v16  ;;  %v3987_v16 = vrot.slane %v3985_v11, 5  ;;  %v3607_v40 = vunpack.c.l.b16 %v3342_v44 }
 0x371   : > { %5859 = vmatmul.msk.bf16.gmra.mxu0 %vm3435_vm13, %v7902_v24  ;;  %v3347_v4 = vrot.slane %v3345_v52, 7  ;;  %v3979_v6 = vrot.slane %v3348_v42, 5  ;;  %v3981_v50 = vrot.slane %v3345_v52, 4  ;;  %v4099_v22 = vpop.f32.mrf.mxu3 }
 0x372   : > { %v2774_v31 = vmax.f32 %v2742_v54, 0.0  ;;  %v4179_v46 = vadd.f32 %v4099_v22, %v7788_v29 }
 0x373   : > { %v3350_v51 = vor.u32 %v3348_v42, %v3347_v4  ;;  %v3980_v49 = vsel %vm6283_vm10, %v3978_v26, %v3979_v6  ;;  %v3982_v23 = vor.u32 %v3981_v50, %v3979_v6  ;;  %v3534_v24 = vpop.f32.mrf.mxu1  ;;  %v3688_v4 = vadd.f32 %v7842_v10, %v7799_v14  ;;  %v2995_v14 = vld [vmem:[#allocation3 + $0x10c] sm:$0x1] }
 0x374   : > { %v2894_v60 = vpack.c.bf16 %v2774_v31, %v2774_v31  ;;  %v8153_v21 = vadd.f32 %v8064_v0, %v4179_v46 }
 0x375   : > { %v3717_v43 = vpop.f32.mrf.mxu2  ;;  %v3351_v52 = vsel %vm6253_vm7, %v3343_v38, %v3350_v51  ;;  %v3983_v26 = vrot.slane %v3982_v23, 4 }
 0x376   : > { %v8156_v19 = vadd.f32 %v3717_v43, %v8087_v63  ;;  %v3608_v29 = vunpack.c.l.b16 %v3351_v52  ;;  %v4260_v58 = vpop.f32.mrf.mxu0  ;;  %v8158_v42 = vld [vmem:[#allocation3 + $0x104] sm:$0xf]  ;;  %2927 = vst.msk [vmem:[#allocation3 + $0x108] sm:$0xf] %vm2775_vm12, %v2894_v60  ;;  %v4021_v63 = vunpack.c.l.b16 %v3980_v49 }
 0x377   : > { %v9084_v11 = vshrl.u32 %v8158_v42, 16  ;;  %v9082_v54 = vshll.u32 %v8158_v42, 16  ;;  %v3988_v43 = vsel %vm6283_vm10, %v3983_v26, %v3987_v16  ;;  %v6055_v26 = vld [vmem:[#allocation3 + $0x14] sm:$0xff] }
 0x378   : > { %v8165_v0 = vpack.c.b16 %v3608_v29, %v3607_v40  ;;  %v4022_v6 = vunpack.c.l.b16 %v3988_v43  ;;  %v4509_v29 = vshll.u32 %v2995_v14, 16 }
 0x379   : > { %v4499_v50 = vrot.slane %v9084_v11, 4  ;;  %v4500_v22 = vrot.slane %v9082_v54, 5  ;;  %v4101_v44 = vpop.f32.mrf.mxu3 }
 0x37a   : > { %9261 = vst [vmem:[#allocation33_spill] sm:$0xff] %v8165_v0  ;;  %5830 = vmatmul.msk.bf16.gmra.mxu2 %vm3435_vm13, %v8165_v0  ;;  %v4180_v38 = vadd.f32 %v4101_v44, %v3688_v4  ;;  %v8175_v31 = vpack.c.b16 %v4022_v6, %v4021_v63 }
 0x37b   : > { %v4501_v10 = vor.u32 %v4500_v22, %v4499_v50  ;;  %v3537_v51 = vpop.f32.mrf.mxu1  ;;  %v4511_v22 = vrot.slane %v4509_v29, 5 }
 0x37c   : > { %v8178_v49 = vadd.f32 %v8094_v62, %v4180_v38 }
 0x37d   : > { %v3720_v46 = vpop.f32.mrf.mxu2  ;;  %v8183_v60 = vld [vmem:[#allocation3 + $0x108] sm:$0xf]  ;;  %v4502_v62 = vrot.slane %v4501_v10, 4 }
 0x37e   : > { %v8181_v23 = vadd.f32 %v3720_v46, %v8119_v2  ;;  %v4263_v16 = vpop.f32.mrf.mxu0  ;;  %5841 = vmatmul.msk.bf16.gmra.mxu3 %vm3435_vm13, %v7863_v59  ;;  %v9085_v52 = vshrl.u32 %v8183_v60, 16  ;;  %v9083_v40 = vshll.u32 %v8183_v60, 16  ;;  %5871 = vmatmul.msk.bf16.vlgmr.msrb.gmra.mxu1 %vm3435_vm13, %v6055_v26 }
 0x380   : > { %v4503_v2 = vrot.slane %v9083_v40, 5  ;;  %v4505_v4 = vrot.slane %v9085_v52, 4 }
 0x381   : > { %5860 = vmatmul.msk.bf16.gmra.mxu0 %vm3435_vm13, %v7949_v35  ;;  %v4104_v43 = vpop.f32.mrf.mxu3 }
 0x382   : > { %v4181_v63 = vadd.f32 %v4104_v43, %v7869_v45  ;;  %v4504_v6 = vsel %vm6283_vm10, %v4502_v62, %v4503_v2  ;;  %v4506_v50 = vor.u32 %v4505_v4, %v4503_v2 }
 0x383   : > { %v3539_v38 = vpop.f32.mrf.mxu1  ;;  %v4515_v40 = vunpack.c.l.b16 %v4504_v6 }
 0x384   : > { %v8200_v14 = vadd.f32 %v8126_v39, %v4181_v63  ;;  %v4507_v10 = vrot.slane %v4506_v50, 4  ;;  %v8217_v63 = vld [vmem:[#allocation3 + $0x24] sm:$0xff] }
 0x385   : > { %v3722_v44 = vpop.f32.mrf.mxu2 }
 0x386   : > { %v8202_v46 = vadd.f32 %v3722_v44, %v3534_v24  ;;  %v4265_v26 = vpop.f32.mrf.mxu0  ;;  %v4512_v54 = vsel %vm6283_vm10, %v4507_v10, %v4511_v22 }
 0x387   : > { %v4516_v11 = vunpack.c.l.b16 %v4512_v54 }
 0x389   : > { %v4106_v45 = vpop.f32.mrf.mxu3  ;;  %v8208_v62 = vpack.c.b16 %v4516_v11, %v4515_v40 }
 0x38a   : > { %5888 = vmatmul.msk.bf16.vlgmr.msrb.gmra.mxu2 %vm3435_vm13, %v7510_v25  ;;  %v4182_v29 = vadd.f32 %v4106_v45, %v7894_v1 }
 0x38b   : > { %9262 = vst [vmem:[#allocation18_spill] sm:$0xff] %v8208_v62  ;;  %v3542_v39 = vpop.f32.mrf.mxu1 }
 0x38c   : > { %v8211_v4 = vadd.f32 %v4260_v58, %v4182_v29 }
 0x38d   : > { %v3725_v2 = vpop.f32.mrf.mxu2 }
 0x38e   : > { %v8213_v24 = vadd.f32 %v3725_v2, %v3537_v51  ;;  %v4268_v43 = vpop.f32.mrf.mxu0  ;;  %5842 = vmatmul.msk.bf16.gmra.mxu3 %vm3435_vm13, %v7910_v57  ;;  %5872 = vmatmul.msk.bf16.gmra.mxu1 %vm3435_vm13, %v8217_v63 }
 0x391   : > { %5861 = vmatmul.msk.bf16.gmra.mxu0 %vm3435_vm13, %v7996_v37  ;;  %v4109_v25 = vpop.f32.mrf.mxu3 }
 0x392   : > { %v4183_v1 = vadd.f32 %v4109_v25, %v7916_v7 }
 0x393   : > { %v3544_v58 = vpop.f32.mrf.mxu1 }
 0x394   : > { %v8224_v54 = vadd.f32 %v4263_v16, %v4183_v1  ;;  %v8237_v16 = vld [vmem:[#allocation3 + $0x34] sm:$0xff] }
 0x395   : > { %v3727_v11 = vpop.f32.mrf.mxu2 }
 0x396   : > { %v8226_v51 = vadd.f32 %v3727_v11, %v3539_v38  ;;  %v4270_v40 = vpop.f32.mrf.mxu0 }
 0x399   : > { %v4111_v6 = vpop.f32.mrf.mxu3 }
 0x39a   : > { %5889 = vmatmul.msk.bf16.gmra.mxu2 %vm3435_vm13, %v7547_v15  ;;  %v4184_v50 = vadd.f32 %v4111_v6, %v7941_v32 }
 0x39b   : > { %v3547_v44 = vpop.f32.mrf.mxu1 }
 0x39c   : > { %v8231_v10 = vadd.f32 %v4265_v26, %v4184_v50 }
 0x39d   : > { %v3730_v22 = vpop.f32.mrf.mxu2 }
 0x39e   : > { %v8233_v45 = vadd.f32 %v3730_v22, %v3542_v39  ;;  %v4273_v7 = vpop.f32.mrf.mxu0  ;;  %5843 = vmatmul.msk.bf16.gmra.mxu3 %vm3435_vm13, %v7957_v12  ;;  %5873 = vmatmul.msk.bf16.gmra.mxu1 %vm3435_vm13, %v8237_v16 }
 0x3a1   : > { %5862 = vmatmul.msk.bf16.gmra.mxu0 %vm3435_vm13, %v8046_v33  ;;  %v4114_v38 = vpop.f32.mrf.mxu3 }
 0x3a2   : > { %v4185_v32 = vadd.f32 %v4114_v38, %v7963_v55 }
 0x3a3   : > { %v3549_v26 = vpop.f32.mrf.mxu1 }
 0x3a4   : > { %v8244_v2 = vadd.f32 %v4268_v43, %v4185_v32  ;;  %v8257_v43 = vld [vmem:[#allocation3 + $0x44] sm:$0xff] }
 0x3a5   : > { %v3732_v29 = vpop.f32.mrf.mxu2 }
 0x3a6   : > { %v8246_v39 = vadd.f32 %v3732_v29, %v3544_v58  ;;  %v4275_v25 = vpop.f32.mrf.mxu0 }
 0x3a9   : > { %v4116_v1 = vpop.f32.mrf.mxu3 }
 0x3aa   : > { %5890 = vmatmul.msk.bf16.gmra.mxu2 %vm3435_vm13, %v7606_v20  ;;  %v4186_v11 = vadd.f32 %v4116_v1, %v7988_v13 }
 0x3ab   : > { %v3552_v50 = vpop.f32.mrf.mxu1 }
 0x3ac   : > { %v8251_v22 = vadd.f32 %v4270_v40, %v4186_v11 }
 0x3ad   : > { %v3735_v6 = vpop.f32.mrf.mxu2 }
 0x3ae   : > { %v8253_v52 = vadd.f32 %v3735_v6, %v3547_v44  ;;  %v4278_v55 = vpop.f32.mrf.mxu0  ;;  %5844 = vmatmul.msk.bf16.gmra.mxu3 %vm3435_vm13, %v8004_v47  ;;  %5874 = vmatmul.msk.bf16.gmra.mxu1 %vm3435_vm13, %v8257_v43 }
 0x3b1   : > { %5863 = vmatmul.msk.bf16.gmra.mxu0 %vm3435_vm13, %v8100_v18  ;;  %v4119_v58 = vpop.f32.mrf.mxu3 }
 0x3b2   : > { %v4187_v13 = vadd.f32 %v4119_v58, %v8010_v3  ;;  %v9263_v58 = vshrl.u32 %v8183_v60, 16 }
 0x3b3   : > { %v3554_v40 = vpop.f32.mrf.mxu1 }
 0x3b4   : > { %v8264_v32 = vadd.f32 %v4273_v7, %v4187_v13  ;;  %v2992_v7 = vld [vmem:[#allocation3 + $0x100] sm:$0xf]  ;;  %v4228_v13 = vrot.slane %v9263_v58, 7 }
 0x3b5   : > { %v3737_v38 = vpop.f32.mrf.mxu2 }
 0x3b6   : > { %v8266_v44 = vadd.f32 %v3737_v38, %v3549_v26  ;;  %v4280_v29 = vpop.f32.mrf.mxu0  ;;  %v8277_v26 = vld [vmem:[#allocation3 + $0x54] sm:$0xff] }
 0x3b9   : > { %v4121_v1 = vpop.f32.mrf.mxu3 }
 0x3ba   : > { %5891 = vmatmul.msk.bf16.gmra.mxu2 %vm3435_vm13, %v7643_v53  ;;  %v4188_v11 = vadd.f32 %v4121_v1, %v8038_v8 }
 0x3bb   : > { %v3557_v9 = vpop.f32.mrf.mxu1 }
 0x3bc   : > { %v8271_v33 = vadd.f32 %v4275_v25, %v4188_v11  ;;  %v4212_v25 = vshrl.u32 %v2992_v7, 16  ;;  %v9265_v11 = vshll.u32 %v8183_v60, 16 }
 0x3bd   : > { %v3740_v6 = vpop.f32.mrf.mxu2 }
 0x3be   : > { %v8273_v18 = vadd.f32 %v3740_v6, %v3552_v50  ;;  %v4283_v3 = vpop.f32.mrf.mxu0  ;;  %5845 = vmatmul.msk.bf16.gmra.mxu3 %vm3435_vm13, %v8054_v27  ;;  %5875 = vmatmul.msk.bf16.gmra.mxu1 %vm3435_vm13, %v8277_v26  ;;  %v9264_v50 = vshrl.u32 %v8158_v42, 16  ;;  %v4231_v6 = vor.u32 %v9265_v11, %v4228_v13  ;;  %v5848_v35 = vrot.slane %v4212_v25, 11 }
 0x3c0   : > { %v4219_v38 = vrot.slane %v9264_v50, 7 }
 0x3c1   : > { %5864 = vmatmul.msk.bf16.gmra.mxu0 %vm3435_vm13, %v8165_v0  ;;  %v4124_v8 = vpop.f32.mrf.mxu3  ;;  %v9266_v0 = vshll.u32 %v8158_v42, 16 }
 0x3c2   : > { %v4189_v1 = vadd.f32 %v4124_v8, %v8060_v30  ;;  %v4224_v7 = vrot.slane %v4219_v38, 4 }
 0x3c3   : > { %v3559_v20 = vpop.f32.mrf.mxu1  ;;  %v4222_v62 = vor.u32 %v9266_v0, %v4219_v38  ;;  %v8311_v38 = vld [vmem:[#allocation3 + $0x64] sm:$0xff] }
 0x3c4   : > { %v8290_v37 = vadd.f32 %v4278_v55, %v4189_v1  ;;  %v4232_v50 = vsel %vm6253_vm7, %v4224_v7, %v4231_v6 }
 0x3c5   : > { %v3742_v53 = vpop.f32.mrf.mxu2  ;;  %v4223_v30 = vsel %vm6253_vm7, %v5848_v35, %v4222_v62 }
 0x3c6   : > { %v8292_v15 = vadd.f32 %v3742_v53, %v3554_v40  ;;  %v4285_v58 = vpop.f32.mrf.mxu0  ;;  %v4236_v53 = vunpack.c.l.b16 %v4232_v50  ;;  %v4235_v13 = vunpack.c.l.b16 %v4223_v30 }
 0x3c8   : > { %v8309_v25 = vpack.c.b16 %v4236_v53, %v4235_v13 }
 0x3c9   : > { %v4126_v56 = vpop.f32.mrf.mxu3 }
 0x3ca   : > { %5892 = vmatmul.msk.bf16.gmra.mxu2 %vm3435_vm13, %v7688_v48  ;;  %v4190_v60 = vadd.f32 %v4126_v56, %v8092_v34 }
 0x3cb   : > { %v3562_v40 = vpop.f32.mrf.mxu1 }
 0x3cc   : > { %v8303_v8 = vadd.f32 %v4280_v29, %v4190_v60 }
 0x3cd   : > { %v3745_v55 = vpop.f32.mrf.mxu2 }
 0x3ce   : > { %v8305_v42 = vadd.f32 %v3745_v55, %v3557_v9  ;;  %v4288_v0 = vpop.f32.mrf.mxu0  ;;  %5846 = vmatmul.msk.bf16.gmra.mxu3 %vm3435_vm13, %v8116_v5  ;;  %5876 = vmatmul.msk.bf16.gmra.mxu1 %vm3435_vm13, %v8311_v38 }
 0x3d1   : > { %5865 = vmatmul.msk.bf16.gmra.mxu0 %vm3435_vm13, %v8309_v25  ;;  %v4129_v35 = vpop.f32.mrf.mxu3 }
 0x3d2   : > { %v4191_v34 = vadd.f32 %v4129_v35, %v8122_v41 }
 0x3d3   : > { %v3564_v9 = vpop.f32.mrf.mxu1 }
 0x3d4   : > { %v8318_v62 = vadd.f32 %v4283_v3, %v4191_v34  ;;  %v8331_v3 = vld [vmem:[#allocation3 + $0x74] sm:$0xff] }
 0x3d5   : > { %v3747_v56 = vpop.f32.mrf.mxu2 }
 0x3d6   : > { %v8320_v29 = vadd.f32 %v3747_v56, %v3559_v20  ;;  %v4290_v1 = vpop.f32.mrf.mxu0 }
 0x3d9   : > { %v4131_v11 = vpop.f32.mrf.mxu3 }
 0x3da   : > { %5893 = vmatmul.msk.bf16.gmra.mxu2 %vm3435_vm13, %v7729_v17  ;;  %v4192_v6 = vadd.f32 %v4131_v11, %v8156_v19 }
 0x3db   : > { %v3567_v50 = vpop.f32.mrf.mxu1 }
 0x3dc   : > { %v8325_v30 = vadd.f32 %v4285_v58, %v4192_v6 }
 0x3dd   : > { %v3750_v7 = vpop.f32.mrf.mxu2 }
 0x3de   : > { %v8327_v60 = vadd.f32 %v3750_v7, %v3562_v40  ;;  %v4293_v41 = vpop.f32.mrf.mxu0  ;;  %5847 = vmatmul.msk.bf16.gmra.mxu3 %vm3435_vm13, %v8175_v31  ;;  %5877 = vmatmul.msk.bf16.gmra.mxu1 %vm3435_vm13, %v8331_v3  ;;  %v9267_v7 = vld [vmem:[#allocation14_spill] sm:$0xff] }
 0x3e1   : > { %5927 = vmatmul.msk.bf16.vlgmr.msra.gmra.mxu0 %vm3435_vm13, %v8217_v63  ;;  %v4134_v20 = vpop.f32.mrf.mxu3 }
 0x3e2   : > { %v4193_v19 = vadd.f32 %v4134_v20, %v8181_v23 }
 0x3e3   : > { %v3569_v58 = vpop.f32.mrf.mxu1 }
 0x3e4   : > { %v8338_v55 = vadd.f32 %v4288_v0, %v4193_v19  ;;  %v8351_v0 = vld [vmem:[#allocation3 + $0x84] sm:$0xff] }
 0x3e5   : > { %v3752_v53 = vpop.f32.mrf.mxu2 }
 0x3e6   : > { %v8340_v40 = vadd.f32 %v3752_v53, %v3564_v9  ;;  %v4295_v13 = vpop.f32.mrf.mxu0 }
 0x3e9   : > { %v4136_v35 = vpop.f32.mrf.mxu3 }
 0x3ea   : > { %5894 = vmatmul.msk.bf16.gmra.mxu2 %vm3435_vm13, %v7779_v36  ;;  %v4194_v34 = vadd.f32 %v4136_v35, %v8202_v46 }
 0x3eb   : > { %v3572_v11 = vpop.f32.mrf.mxu1 }
 0x3ec   : > { %v8345_v6 = vadd.f32 %v4290_v1, %v4194_v34 }
 0x3ed   : > { %v3755_v56 = vpop.f32.mrf.mxu2 }
 0x3ee   : > { %v8347_v63 = vadd.f32 %v3755_v56, %v3567_v50  ;;  %v4298_v23 = vpop.f32.mrf.mxu0  ;;  %5906 = vmatmul.msk.bf16.vlgmr.msra.gmra.mxu3 %vm3435_vm13, %v9267_v7  ;;  %5878 = vmatmul.msk.bf16.gmra.mxu1 %vm3435_vm13, %v8351_v0 }
 0x3f1   : > { %5928 = vmatmul.msk.bf16.gmra.mxu0 %vm3435_vm13, %v8237_v16  ;;  %v4139_v9 = vpop.f32.mrf.mxu3 }
 0x3f2   : > { %v4195_v46 = vadd.f32 %v4139_v9, %v8213_v24 }
 0x3f3   : > { %v3574_v1 = vpop.f32.mrf.mxu1 }
 0x3f4   : > { %v8358_v19 = vadd.f32 %v4293_v41, %v4195_v46  ;;  %v9268_v41 = vld [vmem:[#allocation13_spill] sm:$0xff] }
 0x3f5   : > { %v3757_v20 = vpop.f32.mrf.mxu2 }
 0x3f6   : > { %v8360_v50 = vadd.f32 %v3757_v20, %v3569_v58  ;;  %v4300_v53 = vpop.f32.mrf.mxu0  ;;  %v8372_v58 = vld [vmem:[#allocation3 + $0x94] sm:$0xff] }
 0x3f9   : > { %v4141_v35 = vpop.f32.mrf.mxu3 }
 0x3fa   : > { %5895 = vmatmul.msk.bf16.gmra.mxu2 %vm3435_vm13, %v7820_v61  ;;  %v4196_v34 = vadd.f32 %v4141_v35, %v8226_v51 }
 0x3fb   : > { %v4387_v7 = vpop.f32.mrf.mxu1 }
 0x3fc   : > { %v8365_v28 = vadd.f32 %v4295_v13, %v4196_v34  ;;  %v4467_v24 = vadd.f32 %v4387_v7, %v8153_v21 }
 0x3fd   : > { %v3760_v56 = vpop.f32.mrf.mxu2 }
 0x3fe   : > { %v8367_v16 = vadd.f32 %v3760_v56, %v3572_v11  ;;  %v4303_v9 = vpop.f32.mrf.mxu0  ;;  %5907 = vmatmul.msk.bf16.gmra.mxu3 %vm3435_vm13, %v9268_v41  ;;  %5879 = vmatmul.msk.bf16.gmra.mxu1 %vm3435_vm13, %v8372_v58 }
 0x401   : > { %5929 = vmatmul.msk.bf16.gmra.mxu0 %vm3435_vm13, %v8257_v43  ;;  %v4144_v51 = vpop.f32.mrf.mxu3 }
 0x402   : > { %v4197_v13 = vadd.f32 %v4144_v51, %v8233_v45 }
 0x403   : > { %v4389_v11 = vpop.f32.mrf.mxu1 }
 0x404   : > { %v8379_v20 = vadd.f32 %v4298_v23, %v4197_v13  ;;  %v4468_v35 = vadd.f32 %v4389_v11, %v8178_v49  ;;  %v8394_v49 = vld [vmem:[#allocation3 + $0xa4] sm:$0xff] }
 0x405   : > { %v3762_v46 = vpop.f32.mrf.mxu2 }
 0x406   : > { %v8381_v21 = vadd.f32 %v3762_v46, %v3574_v1  ;;  %v4305_v34 = vpop.f32.mrf.mxu0  ;;  %v9269_v1 = vld [vmem:[#allocation11_spill] sm:$0xff] }
 0x409   : > { %v4146_v56 = vpop.f32.mrf.mxu3 }
 0x40a   : > { %5896 = vmatmul.msk.bf16.gmra.mxu2 %vm3435_vm13, %v7863_v59  ;;  %v4198_v7 = vadd.f32 %v4146_v56, %v8246_v39 }
 0x40b   : > { %v4392_v43 = vpop.f32.mrf.mxu1 }
 0x40c   : > { %v8387_v61 = vadd.f32 %v4300_v53, %v4198_v7  ;;  %v4469_v23 = vadd.f32 %v4392_v43, %v8200_v14 }
 0x40d   : > { %v4533_v41 = vpop.f32.mrf.mxu2 }
 0x40e   : > { %v8389_v45 = vadd.f32 %v4533_v41, %v4467_v24  ;;  %v4308_v51 = vpop.f32.mrf.mxu0  ;;  %5908 = vmatmul.msk.bf16.gmra.mxu3 %vm3435_vm13, %v9269_v1  ;;  %5880 = vmatmul.msk.bf16.gmra.mxu1 %vm3435_vm13, %v8394_v49 }
 0x411   : > { %5930 = vmatmul.msk.bf16.gmra.mxu0 %vm3435_vm13, %v8277_v26  ;;  %v4149_v39 = vpop.f32.mrf.mxu3 }
 0x412   : > { %v4199_v53 = vadd.f32 %v4149_v39, %v8253_v52 }
 0x413   : > { %v4394_v24 = vpop.f32.mrf.mxu1 }
 0x414   : > { %v8401_v46 = vadd.f32 %v4303_v9, %v4199_v53  ;;  %v4470_v11 = vadd.f32 %v4394_v24, %v8211_v4  ;;  %v8416_v4 = vld [vmem:[#allocation3 + $0xb4] sm:$0xff] }
 0x415   : > { %v4535_v13 = vpop.f32.mrf.mxu2 }
 0x416   : > { %v8403_v14 = vadd.f32 %v4535_v13, %v4468_v35  ;;  %v4310_v56 = vpop.f32.mrf.mxu0  ;;  %v9270_v35 = vld [vmem:[#allocation7_spill] sm:$0xff] }
 0x419   : > { %v4151_v7 = vpop.f32.mrf.mxu3 }
 0x41a   : > { %5897 = vmatmul.msk.bf16.gmra.mxu2 %vm3435_vm13, %v7910_v57  ;;  %v4200_v41 = vadd.f32 %v4151_v7, %v8266_v44 }
 0x41b   : > { %v4397_v26 = vpop.f32.mrf.mxu1 }
 0x41c   : > { %v8409_v1 = vadd.f32 %v4305_v34, %v4200_v41  ;;  %v4471_v9 = vadd.f32 %v4397_v26, %v8224_v54 }
 0x41d   : > { %v4538_v43 = vpop.f32.mrf.mxu2 }
 0x41e   : > { %v8411_v52 = vadd.f32 %v4538_v43, %v4469_v23  ;;  %v4313_v39 = vpop.f32.mrf.mxu0  ;;  %5909 = vmatmul.msk.bf16.gmra.mxu3 %vm3435_vm13, %v9270_v35  ;;  %5881 = vmatmul.msk.bf16.gmra.mxu1 %vm3435_vm13, %v8416_v4 }
 0x421   : > { %5931 = vmatmul.msk.bf16.gmra.mxu0 %vm3435_vm13, %v8311_v38  ;;  %v4154_v44 = vpop.f32.mrf.mxu3 }
 0x422   : > { %v4201_v34 = vadd.f32 %v4154_v44, %v8273_v18 }
 0x423   : > { %v4399_v23 = vpop.f32.mrf.mxu1 }
 0x424   : > { %v8423_v13 = vadd.f32 %v4308_v51, %v4201_v34  ;;  %v4472_v24 = vadd.f32 %v4399_v23, %v8231_v10  ;;  %v8438_v10 = vld [vmem:[#allocation3 + $0xc4] sm:$0xff] }
 0x425   : > { %v4540_v53 = vpop.f32.mrf.mxu2 }
 0x426   : > { %v8425_v54 = vadd.f32 %v4540_v53, %v4470_v11  ;;  %v4315_v7 = vpop.f32.mrf.mxu0  ;;  %v9271_v11 = vld [vmem:[#allocation15_spill] sm:$0xff] }
 0x429   : > { %v4156_v41 = vpop.f32.mrf.mxu3 }
 0x42a   : > { %5898 = vmatmul.msk.bf16.gmra.mxu2 %vm3435_vm13, %v7957_v12  ;;  %v4202_v43 = vadd.f32 %v4156_v41, %v8292_v15 }
 0x42b   : > { %v4402_v38 = vpop.f32.mrf.mxu1 }
 0x42c   : > { %v8431_v35 = vadd.f32 %v4310_v56, %v4202_v43  ;;  %v4473_v51 = vadd.f32 %v4402_v38, %v8244_v2 }
 0x42d   : > { %v4543_v26 = vpop.f32.mrf.mxu2 }
 0x42e   : > { %v8433_v18 = vadd.f32 %v4543_v26, %v4471_v9  ;;  %v4318_v44 = vpop.f32.mrf.mxu0  ;;  %5910 = vmatmul.msk.bf16.gmra.mxu3 %vm3435_vm13, %v9271_v11  ;;  %5882 = vmatmul.msk.bf16.gmra.mxu1 %vm3435_vm13, %v8438_v10 }
 0x431   : > { %5932 = vmatmul.msk.bf16.gmra.mxu0 %vm3435_vm13, %v8331_v3  ;;  %v4159_v15 = vpop.f32.mrf.mxu3 }
 0x432   : > { %v4203_v56 = vadd.f32 %v4159_v15, %v8305_v42 }
 0x433   : > { %v4404_v9 = vpop.f32.mrf.mxu1 }
 0x434   : > { %v8445_v53 = vadd.f32 %v4313_v39, %v4203_v56  ;;  %v4474_v23 = vadd.f32 %v4404_v9, %v8251_v22  ;;  %v9273_v22 = vld [vmem:[#allocation30_spill] sm:$0xff] }
 0x435   : > { %v4545_v34 = vpop.f32.mrf.mxu2 }
 0x436   : > { %v8447_v2 = vadd.f32 %v4545_v34, %v4472_v24  ;;  %v4320_v41 = vpop.f32.mrf.mxu0  ;;  %v9272_v24 = vld [vmem:[#allocation24_spill] sm:$0xff] }
 0x439   : > { %v4161_v43 = vpop.f32.mrf.mxu3 }
 0x43a   : > { %5899 = vmatmul.msk.bf16.gmra.mxu2 %vm3435_vm13, %v8004_v47  ;;  %v4204_v26 = vadd.f32 %v4161_v43, %v8320_v29 }
 0x43b   : > { %v4407_v3 = vpop.f32.mrf.mxu1 }
 0x43c   : > { %v8453_v11 = vadd.f32 %v4315_v7, %v4204_v26  ;;  %v4475_v39 = vadd.f32 %v4407_v3, %v8264_v32 }
 0x43d   : > { %v4548_v38 = vpop.f32.mrf.mxu2 }
 0x43e   : > { %v8455_v42 = vadd.f32 %v4548_v38, %v4473_v51  ;;  %v4323_v15 = vpop.f32.mrf.mxu0  ;;  %5911 = vmatmul.msk.bf16.gmra.mxu3 %vm3435_vm13, %v9272_v24  ;;  %5883 = vmatmul.msk.bf16.gmra.mxu1 %vm3435_vm13, %v9273_v22  ;;  %v9274_v22 = vld [vmem:[#allocation4_spill] sm:$0xff] }
 0x441   : > { %5933 = vmatmul.msk.bf16.gmra.mxu0 %vm3435_vm13, %v8351_v0  ;;  %v4164_v56 = vpop.f32.mrf.mxu3 }
 0x442   : > { %v4205_v29 = vadd.f32 %v4164_v56, %v8327_v60 }
 0x443   : > { %v4409_v7 = vpop.f32.mrf.mxu1 }
 0x444   : > { %v8465_v9 = vadd.f32 %v4318_v44, %v4205_v29  ;;  %v4476_v32 = vadd.f32 %v4409_v7, %v8271_v33 }
 0x445   : > { %v4550_v34 = vpop.f32.mrf.mxu2 }
 0x446   : > { %v8467_v51 = vadd.f32 %v4550_v34, %v4474_v23  ;;  %v4325_v43 = vpop.f32.mrf.mxu0  ;;  %v9275_v23 = vld [vmem:[#allocation28_spill] sm:$0xff] }
 0x449   : > { %v4166_v26 = vpop.f32.mrf.mxu3 }
 0x44a   : > { %5900 = vmatmul.msk.bf16.gmra.mxu2 %vm3435_vm13, %v8054_v27  ;;  %v4206_v38 = vadd.f32 %v4166_v26, %v8340_v40 }
 0x44b   : > { %v4412_v0 = vpop.f32.mrf.mxu1 }
 0x44c   : > { %v8473_v24 = vadd.f32 %v4320_v41, %v4206_v38  ;;  %v4477_v44 = vadd.f32 %v4412_v0, %v8290_v37 }
 0x44d   : > { %v4553_v3 = vpop.f32.mrf.mxu2 }
 0x44e   : > { %v8475_v60 = vadd.f32 %v4553_v3, %v4475_v39  ;;  %5912 = vmatmul.msk.bf16.gmra.mxu3 %vm3435_vm13, %v9274_v22  ;;  %5884 = vmatmul.msk.bf16.gmra.mxu1 %vm3435_vm13, %v9275_v23  ;;  %v4328_v56 = vpop.f32.mrf.mxu0  ;;  %v9276_v22 = vld [vmem:[#allocation8_spill] sm:$0xff] }
 0x451   : > { %5934 = vmatmul.msk.bf16.gmra.mxu0 %vm3435_vm13, %v8372_v58  ;;  %v4169_v33 = vpop.f32.mrf.mxu3 }
 0x452   : > { %v4207_v40 = vadd.f32 %v4169_v33, %v8347_v63 }
 0x453   : > { %v4414_v41 = vpop.f32.mrf.mxu1 }
 0x454   : > { %v8485_v34 = vadd.f32 %v4323_v15, %v4207_v40  ;;  %v4478_v37 = vadd.f32 %v4414_v41, %v8303_v8 }
 0x455   : > { %v4555_v29 = vpop.f32.mrf.mxu2 }
 0x456   : > { %v8487_v39 = vadd.f32 %v4555_v29, %v4476_v32  ;;  %v4330_v38 = vpop.f32.mrf.mxu0  ;;  %v9277_v32 = vld [vmem:[#allocation10_spill] sm:$0xff] }
 0x459   : > { %v4171_v7 = vpop.f32.mrf.mxu3 }
 0x45a   : > { %5901 = vmatmul.msk.bf16.gmra.mxu2 %vm3435_vm13, %v8116_v5  ;;  %v4208_v26 = vadd.f32 %v4171_v7, %v8360_v50 }
 0x45b   : > { %v4417_v3 = vpop.f32.mrf.mxu1 }
 0x45c   : > { %v8493_v0 = vadd.f32 %v4325_v43, %v4208_v26  ;;  %v4479_v15 = vadd.f32 %v4417_v3, %v8318_v62 }
 0x45d   : > { %v4558_v58 = vpop.f32.mrf.mxu2 }
 0x45e   : > { %v8495_v63 = vadd.f32 %v4558_v58, %v4477_v44  ;;  %5913 = vmatmul.msk.bf16.gmra.mxu3 %vm3435_vm13, %v9276_v22  ;;  %5885 = vmatmul.msk.bf16.gmra.mxu1 %vm3435_vm13, %v9277_v32  ;;  %v4821_v40 = vpop.f32.mrf.mxu0  ;;  %v8518_v58 = vld [vmem:[#allocation3 + $0x104] sm:$0xff] }
 0x461   : > { %5935 = vmatmul.msk.bf16.gmra.mxu0 %vm3435_vm13, %v8394_v49  ;;  %v4174_v8 = vpop.f32.mrf.mxu3 }
 0x462   : > { %v4209_v50 = vadd.f32 %v4174_v8, %v8367_v16 }
 0x463   : > { %v4419_v33 = vpop.f32.mrf.mxu1 }
 0x464   : > { %v8505_v43 = vadd.f32 %v4328_v56, %v4209_v50  ;;  %v4480_v62 = vadd.f32 %v4419_v33, %v8325_v30 }
 0x465   : > { %v4560_v23 = vpop.f32.mrf.mxu2 }
 0x466   : > { %v8507_v44 = vadd.f32 %v4560_v23, %v4478_v37  ;;  %v9278_v37 = vld [vmem:[#allocation9_spill] sm:$0xff]  ;;  %v4823_v30 = vpop.f32.mrf.mxu0  ;;  %v9279_v23 = vld [vmem:[#allocation18_spill] sm:$0xff] }
 0x469   : > { %v4176_v29 = vpop.f32.mrf.mxu3 }
 0x46a   : > { %5902 = vmatmul.msk.bf16.gmra.mxu2 %vm3435_vm13, %v8175_v31  ;;  %v4210_v41 = vadd.f32 %v4176_v29, %v8381_v21 }
 0x46b   : > { %v4422_v49 = vpop.f32.mrf.mxu1 }
 0x46c   : > { %v8513_v26 = vadd.f32 %v4330_v38, %v4210_v41  ;;  %v4481_v56 = vadd.f32 %v4422_v49, %v8338_v55  ;;  %v9280_v49 = vld [vmem:[#allocation26_spill] sm:$0xff] }
 0x46d   : > { %v4563_v7 = vpop.f32.mrf.mxu2 }
 0x46e   : > { %v8515_v16 = vadd.f32 %v4563_v7, %v4479_v15  ;;  %5914 = vmatmul.msk.bf16.gmra.mxu3 %vm3435_vm13, %v9278_v37  ;;  %5886 = vmatmul.msk.bf16.gmra.mxu1 %vm3435_vm13, %v8518_v58  ;;  %v4826_v50 = vpop.f32.mrf.mxu0 }
 0x471   : > { %5936 = vmatmul.msk.bf16.gmra.mxu0 %vm3435_vm13, %v8416_v4  ;;  %v4687_v21 = vpop.f32.mrf.mxu3 }
 0x472   : > { %v4767_v38 = vadd.f32 %v4687_v21, %v8389_v45 }
 0x473   : > { %v4424_v15 = vpop.f32.mrf.mxu1 }
 0x474   : > { %v8527_v22 = vadd.f32 %v4821_v40, %v4767_v38  ;;  %v4482_v8 = vadd.f32 %v4424_v15, %v8345_v6  ;;  %v6067_v15 = vld [vmem:[#allocation2 + $0x14] sm:$0xff] }
 0x475   : > { %v4565_v3 = vpop.f32.mrf.mxu2 }
 0x476   : > { %v8529_v55 = vadd.f32 %v4565_v3, %v4480_v62  ;;  %v9281_v62 = vld [vmem:[#allocation16_spill] sm:$0xff]  ;;  %v4828_v37 = vpop.f32.mrf.mxu0 }
 0x479   : > { %v4689_v33 = vpop.f32.mrf.mxu3 }
 0x47a   : > { %5903 = vmatmul.msk.bf16.gmra.mxu2 %vm3435_vm13, %v9279_v23  ;;  %v4768_v29 = vadd.f32 %v4689_v33, %v8403_v14 }
 0x47b   : > { %v4427_v4 = vpop.f32.mrf.mxu1 }
 0x47c   : > { %v8535_v7 = vadd.f32 %v4823_v30, %v4768_v29  ;;  %v4483_v40 = vadd.f32 %v4427_v4, %v8358_v19 }
 0x47d   : > { %v4568_v41 = vpop.f32.mrf.mxu2 }
 0x47e   : > { %v8537_v45 = vadd.f32 %v4568_v41, %v4481_v56  ;;  %5915 = vmatmul.msk.bf16.gmra.mxu3 %vm3435_vm13, %v9280_v49  ;;  %5944 = vmatmul.msk.bf16.vlgmr.msra.gmra.mxu1 %vm3435_vm13, %v9281_v62  ;;  %v9282_v49 = vld [vmem:[#allocation25_spill] sm:$0xff] }
 0x481   : > { %5937 = vmatmul.msk.bf16.gmra.mxu0 %vm3435_vm13, %v8438_v10  ;;  %v4692_v6 = vpop.f32.mrf.mxu3 }
 0x482   : > { %v4769_v14 = vadd.f32 %v4692_v6, %v8411_v52  ;;  %v4831_v52 = vpop.f32.mrf.mxu0 }
 0x483   : > { %v4429_v30 = vpop.f32.mrf.mxu1 }
 0x484   : > { %v8547_v38 = vadd.f32 %v4826_v50, %v4769_v14  ;;  %v4484_v19 = vadd.f32 %v4429_v30, %v8365_v28  ;;  %v6068_v28 = vld [vmem:[#allocation3 + $0xd4] sm:$0xff] }
 0x485   : > { %v4570_v21 = vpop.f32.mrf.mxu2 }
 0x486   : > { %v8549_v56 = vadd.f32 %v4570_v21, %v4482_v8  ;;  %v9283_v8 = vld [vmem:[#allocation12_spill] sm:$0xff] }
 0x489   : > { %v4694_v3 = vpop.f32.mrf.mxu3 }
 0x48a   : > { %5960 = vmatmul.msk.bf16.vlgmr.msra.gmra.mxu2 %vm1024_vm2, %v6067_v15  ;;  %v4770_v33 = vadd.f32 %v4694_v3, %v8425_v54  ;;  %v4833_v21 = vpop.f32.mrf.mxu0  ;;  %v6069_v3 = vld [vmem:[#allocation2 + $0x24] sm:$0xff] }
 0x48b   : > { %v4432_v10 = vpop.f32.mrf.mxu1 }
 0x48c   : > { %v8554_v41 = vadd.f32 %v4828_v37, %v4770_v33  ;;  %v4485_v50 = vadd.f32 %v4432_v10, %v8379_v20 }
 0x48d   : > { %v4573_v29 = vpop.f32.mrf.mxu2 }
 0x48e   : > { %v8556_v4 = vadd.f32 %v4573_v29, %v4483_v40  ;;  %5916 = vmatmul.msk.bf16.gmra.mxu3 %vm3435_vm13, %v9282_v49  ;;  %5945 = vmatmul.msk.bf16.gmra.mxu1 %vm3435_vm13, %v9283_v8  ;;  %v9284_v49 = vld [vmem:[#allocation29_spill] sm:$0xff] }
 0x491   : > { %5938 = vmatmul.msk.bf16.gmra.mxu0 %vm3435_vm13, %v6068_v28  ;;  %v4697_v62 = vpop.f32.mrf.mxu3 }
 0x492   : > { %v4771_v54 = vadd.f32 %v4697_v62, %v8433_v18  ;;  %v4836_v8 = vpop.f32.mrf.mxu0 }
 0x493   : > { %v4434_v14 = vpop.f32.mrf.mxu1 }
 0x494   : > { %v8565_v37 = vadd.f32 %v4831_v52, %v4771_v54  ;;  %v4486_v20 = vadd.f32 %v4434_v14, %v8387_v61  ;;  %v6070_v61 = vld [vmem:[#allocation3 + $0xe4] sm:$0xff] }
 0x495   : > { %v4575_v6 = vpop.f32.mrf.mxu2 }
 0x496   : > { %v8567_v40 = vadd.f32 %v4575_v6, %v4484_v19  ;;  %v9285_v19 = vld [vmem:[#allocation23_spill] sm:$0xff] }
 0x499   : > { %v4699_v30 = vpop.f32.mrf.mxu3 }
 0x49a   : > { %5961 = vmatmul.msk.bf16.gmra.mxu2 %vm1024_vm2, %v6069_v3  ;;  %v4772_v15 = vadd.f32 %v4699_v30, %v8447_v2  ;;  %v4838_v3 = vpop.f32.mrf.mxu0 }
 0x49b   : > { %v4437_v29 = vpop.f32.mrf.mxu1 }
 0x49c   : > { %v8572_v10 = vadd.f32 %v4833_v21, %v4772_v15  ;;  %v4487_v52 = vadd.f32 %v4437_v29, %v8401_v46  ;;  %v6071_v21 = vld [vmem:[#allocation2 + $0x34] sm:$0xff] }
 0x49d   : > { %v4578_v33 = vpop.f32.mrf.mxu2 }
 0x49e   : > { %v8574_v18 = vadd.f32 %v4578_v33, %v4485_v50  ;;  %5917 = vmatmul.msk.bf16.gmra.mxu3 %vm3435_vm13, %v9284_v49  ;;  %5946 = vmatmul.msk.bf16.gmra.mxu1 %vm3435_vm13, %v9285_v19  ;;  %v9286_v19 = vld [vmem:[#allocation31_spill] sm:$0xff] }
 0x4a1   : > { %5939 = vmatmul.msk.bf16.gmra.mxu0 %vm3435_vm13, %v6070_v61  ;;  %v4702_v28 = vpop.f32.mrf.mxu3 }
 0x4a2   : > { %v4773_v2 = vadd.f32 %v4702_v28, %v8455_v42 }
 0x4a3   : > { %v4439_v54 = vpop.f32.mrf.mxu1 }
 0x4a4   : > { %v8583_v6 = vadd.f32 %v4836_v8, %v4773_v2  ;;  %v4488_v46 = vadd.f32 %v4439_v54, %v8409_v1  ;;  %v6072_v8 = vld [vmem:[#allocation2 + $0x44] sm:$0xff]  ;;  %v8616_v54 = vld [vmem:[#allocation3 + $0x118] sm:$0xf] }
 0x4a5   : > { %v4580_v62 = vpop.f32.mrf.mxu2 }
 0x4a6   : > { %v8585_v50 = vadd.f32 %v4580_v62, %v4486_v20  ;;  %v9287_v62 = vld [vmem:[#allocation33_spill] sm:$0xff] }
 0x4a9   : > { %v4704_v14 = vpop.f32.mrf.mxu3 }
 0x4aa   : > { %5962 = vmatmul.msk.bf16.gmra.mxu2 %vm1024_vm2, %v6071_v21  ;;  %v4774_v30 = vadd.f32 %v4704_v14, %v8467_v51 }
 0x4ab   : > { %v4442_v33 = vpop.f32.mrf.mxu1 }
 0x4ac   : > { %v8590_v29 = vadd.f32 %v4838_v3, %v4774_v30  ;;  %v4489_v49 = vadd.f32 %v4442_v33, %v8423_v13  ;;  %v9102_v30 = vshrl.u32 %v8616_v54, 16  ;;  %v6073_v3 = vld [vmem:[#allocation2 + $0x54] sm:$0xff] }
 0x4ad   : > { %v4583_v15 = vpop.f32.mrf.mxu2 }
 0x4ae   : > { %v8592_v42 = vadd.f32 %v4583_v15, %v4487_v52  ;;  %5918 = vmatmul.msk.bf16.gmra.mxu3 %vm3435_vm13, %v9286_v19  ;;  %5947 = vmatmul.msk.bf16.gmra.mxu1 %vm3435_vm13, %v7688_v48  ;;  %v4662_v33 = vrot.slane %v9102_v30, 7 }
 0x4b1   : > { %5940 = vmatmul.msk.bf16.gmra.mxu0 %vm3435_vm13, %v9277_v32  ;;  %v8614_v32 = vld [vmem:[#allocation3 + $0x114] sm:$0xf] }
 0x4b2   : > { %v4651_v21 = vshrl.u32 %v8614_v32, 16  ;;  %v4654_v15 = vshll.u32 %v8614_v32, 16 }
 0x4b3   : > { %v4444_v51 = vpop.f32.mrf.mxu1 }
 0x4b4   : > { %v4490_v61 = vadd.f32 %v4444_v51, %v8431_v35 }
 0x4b5   : > { %v4585_v1 = vpop.f32.mrf.mxu2 }
 0x4b6   : > { %v8601_v20 = vadd.f32 %v4585_v1, %v4488_v46  ;;  %v6015_v1 = vld [vmem:[#allocation3 + $0x114] sm:$0xff] }
 0x4ba   : > { %5963 = vmatmul.msk.bf16.gmra.mxu2 %vm1024_vm2, %v6072_v8 }
 0x4bb   : > { %v4447_v13 = vpop.f32.mrf.mxu1 }
 0x4bc   : > { %v4491_v2 = vadd.f32 %v4447_v13, %v8445_v53  ;;  %v2996_v53 = vld [vmem:[#allocation3 + $0x110] sm:$0xf] }
 0x4bd   : > { %v4588_v52 = vpop.f32.mrf.mxu2 }
 0x4be   : > { %v8605_v28 = vadd.f32 %v4588_v52, %v4489_v49  ;;  %5919 = vmatmul.msk.bf16.gmra.mxu3 %vm3435_vm13, %v9287_v62  ;;  %5948 = vmatmul.msk.bf16.gmra.mxu1 %vm3435_vm13, %v7729_v17  ;;  %v4646_v17 = vshrl.u32 %v2996_v53, 16  ;;  %v4663_v49 = vshll.u32 %v8616_v54, 16 }
 0x4c0   : > { %v5904_v8 = vrot.slane %v4646_v17, 11  ;;  %v4665_v62 = vor.u32 %v4663_v49, %v4662_v33 }
 0x4c1   : > { %5941 = vmatmul.msk.bf16.gmra.mxu0 %vm3435_vm13, %v8518_v58  ;;  %v4653_v58 = vrot.slane %v4651_v21, 7 }
 0x4c3   : > { %v4449_v35 = vpop.f32.mrf.mxu1  ;;  %v4656_v52 = vor.u32 %v4654_v15, %v4653_v58  ;;  %v4658_v13 = vrot.slane %v4653_v58, 4  ;;  %v6074_v58 = vld [vmem:[#allocation2 + $0x64] sm:$0xff] }
 0x4c4   : > { %v4492_v14 = vadd.f32 %v4449_v35, %v8453_v11 }
 0x4c5   : > { %v4590_v48 = vpop.f32.mrf.mxu2 }
 0x4c6   : > { %v8618_v46 = vadd.f32 %v4590_v48, %v4490_v61  ;;  %v4657_v48 = vsel %vm6253_vm7, %v5904_v8, %v4656_v52  ;;  %v9289_v52 = vld [vmem:[#allocation27_spill] sm:$0xff] }
 0x4ca   : > { %5964 = vmatmul.msk.bf16.gmra.mxu2 %vm1024_vm2, %v6073_v3  ;;  %v4669_v3 = vunpack.c.l.b16 %v4657_v48 }
 0x4cb   : > { %v4452_v19 = vpop.f32.mrf.mxu1 }
 0x4cc   : > { %v4493_v61 = vadd.f32 %v4452_v19, %v8465_v9  ;;  %v4666_v9 = vsel %vm6253_vm7, %v4658_v13, %v4665_v62 }
 0x4cd   : > { %v4593_v11 = vpop.f32.mrf.mxu2  ;;  %v4670_v17 = vunpack.c.l.b16 %v4666_v9 }
 0x4ce   : > { %v8630_v51 = vadd.f32 %v4593_v11, %v4491_v2  ;;  %5920 = vmatmul.msk.bf16.gmra.mxu3 %vm3435_vm13, %v8309_v25  ;;  %5949 = vmatmul.msk.bf16.gmra.mxu1 %vm3435_vm13, %v7779_v36  ;;  %v6075_v2 = vld [vmem:[#allocation2 + $0x74] sm:$0xff] }
 0x4cf   : > { %v4671_v33 = vpack.c.b16 %v4670_v17, %v4669_v3  ;;  %v6076_v17 = vld [vmem:[#allocation2 + $0x84] sm:$0xff] }
 0x4d1   : > { %5942 = vmatmul.msk.bf16.gmra.mxu0 %vm3435_vm13, %v6015_v1 }
 0x4d3   : > { %v4454_v35 = vpop.f32.mrf.mxu1 }
 0x4d4   : > { %v4494_v36 = vadd.f32 %v4454_v35, %v8473_v24 }
 0x4d5   : > { %v4595_v25 = vpop.f32.mrf.mxu2 }
 0x4d6   : > { %v8646_v53 = vadd.f32 %v4595_v25, %v4492_v14 }
 0x4da   : > { %5965 = vmatmul.msk.bf16.gmra.mxu2 %vm1024_vm2, %v6074_v58 }
 0x4db   : > { %v4457_v19 = vpop.f32.mrf.mxu1 }
 0x4dc   : > { %v4495_v8 = vadd.f32 %v4457_v19, %v8485_v34 }
 0x4dd   : > { %v4598_v11 = vpop.f32.mrf.mxu2 }
 0x4de   : > { %v8650_v1 = vadd.f32 %v4598_v11, %v4493_v61  ;;  %5921 = vmatmul.msk.bf16.gmra.mxu3 %vm3435_vm13, %v4671_v33  ;;  %5950 = vmatmul.msk.bf16.gmra.mxu1 %vm3435_vm13, %v9289_v52  ;;  %v8685_v52 = vld [vmem:[%s9027_s8] ss:$0 sm:$0xff] }
 0x4e3   : > { %v4459_v13 = vpop.f32.mrf.mxu1 }
 0x4e4   : > { %v4496_v62 = vadd.f32 %v4459_v13, %v8493_v0 }
 0x4e5   : > { %v4600_v14 = vpop.f32.mrf.mxu2 }
 0x4e6   : > { %v8656_v24 = vadd.f32 %v4600_v14, %v4494_v36  ;;  %v8691_v14 = vld [vmem:[%s9025_s6] ss:$0 sm:$0xff] }
 0x4ea   : > { %5966 = vmatmul.msk.bf16.gmra.mxu2 %vm1024_vm2, %v6075_v2 }
 0x4eb   : > { %v4462_v9 = vpop.f32.mrf.mxu1 }
 0x4ec   : > { %v4497_v34 = vadd.f32 %v4462_v9, %v8505_v43 }
 0x4ed   : > { %v4603_v48 = vpop.f32.mrf.mxu2 }
 0x4ee   : > { %v8660_v61 = vadd.f32 %v4603_v48, %v4495_v8  ;;  %5951 = vmatmul.msk.bf16.gmra.mxu1 %vm3435_vm13, %v7863_v59  ;;  %v6077_v8 = vld [vmem:[#allocation2 + $0x94] sm:$0xff]  ;;  %v8699_v48 = vpop.f32.mrf.mxu3 }
 0x4f3   : > { %v4464_v35 = vpop.f32.mrf.mxu1 }
 0x4f4   : > { %v4498_v36 = vadd.f32 %v4464_v35, %v8513_v26  ;;  %v8679_v26 = vld [vmem:[%s9024_s5] ss:$0 sm:$0xff] }
 0x4f5   : > { %v4605_v25 = vpop.f32.mrf.mxu2 }
 0x4f6   : > { %v8665_v3 = vadd.f32 %v4605_v25, %v4496_v62 }
 0x4fa   : > { %5967 = vmatmul.msk.bf16.gmra.mxu2 %vm1024_vm2, %v6076_v17 }
 0x4fb   : > { %v4967_v58 = vpop.f32.mrf.mxu1 }
 0x4fc   : > { %v5047_v19 = vadd.f32 %v4967_v58, %v8527_v22  ;;  %v8696_v22 = vld [vmem:[%s9028_s9] ss:$0 sm:$0xff] }
 0x4fd   : > { %v4608_v0 = vpop.f32.mrf.mxu2 }
 0x4fe   : > { %v8669_v33 = vadd.f32 %v4608_v0, %v4497_v34  ;;  %5952 = vmatmul.msk.bf16.gmra.mxu1 %vm3435_vm13, %v7910_v57  ;;  %v5083_v57 = vmul.f32 %v8679_v26, %v5047_v19 }
 0x500   : > { %v5119_v9 = vadd.f32 %v8691_v14, %v5083_v57 }
 0x503   : > { %v4969_v11 = vpop.f32.mrf.mxu1 }
 0x504   : > { %v5048_v34 = vadd.f32 %v4969_v11, %v8535_v7  ;;  %v8713_v7 = vpop.f32.mrf.mxu0 }
 0x505   : > { %v4610_v43 = vpop.f32.mrf.mxu2 }
 0x506   : > { %v8673_v59 = vadd.f32 %v4610_v43, %v4498_v36  ;;  %v5084_v36 = vmul.f32 %v8679_v26, %v5048_v34 }
 0x50a   : > { %5968 = vmatmul.msk.bf16.gmra.mxu2 %vm1024_vm2, %v6077_v8  ;;  %v8721_v8 = vpop.f32.mrf.mxu3 }
 0x50b   : > { %v4972_v62 = vpop.f32.mrf.mxu1 }
 0x50c   : > { %v5049_v11 = vadd.f32 %v4972_v62, %v8547_v38 }
 0x50d   : > { %v5164_v13 = vpop.f32.mrf.mxu2 }
 0x50e   : > { %v5248_v2 = vmul.f32 %v8685_v52, %v5164_v13  ;;  %5953 = vmatmul.msk.bf16.gmra.mxu1 %vm3435_vm13, %v7957_v12  ;;  %v5120_v12 = vadd.f32 %v8691_v14, %v5084_v36  ;;  %v6078_v13 = vld [vmem:[#allocation2 + $0xa4] sm:$0xff]  ;;  %v8728_v36 = vpop.f32.mrf.mxu0 }
 0x510   : > { %v5284_v25 = vadd.f32 %v8696_v22, %v5248_v2  ;;  %v5085_v2 = vmul.f32 %v8679_v26, %v5049_v11 }
 0x512   : > { %v5316_v35 = vadd.f32 %v5284_v25, %v5119_v9  ;;  %v5121_v38 = vadd.f32 %v8691_v14, %v5085_v2 }
 0x513   : > { %v4974_v58 = vpop.f32.mrf.mxu1 }
 0x514   : > { %v5348_v17 = vmax.f32 %v5316_v35, 0.0  ;;  %v5050_v62 = vadd.f32 %v4974_v58, %v8554_v41 }
 0x515   : > { %v5166_v0 = vpop.f32.mrf.mxu2 }
 0x516   : > { %5380 = vst.msk [vmem:[%s8710_s26] sm:$0xff] %vm3435_vm13, %v5348_v17  ;;  %v5249_v43 = vmul.f32 %v8685_v52, %v5166_v0 }
 0x518   : > { %v5285_v19 = vadd.f32 %v8696_v22, %v5249_v43  ;;  %v8735_v43 = vpop.f32.mrf.mxu3 }
 0x51a   : > { %v5317_v57 = vadd.f32 %v5285_v19, %v5120_v12  ;;  %5969 = vmatmul.msk.bf16.gmra.mxu2 %vm1024_vm2, %v6078_v13  ;;  %v5086_v12 = vmul.f32 %v8679_v26, %v5050_v62 }
 0x51b   : > { %v4977_v25 = vpop.f32.mrf.mxu1 }
 0x51c   : > { %v5349_v9 = vmax.f32 %v5317_v57, 0.0  ;;  %v5122_v41 = vadd.f32 %v8691_v14, %v5086_v12  ;;  %v5051_v58 = vadd.f32 %v4977_v25, %v8565_v37 }
 0x51d   : > { %v5169_v34 = vpop.f32.mrf.mxu2 }
 0x51e   : > { %5381 = vst.msk [vmem:[%s8710_s26 + $0x8] sm:$0xff] %vm3435_vm13, %v5349_v9  ;;  %v5250_v35 = vmul.f32 %v8685_v52, %v5169_v34  ;;  %5954 = vmatmul.msk.bf16.gmra.mxu1 %vm3435_vm13, %v8004_v47  ;;  %v8744_v47 = vpop.f32.mrf.mxu0  ;;  %v6079_v34 = vld [vmem:[#allocation2 + $0xb4] sm:$0xff] }
 0x520   : > { %v5286_v17 = vadd.f32 %v8696_v22, %v5250_v35  ;;  %v5087_v35 = vmul.f32 %v8679_v26, %v5051_v58 }
 0x522   : > { %v5318_v0 = vadd.f32 %v5286_v17, %v5121_v38  ;;  %v5123_v25 = vadd.f32 %v8691_v14, %v5087_v35 }
 0x523   : > { %v4979_v57 = vpop.f32.mrf.mxu1 }
 0x524   : > { %v5350_v11 = vmax.f32 %v5318_v0, 0.0  ;;  %v8748_v0 = vpop.f32.mrf.mxu3  ;;  %v5052_v12 = vadd.f32 %v4979_v57, %v8572_v10 }
 0x525   : > { %v5171_v19 = vpop.f32.mrf.mxu2 }
 0x526   : > { %5382 = vst.msk [vmem:[%s8710_s26 + $0x10] sm:$0xff] %vm3435_vm13, %v5350_v11  ;;  %v5251_v13 = vmul.f32 %v8685_v52, %v5171_v19 }
 0x528   : > { %v5287_v2 = vadd.f32 %v8696_v22, %v5251_v13  ;;  %v8758_v13 = vpop.f32.mrf.mxu0 }
 0x52a   : > { %v5319_v9 = vadd.f32 %v5287_v2, %v5122_v41  ;;  %5970 = vmatmul.msk.bf16.gmra.mxu2 %vm1024_vm2, %v6079_v34  ;;  %v5088_v41 = vmul.f32 %v8679_v26, %v5052_v12 }
 0x52b   : > { %v4982_v17 = vpop.f32.mrf.mxu1 }
 0x52c   : > { %v5351_v38 = vmax.f32 %v5319_v9, 0.0  ;;  %v8764_v35 = vpop.f32.mrf.mxu3  ;;  %v5124_v10 = vadd.f32 %v8691_v14, %v5088_v41  ;;  %v5053_v57 = vadd.f32 %v4982_v17, %v8583_v6 }
 0x52d   : > { %v5174_v62 = vpop.f32.mrf.mxu2 }
 0x52e   : > { %5383 = vst.msk [vmem:[%s8710_s26 + $0x18] sm:$0xff] %vm3435_vm13, %v5351_v38  ;;  %v5252_v37 = vmul.f32 %v8685_v52, %v5174_v62  ;;  %5955 = vmatmul.msk.bf16.gmra.mxu1 %vm3435_vm13, %v8054_v27  ;;  %v6080_v62 = vld [vmem:[#allocation2 + $0xc4] sm:$0xff] }
 0x530   : > { %v5288_v11 = vadd.f32 %v8696_v22, %v5252_v37  ;;  %v2788_v37 = vld [vmem:[#allocation3 + $0x11c] sm:$0x1]  ;;  %v8773_v30 = vpop.f32.mrf.mxu0 }
 0x532   : > { %v5320_v19 = vadd.f32 %v5288_v11, %v5123_v25  ;;  %v5089_v25 = vmul.f32 %v8679_v26, %v5053_v57 }
 0x533   : > { %v4984_v9 = vpop.f32.mrf.mxu1 }
 0x534   : > { %v5352_v58 = vmax.f32 %v5320_v19, 0.0  ;;  %v2789_v19 = vsel %vm7415_vm15, 0, %v2788_v37  ;;  %v5125_v17 = vadd.f32 %v8691_v14, %v5089_v25  ;;  %v5054_v41 = vadd.f32 %v4984_v9, %v8590_v29  ;;  %v8785_v57 = vpop.f32.mrf.mxu3 }
 0x535   : > { %v5176_v2 = vpop.f32.mrf.mxu2  ;;  %2790 = vst [vmem:[#allocation3 + $0x11c] sm:$0x1] %v2789_v19 }
 0x536   : > { %5384 = vst.msk [vmem:[%s8710_s26 + $0x20] sm:$0xff] %vm3435_vm13, %v5352_v58  ;;  %v5253_v34 = vmul.f32 %v8685_v52, %v5176_v2 }
 0x538   : > { %v5289_v27 = vadd.f32 %v8696_v22, %v5253_v34 }
 0x53a   : > { %v5321_v38 = vadd.f32 %v5289_v27, %v5124_v10  ;;  %5971 = vmatmul.msk.bf16.gmra.mxu2 %vm1024_vm2, %v6080_v62  ;;  %v4775_v10 = vadd.f32 %v8699_v48, %v8475_v60  ;;  %v8794_v60 = vpop.f32.mrf.mxu0 }
 0x53b   : > { %v4987_v2 = vpop.f32.mrf.mxu1 }
 0x53c   : > { %v5353_v12 = vmax.f32 %v5321_v38, 0.0  ;;  %v5090_v38 = vmul.f32 %v8679_v26, %v5054_v41  ;;  %v2860_v37 = vld [vmem:[#allocation3 + $0x11c] sm:$0x1]  ;;  %v4909_v9 = vadd.f32 %v8713_v7, %v4775_v10  ;;  %v8801_v41 = vpop.f32.mrf.mxu3 }
 0x53d   : > { %v5179_v58 = vpop.f32.mrf.mxu2  ;;  %v2861_v29 = vsel %vm7415_vm15, 0, %v2860_v37  ;;  %v4777_v37 = vadd.f32 %v8735_v43, %v8495_v63  ;;  %v4933_v43 = vrot.slane %v4651_v21, 4 }
 0x53e   : > { %5385 = vst.msk [vmem:[%s8710_s26 + $0x28] sm:$0xff] %vm3435_vm13, %v5353_v12  ;;  %v5254_v6 = vmul.f32 %v8685_v52, %v5179_v58  ;;  %5956 = vmatmul.msk.bf16.gmra.mxu1 %vm3435_vm13, %v8116_v5  ;;  %v5126_v48 = vadd.f32 %v8691_v14, %v5090_v38  ;;  %v5055_v25 = vadd.f32 %v4987_v2, %v4909_v9 }
 0x53f   : > { %2862 = vst [vmem:[#allocation3 + $0x11c] sm:$0x1] %v2861_v29 }
 0x540   : > { %v5290_v34 = vadd.f32 %v8696_v22, %v5254_v6  ;;  %v4776_v6 = vadd.f32 %v8721_v8, %v8487_v39  ;;  %v5091_v7 = vmul.f32 %v8679_v26, %v5055_v25 }
 0x542   : > { %v5322_v27 = vadd.f32 %v5290_v34, %v5125_v17  ;;  %v6081_v17 = vld [vmem:[#allocation2 + $0xd4] sm:$0xff]  ;;  %v4910_v10 = vadd.f32 %v8728_v36, %v4776_v6  ;;  %v5127_v39 = vadd.f32 %v8691_v14, %v5091_v7  ;;  %v9291_v7 = vshrl.u32 %v8616_v54, 16 }
 0x543   : > { %v4989_v19 = vpop.f32.mrf.mxu1 }
 0x544   : > { %v5354_v62 = vmax.f32 %v5322_v27, 0.0  ;;  %v8817_v25 = vpop.f32.mrf.mxu3 }
 0x545   : > { %v5181_v12 = vpop.f32.mrf.mxu2 }
 0x546   : > { %5386 = vst.msk [vmem:[%s8710_s26 + $0x30] sm:$0xff] %vm3435_vm13, %v5354_v62  ;;  %v5255_v5 = vmul.f32 %v8685_v52, %v5181_v12  ;;  %v5056_v62 = vadd.f32 %v4989_v19, %v4910_v10  ;;  %v8814_v12 = vpop.f32.mrf.mxu0  ;;  %v4911_v19 = vadd.f32 %v8744_v47, %v4777_v37  ;;  %v4939_v47 = vrot.slane %v9291_v7, 4 }
 0x548   : > { %v5291_v58 = vadd.f32 %v8696_v22, %v5255_v5  ;;  %v5092_v29 = vmul.f32 %v8679_v26, %v5056_v62 }
 0x54a   : > { %v5323_v11 = vadd.f32 %v5291_v58, %v5126_v48  ;;  %5972 = vmatmul.msk.bf16.gmra.mxu2 %vm1024_vm2, %v6081_v17  ;;  %v4937_v17 = vrot.slane %v4663_v49, 5 }
 0x54b   : > { %v4992_v38 = vpop.f32.mrf.mxu1 }
 0x54c   : > { %v5355_v34 = vmax.f32 %v5323_v11, 0.0  ;;  %v5057_v6 = vadd.f32 %v4992_v38, %v4911_v19  ;;  %v4934_v11 = vrot.slane %v4654_v15, 5  ;;  %v2999_v38 = vld [vmem:[#allocation3 + $0x11c] sm:$0x1]  ;;  %v4940_v49 = vor.u32 %v4939_v47, %v4937_v17 }
 0x54d   : > { %v5184_v27 = vpop.f32.mrf.mxu2 }
 0x54e   : > { %5387 = vst.msk [vmem:[%s8710_s26 + $0x38] sm:$0xff] %vm3435_vm13, %v5355_v34  ;;  %v5256_v2 = vmul.f32 %v8685_v52, %v5184_v27  ;;  %5957 = vmatmul.msk.bf16.gmra.mxu1 %vm3435_vm13, %v8175_v31  ;;  %v5128_v31 = vadd.f32 %v8691_v14, %v5092_v29  ;;  %v4778_v34 = vadd.f32 %v8748_v0, %v8507_v44  ;;  %v6082_v27 = vld [vmem:[#allocation2 + $0xe4] sm:$0xff]  ;;  %v8843_v0 = vpop.f32.mrf.mxu3 }
 0x54f   : > { %v5093_v32 = vmul.f32 %v8679_v26, %v5057_v6  ;;  %v4935_v15 = vor.u32 %v4934_v11, %v4933_v43 }
 0x550   : > { %v5292_v8 = vadd.f32 %v8696_v22, %v5256_v2  ;;  %v8836_v2 = vpop.f32.mrf.mxu0  ;;  %v4912_v54 = vadd.f32 %v8758_v13, %v4778_v34 }
 0x551   : > { %v5129_v37 = vadd.f32 %v8691_v14, %v5093_v32 }
 0x552   : > { %v5324_v36 = vadd.f32 %v5292_v8, %v5127_v39  ;;  %v4943_v8 = vshll.u32 %v2999_v38, 16  ;;  %v4780_v38 = vadd.f32 %v8785_v57, %v8529_v55 }
 0x553   : > { %v4994_v48 = vpop.f32.mrf.mxu1 }
 0x554   : > { %v5356_v9 = vmax.f32 %v5324_v36, 0.0  ;;  %v5058_v36 = vadd.f32 %v4994_v48, %v4912_v54  ;;  %v4945_v19 = vrot.slane %v4943_v8, 5 }
 0x555   : > { %v5186_v5 = vpop.f32.mrf.mxu2 }
 0x556   : > { %5388 = vst.msk [vmem:[%s8710_s26 + $0x40] sm:$0xff] %vm3435_vm13, %v5356_v9  ;;  %v5257_v58 = vmul.f32 %v8685_v52, %v5186_v5  ;;  %v4936_v9 = vrot.slane %v4935_v15, 4  ;;  %v4941_v5 = vrot.slane %v4940_v49, 4  ;;  %v4729_v32 = vpop.f32.mrf.mxu3  ;;  %v6083_v15 = vld [vmem:[#allocation2 + $0xf4] sm:$0xff] }
 0x558   : > { %v5293_v63 = vadd.f32 %v8696_v22, %v5257_v58  ;;  %v4779_v58 = vadd.f32 %v8764_v35, %v8515_v16  ;;  %v4938_v43 = vsel %vm6283_vm10, %v4936_v9, %v4937_v17  ;;  %v4946_v7 = vsel %vm6283_vm10, %v4941_v5, %v4945_v19  ;;  %v8856_v47 = vpop.f32.mrf.mxu0 }
 0x559   : > { %v4949_v35 = vunpack.c.l.b16 %v4938_v43 }
 0x55a   : > { %v5325_v10 = vadd.f32 %v5293_v63, %v5128_v31  ;;  %5973 = vmatmul.msk.bf16.gmra.mxu2 %vm1024_vm2, %v6082_v27  ;;  %v5094_v31 = vmul.f32 %v8679_v26, %v5058_v36  ;;  %v4950_v27 = vunpack.c.l.b16 %v4946_v7  ;;  %v6084_v7 = vld [vmem:[#allocation2 + $0x104] sm:$0xff] }
 0x55b   : > { %v4997_v39 = vpop.f32.mrf.mxu1 }
 0x55c   : > { %v5357_v21 = vmax.f32 %v5325_v10, 0.0  ;;  %v5130_v34 = vadd.f32 %v8691_v14, %v5094_v31  ;;  %v4951_v49 = vpack.c.b16 %v4950_v27, %v4949_v35 }
 0x55d   : > { %v5189_v62 = vpop.f32.mrf.mxu2 }
 0x55e   : > { %5389 = vst.msk [vmem:[%s8710_s26 + $0x48] sm:$0xff] %vm3435_vm13, %v5357_v21  ;;  %v5258_v44 = vmul.f32 %v8685_v52, %v5189_v62  ;;  %5958 = vmatmul.msk.bf16.gmra.mxu1 %vm3435_vm13, %v9279_v23  ;;  %v4913_v23 = vadd.f32 %v8773_v30, %v4779_v58  ;;  %v4732_v5 = vpop.f32.mrf.mxu3 }
 0x560   : > { %v5294_v29 = vadd.f32 %v8696_v22, %v5258_v44  ;;  %v5059_v10 = vadd.f32 %v4997_v39, %v4913_v23  ;;  %v4914_v39 = vadd.f32 %v8794_v60, %v4780_v38  ;;  %v4783_v38 = vadd.f32 %v8843_v0, %v8556_v4 }
 0x561   : > { %v4784_v0 = vadd.f32 %v4729_v32, %v8567_v40  ;;  %v4785_v40 = vadd.f32 %v4732_v5, %v8574_v18 }
 0x562   : > { %v5326_v13 = vadd.f32 %v5294_v29, %v5129_v37  ;;  %v5095_v30 = vmul.f32 %v8679_v26, %v5059_v10  ;;  %v4863_v37 = vpop.f32.mrf.mxu0  ;;  %v4781_v29 = vadd.f32 %v8801_v41, %v8537_v45  ;;  %v4782_v45 = vadd.f32 %v8817_v25, %v8549_v56 }
 0x563   : > { %v4999_v48 = vpop.f32.mrf.mxu1 }
 0x564   : > { %v5358_v6 = vmax.f32 %v5326_v13, 0.0  ;;  %v5131_v55 = vadd.f32 %v8691_v14, %v5095_v30  ;;  %v5060_v57 = vadd.f32 %v4999_v48, %v4914_v39  ;;  %v4915_v31 = vadd.f32 %v8814_v12, %v4781_v29 }
 0x565   : > { %v5191_v11 = vpop.f32.mrf.mxu2  ;;  %v4916_v10 = vadd.f32 %v8836_v2, %v4782_v45  ;;  %v4917_v2 = vadd.f32 %v8856_v47, %v4783_v38  ;;  %v4918_v47 = vadd.f32 %v4863_v37, %v4784_v0 }
 0x566   : > { %5390 = vst.msk [vmem:[%s8710_s26 + $0x50] sm:$0xff] %vm3435_vm13, %v5358_v6  ;;  %v5259_v16 = vmul.f32 %v8685_v52, %v5191_v11  ;;  %v5096_v19 = vmul.f32 %v8679_v26, %v5060_v57 }
 0x568   : > { %v5295_v17 = vadd.f32 %v8696_v22, %v5259_v16  ;;  %v5132_v63 = vadd.f32 %v8691_v14, %v5096_v19 }
 0x56a   : > { %v5327_v21 = vadd.f32 %v5295_v17, %v5130_v34  ;;  %5974 = vmatmul.msk.bf16.gmra.mxu2 %vm1024_vm2, %v6083_v15  ;;  %v4866_v41 = vpop.f32.mrf.mxu0  ;;  %v4734_v34 = vpop.f32.mrf.mxu3 }
 0x56b   : > { %v5002_v54 = vpop.f32.mrf.mxu1  ;;  %v4919_v37 = vadd.f32 %v4866_v41, %v4785_v40  ;;  %v4786_v18 = vadd.f32 %v4734_v34, %v8585_v50 }
 0x56c   : > { %v5359_v62 = vmax.f32 %v5327_v21, 0.0  ;;  %v5061_v43 = vadd.f32 %v5002_v54, %v4915_v31 }
 0x56d   : > { %v5194_v8 = vpop.f32.mrf.mxu2 }
 0x56e   : > { %5391 = vst.msk [vmem:[%s8710_s26 + $0x58] sm:$0xff] %vm3435_vm13, %v5359_v62  ;;  %v5260_v44 = vmul.f32 %v8685_v52, %v5194_v8  ;;  %5959 = vmatmul.msk.bf16.gmra.mxu1 %vm3435_vm13, %v4951_v49  ;;  %v5097_v23 = vmul.f32 %v8679_v26, %v5061_v43 }
 0x570   : > { %v5296_v36 = vadd.f32 %v8696_v22, %v5260_v44  ;;  %v5133_v56 = vadd.f32 %v8691_v14, %v5097_v23 }
 0x572   : > { %v5328_v9 = vadd.f32 %v5296_v36, %v5131_v55  ;;  %v4868_v15 = vpop.f32.mrf.mxu0  ;;  %v4737_v39 = vpop.f32.mrf.mxu3 }
 0x573   : > { %v5004_v60 = vpop.f32.mrf.mxu1  ;;  %v4920_v41 = vadd.f32 %v4868_v15, %v4786_v18  ;;  %v4787_v50 = vadd.f32 %v4737_v39, %v8592_v42 }
 0x574   : > { %v5360_v58 = vmax.f32 %v5328_v9, 0.0  ;;  %v5062_v25 = vadd.f32 %v5004_v60, %v4916_v10 }
 0x575   : > { %v5196_v13 = vpop.f32.mrf.mxu2 }
 0x576   : > { %5392 = vst.msk [vmem:[%s8710_s26 + $0x60] sm:$0xff] %vm3435_vm13, %v5360_v58  ;;  %v5261_v6 = vmul.f32 %v8685_v52, %v5196_v13  ;;  %v5098_v30 = vmul.f32 %v8679_v26, %v5062_v25 }
 0x578   : > { %v5297_v11 = vadd.f32 %v8696_v22, %v5261_v6  ;;  %v5134_v44 = vadd.f32 %v8691_v14, %v5098_v30 }
 0x57a   : > { %v5329_v48 = vadd.f32 %v5297_v11, %v5132_v63  ;;  %5975 = vmatmul.msk.bf16.gmra.mxu2 %vm1024_vm2, %v6084_v7  ;;  %v4871_v58 = vpop.f32.mrf.mxu0  ;;  %v4739_v32 = vpop.f32.mrf.mxu3 }
 0x57b   : > { %v5007_v12 = vpop.f32.mrf.mxu1  ;;  %v4921_v15 = vadd.f32 %v4871_v58, %v4787_v50  ;;  %v4788_v42 = vadd.f32 %v4739_v32, %v8601_v20 }
 0x57c   : > { %v5361_v16 = vmax.f32 %v5329_v48, 0.0  ;;  %v5063_v55 = vadd.f32 %v5007_v12, %v4917_v2 }
 0x57d   : > { %v5199_v35 = vpop.f32.mrf.mxu2 }
 0x57e   : > { %5393 = vst.msk [vmem:[%s8710_s26 + $0x68] sm:$0xff] %vm3435_vm13, %v5361_v16  ;;  %v5262_v17 = vmul.f32 %v8685_v52, %v5199_v35  ;;  %v5099_v36 = vmul.f32 %v8679_v26, %v5063_v55 }
 0x580   : > { %v5298_v27 = vadd.f32 %v8696_v22, %v5262_v17  ;;  %v5135_v60 = vadd.f32 %v8691_v14, %v5099_v36 }
 0x582   : > { %v5330_v21 = vadd.f32 %v5298_v27, %v5133_v56  ;;  %v4873_v23 = vpop.f32.mrf.mxu0  ;;  %v4742_v10 = vpop.f32.mrf.mxu3 }
 0x583   : > { %v5009_v8 = vpop.f32.mrf.mxu1  ;;  %v4922_v58 = vadd.f32 %v4873_v23, %v4788_v42  ;;  %v4789_v20 = vadd.f32 %v4742_v10, %v8605_v28 }
 0x584   : > { %v5362_v62 = vmax.f32 %v5330_v21, 0.0  ;;  %v5064_v31 = vadd.f32 %v5009_v8, %v4918_v47 }
 0x585   : > { %v5201_v49 = vpop.f32.mrf.mxu2 }
 0x586   : > { %5394 = vst.msk [vmem:[%s8710_s26 + $0x70] sm:$0xff] %vm3435_vm13, %v5362_v62  ;;  %v5263_v54 = vmul.f32 %v8685_v52, %v5201_v49  ;;  %v5100_v43 = vmul.f32 %v8679_v26, %v5064_v31 }
 0x588   : > { %v5299_v4 = vadd.f32 %v8696_v22, %v5263_v54  ;;  %v5136_v16 = vadd.f32 %v8691_v14, %v5100_v43 }
 0x58a   : > { %v5331_v57 = vadd.f32 %v5299_v4, %v5134_v44  ;;  %v4876_v34 = vpop.f32.mrf.mxu0  ;;  %v4744_v55 = vpop.f32.mrf.mxu3 }
 0x58b   : > { %v5012_v19 = vpop.f32.mrf.mxu1  ;;  %v4790_v28 = vadd.f32 %v4744_v55, %v8618_v46 }
 0x58c   : > { %v5363_v29 = vmax.f32 %v5331_v57, 0.0  ;;  %v5065_v35 = vadd.f32 %v5012_v19, %v4919_v37 }
 0x58d   : > { %v5204_v9 = vpop.f32.mrf.mxu2 }
 0x58e   : > { %5395 = vst.msk [vmem:[%s8710_s26 + $0x78] sm:$0xff] %vm3435_vm13, %v5363_v29  ;;  %v5264_v13 = vmul.f32 %v8685_v52, %v5204_v9  ;;  %v5101_v17 = vmul.f32 %v8679_v26, %v5065_v35 }
 0x590   : > { %v5300_v6 = vadd.f32 %v8696_v22, %v5264_v13  ;;  %v5137_v21 = vadd.f32 %v8691_v14, %v5101_v17 }
 0x592   : > { %v5332_v63 = vadd.f32 %v5300_v6, %v5135_v60  ;;  %v4878_v29 = vpop.f32.mrf.mxu0  ;;  %v4747_v31 = vpop.f32.mrf.mxu3 }
 0x593   : > { %v5014_v48 = vpop.f32.mrf.mxu1  ;;  %v4791_v46 = vadd.f32 %v4747_v31, %v8630_v51 }
 0x594   : > { %v5364_v11 = vmax.f32 %v5332_v63, 0.0  ;;  %v5066_v30 = vadd.f32 %v5014_v48, %v4920_v41 }
 0x595   : > { %v5206_v45 = vpop.f32.mrf.mxu2 }
 0x596   : > { %5396 = vst.msk [vmem:[%s8710_s26 + $0x80] sm:$0xff] %vm3435_vm13, %v5364_v11  ;;  %v5265_v7 = vmul.f32 %v8685_v52, %v5206_v45  ;;  %v5102_v8 = vmul.f32 %v8679_v26, %v5066_v30 }
 0x598   : > { %v5301_v12 = vadd.f32 %v8696_v22, %v5265_v7  ;;  %v5138_v0 = vadd.f32 %v8691_v14, %v5102_v8  ;;  %v4923_v7 = vadd.f32 %v4876_v34, %v4789_v20 }
 0x59a   : > { %v5333_v5 = vadd.f32 %v5301_v12, %v5136_v16  ;;  %v4881_v37 = vpop.f32.mrf.mxu0  ;;  %v4749_v18 = vpop.f32.mrf.mxu3 }
 0x59b   : > { %v5017_v27 = vpop.f32.mrf.mxu1  ;;  %v4792_v51 = vadd.f32 %v4749_v18, %v8646_v53 }
 0x59c   : > { %v5365_v56 = vmax.f32 %v5333_v5, 0.0  ;;  %v5067_v57 = vadd.f32 %v5017_v27, %v4921_v15  ;;  %v4924_v27 = vadd.f32 %v4878_v29, %v4790_v28 }
 0x59d   : > { %v5209_v25 = vpop.f32.mrf.mxu2 }
 0x59e   : > { %5397 = vst.msk [vmem:[%s8710_s26 + $0x88] sm:$0xff] %vm3435_vm13, %v5365_v56  ;;  %v5266_v38 = vmul.f32 %v8685_v52, %v5209_v25  ;;  %v5103_v9 = vmul.f32 %v8679_v26, %v5067_v57 }
 0x5a0   : > { %v5302_v62 = vadd.f32 %v8696_v22, %v5266_v38  ;;  %v5139_v6 = vadd.f32 %v8691_v14, %v5103_v9 }
 0x5a2   : > { %v5334_v49 = vadd.f32 %v5302_v62, %v5137_v21  ;;  %v4883_v38 = vpop.f32.mrf.mxu0  ;;  %v4752_v34 = vpop.f32.mrf.mxu3 }
 0x5a3   : > { %v5019_v44 = vpop.f32.mrf.mxu1  ;;  %v4793_v53 = vadd.f32 %v4752_v34, %v8650_v1 }
 0x5a4   : > { %v5366_v2 = vmax.f32 %v5334_v49, 0.0  ;;  %v5068_v40 = vadd.f32 %v5019_v44, %v4922_v58  ;;  %v4925_v44 = vadd.f32 %v4881_v37, %v4791_v46 }
 0x5a5   : > { %v5211_v54 = vpop.f32.mrf.mxu2 }
 0x5a6   : > { %5398 = vst.msk [vmem:[%s8710_s26 + $0x90] sm:$0xff] %vm3435_vm13, %v5366_v2  ;;  %v5267_v4 = vmul.f32 %v8685_v52, %v5211_v54  ;;  %v5104_v43 = vmul.f32 %v8679_v26, %v5068_v40 }
 0x5a8   : > { %v5303_v36 = vadd.f32 %v8696_v22, %v5267_v4  ;;  %v5140_v16 = vadd.f32 %v8691_v14, %v5104_v43 }
 0x5aa   : > { %v5335_v39 = vadd.f32 %v5303_v36, %v5138_v0  ;;  %v4886_v57 = vpop.f32.mrf.mxu0 }
 0x5ab   : > { %v5022_v13 = vpop.f32.mrf.mxu1 }
 0x5ac   : > { %v5367_v19 = vmax.f32 %v5335_v39, 0.0  ;;  %v5069_v35 = vadd.f32 %v5022_v13, %v4923_v7  ;;  %v4754_v13 = vpop.f32.mrf.mxu3 }
 0x5ad   : > { %v5214_v47 = vpop.f32.mrf.mxu2  ;;  %v4794_v1 = vadd.f32 %v4754_v13, %v8656_v24 }
 0x5ae   : > { %5399 = vst.msk [vmem:[%s8710_s26 + $0x98] sm:$0xff] %vm3435_vm13, %v5367_v19  ;;  %v5268_v60 = vmul.f32 %v8685_v52, %v5214_v47  ;;  %v5105_v10 = vmul.f32 %v8679_v26, %v5069_v35  ;;  %v4926_v19 = vadd.f32 %v4883_v38, %v4792_v51 }
 0x5b0   : > { %v5304_v63 = vadd.f32 %v8696_v22, %v5268_v60  ;;  %v5141_v21 = vadd.f32 %v8691_v14, %v5105_v10 }
 0x5b2   : > { %v5336_v32 = vadd.f32 %v5304_v63, %v5139_v6  ;;  %v4888_v40 = vpop.f32.mrf.mxu0 }
 0x5b3   : > { %v5024_v48 = vpop.f32.mrf.mxu1  ;;  %v4928_v18 = vadd.f32 %v4888_v40, %v4794_v1 }
 0x5b4   : > { %v5368_v11 = vmax.f32 %v5336_v32, 0.0  ;;  %v5070_v30 = vadd.f32 %v5024_v48, %v4924_v27 }
 0x5b5   : > { %v5216_v45 = vpop.f32.mrf.mxu2 }
 0x5b6   : > { %5400 = vst.msk [vmem:[%s8710_s26 + $0xa0] sm:$0xff] %vm3435_vm13, %v5368_v11  ;;  %v5269_v23 = vmul.f32 %v8685_v52, %v5216_v45  ;;  %v5106_v49 = vmul.f32 %v8679_v26, %v5070_v30  ;;  %v4927_v11 = vadd.f32 %v4886_v57, %v4793_v53 }
 0x5b8   : > { %v5305_v12 = vadd.f32 %v8696_v22, %v5269_v23  ;;  %v5142_v15 = vadd.f32 %v8691_v14, %v5106_v49  ;;  %v4757_v23 = vpop.f32.mrf.mxu3 }
 0x5b9   : > { %v4795_v24 = vadd.f32 %v4757_v23, %v8660_v61 }
 0x5ba   : > { %v5337_v5 = vadd.f32 %v5305_v12, %v5140_v16  ;;  %v4891_v10 = vpop.f32.mrf.mxu0 }
 0x5bb   : > { %v5027_v25 = vpop.f32.mrf.mxu1  ;;  %v4929_v46 = vadd.f32 %v4891_v10, %v4795_v24 }
 0x5bc   : > { %v5369_v17 = vmax.f32 %v5337_v5, 0.0  ;;  %v5071_v4 = vadd.f32 %v5027_v25, %v4925_v44 }
 0x5bd   : > { %v5219_v56 = vpop.f32.mrf.mxu2 }
 0x5be   : > { %5401 = vst.msk [vmem:[%s8710_s26 + $0xa8] sm:$0xff] %vm3435_vm13, %v5369_v17  ;;  %v5270_v41 = vmul.f32 %v8685_v52, %v5219_v56  ;;  %v5107_v42 = vmul.f32 %v8679_v26, %v5071_v4 }
 0x5c0   : > { %v5306_v62 = vadd.f32 %v8696_v22, %v5270_v41  ;;  %v5143_v58 = vadd.f32 %v8691_v14, %v5107_v42  ;;  %v4759_v38 = vpop.f32.mrf.mxu3 }
 0x5c1   : > { %v4796_v61 = vadd.f32 %v4759_v38, %v8665_v3 }
 0x5c2   : > { %v5338_v50 = vadd.f32 %v5306_v62, %v5141_v21 }
 0x5c3   : > { %v5029_v54 = vpop.f32.mrf.mxu1 }
 0x5c4   : > { %v5370_v8 = vmax.f32 %v5338_v50, 0.0  ;;  %v5072_v60 = vadd.f32 %v5029_v54, %v4926_v19 }
 0x5c5   : > { %v5221_v2 = vpop.f32.mrf.mxu2 }
 0x5c6   : > { %5402 = vst.msk [vmem:[%s8710_s26 + $0xb0] sm:$0xff] %vm3435_vm13, %v5370_v8  ;;  %v5271_v55 = vmul.f32 %v8685_v52, %v5221_v2  ;;  %v5108_v63 = vmul.f32 %v8679_v26, %v5072_v60  ;;  %v4893_v2 = vpop.f32.mrf.mxu0 }
 0x5c7   : > { %v4930_v57 = vadd.f32 %v4893_v2, %v4796_v61 }
 0x5c8   : > { %v5307_v0 = vadd.f32 %v8696_v22, %v5271_v55  ;;  %v5144_v48 = vadd.f32 %v8691_v14, %v5108_v63  ;;  %v4762_v4 = vpop.f32.mrf.mxu3 }
 0x5c9   : > { %v4797_v3 = vadd.f32 %v4762_v4, %v8669_v33 }
 0x5ca   : > { %v5339_v36 = vadd.f32 %v5307_v0, %v5142_v15 }
 0x5cb   : > { %v5032_v9 = vpop.f32.mrf.mxu1 }
 0x5cc   : > { %v5371_v39 = vmax.f32 %v5339_v36, 0.0  ;;  %v5073_v37 = vadd.f32 %v5032_v9, %v4927_v11 }
 0x5cd   : > { %v5224_v29 = vpop.f32.mrf.mxu2 }
 0x5ce   : > { %5403 = vst.msk [vmem:[%s8710_s26 + $0xb8] sm:$0xff] %vm3435_vm13, %v5371_v39  ;;  %v5272_v47 = vmul.f32 %v8685_v52, %v5224_v29  ;;  %v5109_v35 = vmul.f32 %v8679_v26, %v5073_v37  ;;  %v4896_v29 = vpop.f32.mrf.mxu0 }
 0x5cf   : > { %v4931_v60 = vadd.f32 %v4896_v29, %v4797_v3 }
 0x5d0   : > { %v5308_v31 = vadd.f32 %v8696_v22, %v5272_v47  ;;  %v5145_v56 = vadd.f32 %v8691_v14, %v5109_v35  ;;  %v4764_v53 = vpop.f32.mrf.mxu3 }
 0x5d1   : > { %v4798_v33 = vadd.f32 %v4764_v53, %v8673_v59 }
 0x5d2   : > { %v5340_v6 = vadd.f32 %v5308_v31, %v5143_v58 }
 0x5d3   : > { %v5034_v43 = vpop.f32.mrf.mxu1 }
 0x5d4   : > { %v5372_v20 = vmax.f32 %v5340_v6, 0.0  ;;  %v5074_v25 = vadd.f32 %v5034_v43, %v4928_v18 }
 0x5d5   : > { %v5226_v32 = vpop.f32.mrf.mxu2 }
 0x5d6   : > { %5404 = vst.msk [vmem:[%s8710_s26 + $0xc0] sm:$0xff] %vm3435_vm13, %v5372_v20  ;;  %v5273_v45 = vmul.f32 %v8685_v52, %v5226_v32  ;;  %v5110_v21 = vmul.f32 %v8679_v26, %v5074_v25  ;;  %v4898_v32 = vpop.f32.mrf.mxu0 }
 0x5d7   : > { %v4932_v37 = vadd.f32 %v4898_v32, %v4798_v33 }
 0x5d8   : > { %v5309_v7 = vadd.f32 %v8696_v22, %v5273_v45  ;;  %v5146_v34 = vadd.f32 %v8691_v14, %v5110_v21 }
 0x5da   : > { %v5341_v16 = vadd.f32 %v5309_v7, %v5144_v48 }
 0x5db   : > { %v5037_v17 = vpop.f32.mrf.mxu1 }
 0x5dc   : > { %v5373_v12 = vmax.f32 %v5341_v16, 0.0  ;;  %v5075_v49 = vadd.f32 %v5037_v17, %v4929_v46 }
 0x5dd   : > { %v5229_v28 = vpop.f32.mrf.mxu2 }
 0x5de   : > { %5405 = vst.msk [vmem:[%s8710_s26 + $0xc8] sm:$0xff] %vm3435_vm13, %v5373_v12  ;;  %v5274_v5 = vmul.f32 %v8685_v52, %v5229_v28  ;;  %v5111_v55 = vmul.f32 %v8679_v26, %v5075_v49 }
 0x5e0   : > { %v5310_v27 = vadd.f32 %v8696_v22, %v5274_v5  ;;  %v5147_v36 = vadd.f32 %v8691_v14, %v5111_v55 }
 0x5e2   : > { %v5342_v41 = vadd.f32 %v5310_v27, %v5145_v56 }
 0x5e3   : > { %v5039_v54 = vpop.f32.mrf.mxu1 }
 0x5e4   : > { %v5374_v30 = vmax.f32 %v5342_v41, 0.0  ;;  %v5076_v42 = vadd.f32 %v5039_v54, %v4930_v57 }
 0x5e5   : > { %v5231_v62 = vpop.f32.mrf.mxu2 }
 0x5e6   : > { %5406 = vst.msk [vmem:[%s8710_s26 + $0xd0] sm:$0xff] %vm3435_vm13, %v5374_v30  ;;  %v5275_v50 = vmul.f32 %v8685_v52, %v5231_v62  ;;  %v5112_v47 = vmul.f32 %v8679_v26, %v5076_v42 }
 0x5e8   : > { %v5311_v8 = vadd.f32 %v8696_v22, %v5275_v50  ;;  %v5148_v6 = vadd.f32 %v8691_v14, %v5112_v47 }
 0x5ea   : > { %v5343_v44 = vadd.f32 %v5311_v8, %v5146_v34 }
 0x5eb   : > { %v5042_v19 = vpop.f32.mrf.mxu1 }
 0x5ec   : > { %v5375_v15 = vmax.f32 %v5343_v44, 0.0  ;;  %v5077_v40 = vadd.f32 %v5042_v19, %v4931_v60 }
 0x5ed   : > { %v5234_v0 = vpop.f32.mrf.mxu2 }
 0x5ee   : > { %5407 = vst.msk [vmem:[%s8710_s26 + $0xd8] sm:$0xff] %vm3435_vm13, %v5375_v15  ;;  %v5276_v51 = vmul.f32 %v8685_v52, %v5234_v0  ;;  %v5113_v43 = vmul.f32 %v8679_v26, %v5077_v40 }
 0x5f0   : > { %v5312_v39 = vadd.f32 %v8696_v22, %v5276_v51  ;;  %v5149_v23 = vadd.f32 %v8691_v14, %v5113_v43 }
 0x5f2   : > { %v5344_v9 = vadd.f32 %v5312_v39, %v5147_v36 }
 0x5f3   : > { %v5044_v45 = vpop.f32.mrf.mxu1 }
 0x5f4   : > { %v5376_v13 = vmax.f32 %v5344_v9, 0.0  ;;  %v5078_v1 = vadd.f32 %v5044_v45, %v4932_v37 }
 0x5f5   : > { %v5236_v58 = vpop.f32.mrf.mxu2 }
 0x5f6   : > { %5408 = vst.msk [vmem:[%s8710_s26 + $0xe0] sm:$0xff] %vm3435_vm13, %v5376_v13  ;;  %v5277_v31 = vmul.f32 %v8685_v52, %v5236_v58  ;;  %v5114_v35 = vmul.f32 %v8679_v26, %v5078_v1 }
 0x5f8   : > { %v5313_v63 = vadd.f32 %v8696_v22, %v5277_v31  ;;  %v5150_v5 = vadd.f32 %v8691_v14, %v5114_v35 }
 0x5fa   : > { %v5345_v20 = vadd.f32 %v5313_v63, %v5148_v6 }
 0x5fc   : > { %v5377_v11 = vmax.f32 %v5345_v20, 0.0 }
 0x5fd   : > { %v5239_v48 = vpop.f32.mrf.mxu2 }
 0x5fe   : > { %5409 = vst.msk [vmem:[%s8710_s26 + $0xe8] sm:$0xff] %vm3435_vm13, %v5377_v11  ;;  %v5278_v7 = vmul.f32 %v8685_v52, %v5239_v48 }
 0x600   : > { %v5314_v16 = vadd.f32 %v8696_v22, %v5278_v7 }
 0x602   : > { %v5346_v59 = vadd.f32 %v5314_v16, %v5149_v23 }
 0x604   : > { %v5378_v12 = vmax.f32 %v5346_v59, 0.0 }
 0x605   : > { %v5241_v28 = vpop.f32.mrf.mxu2 }
 0x606   : > { %5410 = vst.msk [vmem:[%s8710_s26 + $0xf0] sm:$0xff] %vm3435_vm13, %v5378_v12  ;;  %v5279_v18 = vmul.f32 %v8685_v52, %v5241_v28 }
 0x608   : > { %v5315_v10 = vadd.f32 %v8696_v22, %v5279_v18 }
 0x60a   : > { %v5347_v17 = vadd.f32 %v5315_v10, %v5150_v5 }
 0x60c   : > { %v5379_v56 = vmax.f32 %v5347_v17, 0.0 }
 0x60e   : > { %5411 = vst.msk [vmem:[%s8710_s26 + $0xf8] sm:$0xff] %vm3435_vm13, %v5379_v56 }
 0x60f PF: > { %s20_s13 = sadd.s32 1, %s6091_s13  }
 0x610   : > { %p17_p4 = scmp.ge.s32.totalorder %s20_s13, 4  }
 0x612   :  { %19 = sbr.rel (!%p17_p4) target bundleno = 1 (0x1), region = 110 }

</bundles_post_ra>
